<compile_context>
chip_gen: v7x
topology: tpu7x:2x2x1
jax: 0.10.0
libtpu: 0.0.40
codegen_flags: <defaults>
</compile_context>

<pallas_src>
import functools

import jax
import jax.numpy as jnp
from jax.experimental import pallas as pl
from jax.experimental.pallas import tpu as pltpu


def _round_up(x, m):
    return (x + m - 1) // m * m


_VMEM_FUSED = 48 * 1024 * 1024
_VMEM_HEAD = 32 * 1024 * 1024


# ---------------------------------------------------------------------------
# Kernel 1: FUSED  stem 3x3/s2 conv (+ReLU6)
#                  -> expand 1x1 (+ReLU6) -> depthwise 3x3 (+ReLU6)
#                  -> project 1x1 -> residual add.
# Grid over batch.  Column j of every in-kernel tensor corresponds to output
# column x = j - 1 (j = 0 is the left zero halo of the depthwise conv).
# ---------------------------------------------------------------------------
def _fused_stem_block_kernel(s_ref, w48_ref, bs_ref, we_ref, be_ref,
                             wd_ref, bd_ref, wp_ref, bp_ref, o_ref,
                             *, ho, wo, wt):
    # s_ref:  (1, ho, wt, 48) bf16   K=48 space-to-depth stem input (pad cols are zero)
    # w48:    (48, 32) bf16          bs: (1, 32) f32
    # we:     (32, 64) bf16          be: (1, 64) f32
    # wd:     (9, 1, 64) f32         bd: (1, 64) f32
    # wp:     (64, 32) bf16          bp: (1, 32) f32
    # o_ref:  (1, ho, wt, 32) bf16   (columns 1..wo are real; rest masked by the head)
    cs = bs_ref.shape[1]
    ce = be_ref.shape[1]

    # --- stem: single K=48 matmul + bias + ReLU6 (f32 accumulation) ---
    s = s_ref[0]                                               # (ho, wt, 48) bf16
    x1 = jnp.dot(s.reshape(ho * wt, 48), w48_ref[...],
                 preferred_element_type=jnp.float32) + bs_ref[...]
    x1 = jnp.clip(x1, 0.0, 6.0)                                # (ho*wt, 32) f32

    # --- expand 1x1 + bias + ReLU6; zero the halo/pad columns ---
    t = jnp.dot(x1.astype(jnp.bfloat16), we_ref[...],
                preferred_element_type=jnp.float32) + be_ref[...]
    t = jnp.clip(t, 0.0, 6.0).reshape(ho, wt, ce)
    col = jax.lax.broadcasted_iota(jnp.int32, (1, wt, 1), 1)
    t = jnp.where((col >= 1) & (col <= wo), t, 0.0)            # zero depthwise column halo

    # --- zero row halo on the cheap major axis ---
    zrow = jnp.zeros((1, wt, ce), jnp.float32)
    t_pad = jnp.concatenate([zrow, t, zrow], axis=0)           # (ho+2, wt, ce)

    # --- depthwise 3x3 + bias + ReLU6.
    #     dx shifts via pltpu.roll (XLU), dy shifts via major-axis slices (free). ---
    r1 = pltpu.roll(t_pad, wt - 1, 1)                          # r1[:, j] = t_pad[:, j+1]
    r2 = pltpu.roll(t_pad, wt - 2, 1)                          # r2[:, j] = t_pad[:, j+2]
    rolls = (t_pad, r1, r2)
    acc = jnp.zeros((ho, wt, ce), jnp.float32)
    for dy in range(3):                                        # static, unrolled at trace
        for dx in range(3):
            acc += rolls[dx][dy:dy + ho] * wd_ref[dy * 3 + dx]
    acc = jnp.clip(acc + bd_ref[...], 0.0, 6.0)

    # --- project 1x1 (linear) + residual add (column-aligned, no sliced read) ---
    pr = jnp.dot(acc.reshape(ho * wt, ce).astype(jnp.bfloat16), wp_ref[...],
                 preferred_element_type=jnp.float32) + bp_ref[...]
    x2 = pr + x1                                               # (ho*wt, 32) f32
    o_ref[0] = x2.reshape(ho, wt, cs).astype(o_ref.dtype)


# ---------------------------------------------------------------------------
# Kernel 2: fused head — 1x1 conv to 1280 (+ReLU6) + global average pool
#           + Linear(1280, embed) + ReLU (+ eval-mode dropout = identity).
# Grid (batch, spatial row-tiles); the 1280-channel feature map never hits HBM.
# m_ref carries 1/(ho*wo) at valid positions and 0 at pad columns, so masking
# and the AdaptiveAvgPool2d((1,1)) scale are a single VPU multiply.
# ---------------------------------------------------------------------------
def _head_kernel(x_ref, m_ref, wl_ref, bl_ref, wf_ref, bf_ref, o_ref, acc_ref):
    j = pl.program_id(1)

    @pl.when(j == 0)
    def _():
        acc_ref[...] = jnp.zeros_like(acc_ref)

    f = jnp.dot(x_ref[0], wl_ref[...], preferred_element_type=jnp.float32) + bl_ref[...]
    f = jnp.clip(f, 0.0, 6.0)                                  # ReLU6 of the final 1x1 conv
    acc_ref[...] += jnp.sum(f * m_ref[...], axis=0, keepdims=True)

    @pl.when(j == pl.num_programs(1) - 1)
    def _():
        pooled = acc_ref[...]                                  # already scaled by 1/(ho*wo)
        z = jnp.dot(pooled.astype(jnp.bfloat16), wf_ref[...],
                    preferred_element_type=jnp.float32) + bf_ref[...]
        # TODO(synk): nn.Dropout(0.3) train-mode masking not emitted (eval => identity).
        o_ref[0] = jnp.maximum(z, 0.0).astype(o_ref.dtype)


# ---------------------------------------------------------------------------
# EncoderCNN wrapper
# ---------------------------------------------------------------------------
class EncoderCNNPallas:
    def __init__(self, embed_size, key, train_CNN=False):
        self.embed_size = embed_size
        self.train_CNN = train_CNN          # backbone grads frozen in torch; fwd-only here

        c_in, c_stem, c_exp, c_feat = 3, 32, 64, 1280
        self.c_in, self.c_stem, self.c_exp, self.c_feat = c_in, c_stem, c_exp, c_feat
        ks = jax.random.split(key, 12)
        s = 0.05
        f32, b16 = jnp.float32, jnp.bfloat16

        # f32 master parameters (mirror the torch module structure; BN folded into biases)
        self.w_stem = jax.random.normal(ks[0], (3, 3, c_in, c_stem), f32) * s
        self.b_stem = jax.random.normal(ks[1], (c_stem,), f32) * s
        self.w_exp = jax.random.normal(ks[2], (c_stem, c_exp), f32) * s
        self.b_exp = jax.random.normal(ks[3], (c_exp,), f32) * s
        self.w_dw = jax.random.normal(ks[4], (3, 3, c_exp), f32) * s
        self.b_dw = jax.random.normal(ks[5], (c_exp,), f32) * s
        self.w_proj = jax.random.normal(ks[6], (c_exp, c_stem), f32) * s
        self.b_proj = jax.random.normal(ks[7], (c_stem,), f32) * s
        self.w_last = jax.random.normal(ks[8], (c_stem, c_feat), f32) * s
        self.b_last = jax.random.normal(ks[9], (c_feat,), f32) * s
        self.w_fc = jax.random.normal(ks[10], (c_feat, embed_size), f32) * s   # nn.Linear
        self.b_fc = jax.random.normal(ks[11], (embed_size,), f32) * s

        # --- kernel-ready forms (bf16 MXU operands, f32 biases / depthwise weights) ---
        # stem 3x3/s2 re-expressed as ONE K=48 matmul over a 2x2 space-to-depth tap slab.
        wpad = jnp.pad(self.w_stem, ((0, 1), (0, 1), (0, 0), (0, 0)))          # (4,4,Cin,Cs)
        w48 = wpad.reshape(2, 2, 2, 2, c_in, c_stem).transpose(0, 2, 1, 3, 4, 5)
        self.w48 = w48.reshape(4 * 4 * c_in, c_stem).astype(b16)               # (48, Cs)
        self.bs2 = self.b_stem.reshape(1, c_stem)
        self.we_b16 = self.w_exp.astype(b16)
        self.be2 = self.b_exp.reshape(1, c_exp)
        self.wd2 = self.w_dw.reshape(9, 1, c_exp)                              # f32
        self.bd2 = self.b_dw.reshape(1, c_exp)
        self.wp_b16 = self.w_proj.astype(b16)
        self.bp2 = self.b_proj.reshape(1, c_stem)
        self.w_last_b16 = self.w_last.astype(b16)
        self.b_last2 = self.b_last.reshape(1, c_feat)
        self.w_fc_b16 = self.w_fc.astype(b16)
        self.b_fc2 = self.b_fc.reshape(1, embed_size)

        # jit the whole forward so the NCHW->NHWC transpose / pad / space-to-depth tap
        # gather / bf16 cast fuse into a single XLA preprocessing pass before the kernels.
        self._forward_jit = jax.jit(self._forward)

    # ------------------------- stage wrappers -------------------------
    def _build_stem_slab(self, images_nchw, ho, wo, wt):
        # K=48 slab: channel order (qy, qx, ry, rx, ci); column j corresponds to x = j-1.
        x = jnp.transpose(images_nchw, (0, 2, 3, 1)).astype(jnp.float32)       # NHWC
        xp = jnp.pad(x, ((0, 0), (1, 1), (1, 1), (0, 0)))
        taps = [xp[:, 2 * qy + ry: 2 * qy + ry + 2 * ho: 2,
                   2 * qx + rx: 2 * qx + rx + 2 * wo: 2, :]
                for qy in range(2) for qx in range(2)
                for ry in range(2) for rx in range(2)]
        slab = jnp.concatenate(taps, axis=-1)                                  # (n,ho,wo,48)
        slab = jnp.pad(slab, ((0, 0), (0, 0), (1, wt - wo - 1), (0, 0)))
        return slab.astype(jnp.bfloat16)                                       # (n,ho,wt,48)

    def _fused_stem_block(self, slab, ho, wo, wt):
        n = slab.shape[0]
        cs, ce = self.c_stem, self.c_exp
        return pl.pallas_call(
            functools.partial(_fused_stem_block_kernel, ho=ho, wo=wo, wt=wt),
            out_shape=jax.ShapeDtypeStruct((n, ho, wt, cs), jnp.bfloat16),
            grid=(n,),
            in_specs=[
                pl.BlockSpec((1, ho, wt, 4 * 4 * self.c_in), lambda i: (i, 0, 0, 0)),
                pl.BlockSpec((4 * 4 * self.c_in, cs), lambda i: (0, 0)),
                pl.BlockSpec((1, cs), lambda i: (0, 0)),
                pl.BlockSpec((cs, ce), lambda i: (0, 0)),
                pl.BlockSpec((1, ce), lambda i: (0, 0)),
                pl.BlockSpec((9, 1, ce), lambda i: (0, 0, 0)),
                pl.BlockSpec((1, ce), lambda i: (0, 0)),
                pl.BlockSpec((ce, cs), lambda i: (0, 0)),
                pl.BlockSpec((1, cs), lambda i: (0, 0)),
            ],
            out_specs=pl.BlockSpec((1, ho, wt, cs), lambda i: (i, 0, 0, 0)),
            compiler_params=pltpu.CompilerParams(
                dimension_semantics=("parallel",), vmem_limit_bytes=_VMEM_FUSED),
        )(slab, self.w48, self.bs2, self.we_b16, self.be2,
          self.wd2, self.bd2, self.wp_b16, self.bp2)

    def _head(self, x2, ho, wo, wt):
        n = x2.shape[0]
        cs, cf, e = self.c_stem, self.c_feat, self.embed_size
        s = ho * wt
        # row tile: divides ho exactly (no pad copy), ~2048 flattened rows per step.
        kmax = max(1, 2048 // wt)
        k = 1
        for d in range(min(ho, kmax), 0, -1):
            if ho % d == 0:
                k = d
                break
        ts = wt * k

        # pooling scale + pad-column mask folded into one per-position weight vector.
        col = jnp.arange(wt)
        mrow = jnp.where((col >= 1) & (col <= wo), 1.0 / (ho * wo), 0.0)
        mask = jnp.tile(mrow, ho).reshape(s, 1).astype(jnp.float32)

        xf = x2.reshape(n, s, cs)
        out = pl.pallas_call(
            _head_kernel,
            out_shape=jax.ShapeDtypeStruct((n, 1, e), jnp.float32),
            grid=(n, ho // k),
            in_specs=[
                pl.BlockSpec((1, ts, cs), lambda i, j: (i, j, 0)),
                pl.BlockSpec((ts, 1), lambda i, j: (j, 0)),
                pl.BlockSpec((cs, cf), lambda i, j: (0, 0)),
                pl.BlockSpec((1, cf), lambda i, j: (0, 0)),
                pl.BlockSpec((cf, e), lambda i, j: (0, 0)),
                pl.BlockSpec((1, e), lambda i, j: (0, 0)),
            ],
            out_specs=pl.BlockSpec((1, 1, e), lambda i, j: (i, 0, 0)),
            scratch_shapes=[pltpu.VMEM((1, cf), jnp.float32)],
            compiler_params=pltpu.CompilerParams(
                dimension_semantics=("parallel", "arbitrary"),
                vmem_limit_bytes=_VMEM_HEAD),
        )(xf, mask, self.w_last_b16, self.b_last2, self.w_fc_b16, self.b_fc2)
        return out.reshape(n, e)

    def _forward(self, images_nchw):
        n, c, h, w = images_nchw.shape
        assert h % 2 == 0 and w % 2 == 0
        ho, wo = h // 2, w // 2
        wt = _round_up(wo, 8) + 8                   # width slab incl. halo + roll scratch
        slab = self._build_stem_slab(images_nchw, ho, wo, wt)   # (n, ho, wt, 48) bf16
        x2 = self._fused_stem_block(slab, ho, wo, wt)           # (n, ho, wt, 32) bf16
        return self._head(x2, ho, wo, wt)                       # (n, embed)      f32

    def __call__(self, images_nchw):
        return self._forward_jit(images_nchw)


# ---------------------------------------------------------------------------
# Plain-JAX reference of the same truncated network (same bf16 cast points),
# used only as a runtime numerics check in __main__.
# ---------------------------------------------------------------------------
def _reference_forward(m, images_nchw):
    f32, b16 = jnp.float32, jnp.bfloat16
    x = jnp.transpose(images_nchw, (0, 2, 3, 1)).astype(f32)
    n, h, w, _ = x.shape
    ho, wo = h // 2, w // 2
    # stem: 3x3 conv stride 2 pad 1 + ReLU6
    xp = jnp.pad(x, ((0, 0), (1, 1), (1, 1), (0, 0))).astype(b16)
    cols = [xp[:, dy:dy + 2 * ho:2, dx:dx + 2 * wo:2, :]
            for dy in range(3) for dx in range(3)]
    patches = jnp.concatenate(cols, axis=-1).reshape(n * ho * wo, 27)
    y = jnp.dot(patches, m.w_stem.reshape(27, -1).astype(b16),
                preferred_element_type=f32) + m.b_stem
    x1 = jnp.clip(y, 0.0, 6.0).reshape(n, ho, wo, m.c_stem)          # f32 (as in kernel)
    # inverted residual block
    t = jnp.dot(x1.reshape(-1, m.c_stem).astype(b16), m.w_exp.astype(b16),
                preferred_element_type=f32) + m.b_exp
    t = jnp.clip(t, 0.0, 6.0).reshape(n, ho, wo, m.c_exp)
    tp = jnp.pad(t, ((0, 0), (1, 1), (1, 1), (0, 0)))
    acc = jnp.zeros_like(t)
    for dy in range(3):
        for dx in range(3):
            acc += tp[:, dy:dy + ho, dx:dx + wo, :] * m.w_dw[dy, dx]
    acc = jnp.clip(acc + m.b_dw, 0.0, 6.0)
    pr = jnp.dot(acc.reshape(-1, m.c_exp).astype(b16), m.w_proj.astype(b16),
                 preferred_element_type=f32) + m.b_proj
    x2 = (pr.reshape(n, ho, wo, m.c_stem) + x1).astype(b16)
    # head: 1x1 conv to 1280 + ReLU6, global average pool, fc, ReLU (dropout eval = identity)
    f = jnp.dot(x2.reshape(n, ho * wo, m.c_stem), m.w_last.astype(b16),
                preferred_element_type=f32) + m.b_last
    f = jnp.clip(f, 0.0, 6.0)
    pooled = jnp.sum(f, axis=1) / (ho * wo)
    z = jnp.dot(pooled.astype(b16), m.w_fc.astype(b16), preferred_element_type=f32) + m.b_fc
    return jnp.maximum(z, 0.0)


if __name__ == "__main__":
    key = jax.random.PRNGKey(0)
    k_img, k_param = jax.random.split(key)

    batch, chans, spatial, embed_size = 2, 3, 16, 32
    images = jax.random.normal(k_img, (batch, chans, spatial, spatial), jnp.float32)  # NCHW

    model = EncoderCNNPallas(embed_size, k_param)
    out = jax.block_until_ready(model(images))

    assert out.shape == (batch, embed_size), out.shape
    assert out.dtype == jnp.float32
    assert bool(jnp.all(jnp.isfinite(out)))
    assert bool(jnp.all(out >= 0.0))            # post-ReLU

    ref = jax.block_until_ready(_reference_forward(model, images))
    max_err = float(jnp.max(jnp.abs(out - ref)))
    assert bool(jnp.allclose(out, ref, atol=5e-3, rtol=5e-2)), max_err

    print("KERNEL_OK")
</pallas_src>

<mosaic_0001>
module attributes {stable_mosaic.version = 11 : i64} {
  func.func @_fused_stem_block_kernel(%arg0: i32, %arg1: memref<1x8x16x48xbf16, #tpu.memory_space<vmem>>, %arg2: memref<48x32xbf16, #tpu.memory_space<vmem>>, %arg3: memref<1x32xf32, #tpu.memory_space<vmem>>, %arg4: memref<32x64xbf16, #tpu.memory_space<vmem>>, %arg5: memref<1x64xf32, #tpu.memory_space<vmem>>, %arg6: memref<9x1x64xf32, #tpu.memory_space<vmem>>, %arg7: memref<1x64xf32, #tpu.memory_space<vmem>>, %arg8: memref<64x32xbf16, #tpu.memory_space<vmem>>, %arg9: memref<1x32xf32, #tpu.memory_space<vmem>>, %arg10: memref<1x8x16x32xbf16, #tpu.memory_space<vmem>>) attributes {dimension_semantics = [#tpu.dimension_semantics<parallel>], iteration_bounds = array<i64: 2>, scalar_prefetch = 0 : i64, scratch_operands = 0 : i64, tpu.core_type = #tpu.core_type<tc>, window_params = [{transform_indices = @transform_0, window_bounds = array<i64: 1, 8, 16, 48>}, {pipeline_mode = #tpu.pipeline_mode<synchronous>, transform_indices = @transform_1, window_bounds = array<i64: 48, 32>}, {pipeline_mode = #tpu.pipeline_mode<synchronous>, transform_indices = @transform_2, window_bounds = array<i64: 1, 32>}, {pipeline_mode = #tpu.pipeline_mode<synchronous>, transform_indices = @transform_3, window_bounds = array<i64: 32, 64>}, {pipeline_mode = #tpu.pipeline_mode<synchronous>, transform_indices = @transform_4, window_bounds = array<i64: 1, 64>}, {pipeline_mode = #tpu.pipeline_mode<synchronous>, transform_indices = @transform_5, window_bounds = array<i64: 9, 1, 64>}, {pipeline_mode = #tpu.pipeline_mode<synchronous>, transform_indices = @transform_6, window_bounds = array<i64: 1, 64>}, {pipeline_mode = #tpu.pipeline_mode<synchronous>, transform_indices = @transform_7, window_bounds = array<i64: 64, 32>}, {pipeline_mode = #tpu.pipeline_mode<synchronous>, transform_indices = @transform_8, window_bounds = array<i64: 1, 32>}, {transform_indices = @transform_9, window_bounds = array<i64: 1, 8, 16, 32>}]} {
    %c0 = arith.constant 0 : index
    %c0_0 = arith.constant 0 : index
    %c0_1 = arith.constant 0 : index
    %c0_2 = arith.constant 0 : index
    %0 = vector.load %arg1[%c0, %c0_0, %c0_1, %c0_2] : memref<1x8x16x48xbf16, #tpu.memory_space<vmem>>, vector<1x8x16x48xbf16>
    %1 = vector.shape_cast %0 : vector<1x8x16x48xbf16> to vector<8x16x48xbf16>
    %2 = vector.shape_cast %1 : vector<8x16x48xbf16> to vector<128x48xbf16>
    %c0_3 = arith.constant 0 : index
    %c0_4 = arith.constant 0 : index
    %3 = vector.load %arg2[%c0_3, %c0_4] : memref<48x32xbf16, #tpu.memory_space<vmem>>, vector<48x32xbf16>
    %cst = arith.constant dense<0.000000e+00> : vector<128x32xf32>
    %4 = tpu.matmul %2, %3, %cst {dimension_numbers = #tpu.dot_dimension_numbers<[1], [0], [0], [1], [0, 0, 1, 1], [], []>} : vector<128x48xbf16>, vector<48x32xbf16>, vector<128x32xf32> -> vector<128x32xf32>
    %c0_5 = arith.constant 0 : index
    %c0_6 = arith.constant 0 : index
    %5 = vector.load %arg3[%c0_5, %c0_6] : memref<1x32xf32, #tpu.memory_space<vmem>>, vector<1x32xf32>
    %6 = vector.broadcast %5 : vector<1x32xf32> to vector<128x32xf32>
    %7 = arith.addf %4, %6 : vector<128x32xf32>
    %cst_7 = arith.constant 0.000000e+00 : f32
    %cst_8 = arith.constant 6.000000e+00 : f32
    %8 = vector.broadcast %cst_7 : f32 to vector<128x32xf32>
    %9 = arith.maximumf %8, %7 : vector<128x32xf32>
    %10 = vector.broadcast %cst_8 : f32 to vector<128x32xf32>
    %11 = arith.minimumf %10, %9 : vector<128x32xf32>
    %12 = arith.truncf %11 : vector<128x32xf32> to vector<128x32xbf16>
    %c0_9 = arith.constant 0 : index
    %c0_10 = arith.constant 0 : index
    %13 = vector.load %arg4[%c0_9, %c0_10] : memref<32x64xbf16, #tpu.memory_space<vmem>>, vector<32x64xbf16>
    %cst_11 = arith.constant dense<0.000000e+00> : vector<128x64xf32>
    %14 = tpu.matmul %12, %13, %cst_11 {dimension_numbers = #tpu.dot_dimension_numbers<[1], [0], [0], [1], [0, 0, 1, 1], [], []>} : vector<128x32xbf16>, vector<32x64xbf16>, vector<128x64xf32> -> vector<128x64xf32>
    %c0_12 = arith.constant 0 : index
    %c0_13 = arith.constant 0 : index
    %15 = vector.load %arg5[%c0_12, %c0_13] : memref<1x64xf32, #tpu.memory_space<vmem>>, vector<1x64xf32>
    %16 = vector.broadcast %15 : vector<1x64xf32> to vector<128x64xf32>
    %17 = arith.addf %14, %16 : vector<128x64xf32>
    %cst_14 = arith.constant 0.000000e+00 : f32
    %cst_15 = arith.constant 6.000000e+00 : f32
    %18 = vector.broadcast %cst_14 : f32 to vector<128x64xf32>
    %19 = arith.maximumf %18, %17 : vector<128x64xf32>
    %20 = vector.broadcast %cst_15 : f32 to vector<128x64xf32>
    %21 = arith.minimumf %20, %19 : vector<128x64xf32>
    %22 = vector.shape_cast %21 : vector<128x64xf32> to vector<8x16x64xf32>
    %23 = tpu.iota {dimensions = array<i32: 1>} : vector<1x16x1xi32>
    %c1_i32 = arith.constant 1 : i32
    %24 = vector.broadcast %c1_i32 : i32 to vector<1x16x1xi32>
    %25 = arith.cmpi sge, %23, %24 : vector<1x16x1xi32>
    %c8_i32 = arith.constant 8 : i32
    %26 = vector.broadcast %c8_i32 : i32 to vector<1x16x1xi32>
    %27 = arith.cmpi sle, %23, %26 : vector<1x16x1xi32>
    %28 = arith.andi %25, %27 : vector<1x16x1xi1>
    %cst_16 = arith.constant 0.000000e+00 : f32
    %29 = vector.shape_cast %28 : vector<1x16x1xi1> to vector<1x16x1xi1>
    %30 = vector.broadcast %29 : vector<1x16x1xi1> to vector<8x16x64xi1>
    %31 = vector.broadcast %cst_16 : f32 to vector<8x16x64xf32>
    %32 = arith.select %30, %22, %31 : vector<8x16x64xi1>, vector<8x16x64xf32>
    %cst_17 = arith.constant 0.000000e+00 : f32
    %33 = vector.broadcast %cst_17 : f32 to vector<1x16x64xf32>
    %34 = tpu.concatenate %33, %32, %33 in 0 : vector<1x16x64xf32>, vector<8x16x64xf32>, vector<1x16x64xf32> -> vector<10x16x64xf32>
    %c15_i32 = arith.constant 15 : i32
    %35 = tpu.dynamic_rotate %34 by %c15_i32 dim 1 : vector<10x16x64xf32>, i32 -> vector<10x16x64xf32>
    %c14_i32 = arith.constant 14 : i32
    %36 = tpu.dynamic_rotate %34 by %c14_i32 dim 1 : vector<10x16x64xf32>, i32 -> vector<10x16x64xf32>
    %cst_18 = arith.constant 0.000000e+00 : f32
    %37 = vector.broadcast %cst_18 : f32 to vector<8x16x64xf32>
    %38 = vector.extract_strided_slice %34 {offsets = [0, 0, 0], sizes = [8, 16, 64], strides = [1, 1, 1]} : vector<10x16x64xf32> to vector<8x16x64xf32>
    %c0_19 = arith.constant 0 : index
    %c0_20 = arith.constant 0 : index
    %c0_21 = arith.constant 0 : index
    %39 = vector.load %arg6[%c0_19, %c0_20, %c0_21] : memref<9x1x64xf32, #tpu.memory_space<vmem>>, vector<1x1x64xf32>
    %40 = vector.shape_cast %39 : vector<1x1x64xf32> to vector<1x64xf32>
    %41 = vector.shape_cast %40 : vector<1x64xf32> to vector<1x1x64xf32>
    %42 = vector.broadcast %41 : vector<1x1x64xf32> to vector<8x16x64xf32>
    %43 = arith.mulf %38, %42 : vector<8x16x64xf32>
    %44 = arith.addf %37, %43 : vector<8x16x64xf32>
    %45 = vector.extract_strided_slice %35 {offsets = [0, 0, 0], sizes = [8, 16, 64], strides = [1, 1, 1]} : vector<10x16x64xf32> to vector<8x16x64xf32>
    %c1 = arith.constant 1 : index
    %c0_22 = arith.constant 0 : index
    %c0_23 = arith.constant 0 : index
    %46 = vector.load %arg6[%c1, %c0_22, %c0_23] : memref<9x1x64xf32, #tpu.memory_space<vmem>>, vector<1x1x64xf32>
    %47 = vector.shape_cast %46 : vector<1x1x64xf32> to vector<1x64xf32>
    %48 = vector.shape_cast %47 : vector<1x64xf32> to vector<1x1x64xf32>
    %49 = vector.broadcast %48 : vector<1x1x64xf32> to vector<8x16x64xf32>
    %50 = arith.mulf %45, %49 : vector<8x16x64xf32>
    %51 = arith.addf %44, %50 : vector<8x16x64xf32>
    %52 = vector.extract_strided_slice %36 {offsets = [0, 0, 0], sizes = [8, 16, 64], strides = [1, 1, 1]} : vector<10x16x64xf32> to vector<8x16x64xf32>
    %c2 = arith.constant 2 : index
    %c0_24 = arith.constant 0 : index
    %c0_25 = arith.constant 0 : index
    %53 = vector.load %arg6[%c2, %c0_24, %c0_25] : memref<9x1x64xf32, #tpu.memory_space<vmem>>, vector<1x1x64xf32>
    %54 = vector.shape_cast %53 : vector<1x1x64xf32> to vector<1x64xf32>
    %55 = vector.shape_cast %54 : vector<1x64xf32> to vector<1x1x64xf32>
    %56 = vector.broadcast %55 : vector<1x1x64xf32> to vector<8x16x64xf32>
    %57 = arith.mulf %52, %56 : vector<8x16x64xf32>
    %58 = arith.addf %51, %57 : vector<8x16x64xf32>
    %59 = vector.extract_strided_slice %34 {offsets = [1, 0, 0], sizes = [8, 16, 64], strides = [1, 1, 1]} : vector<10x16x64xf32> to vector<8x16x64xf32>
    %c3 = arith.constant 3 : index
    %c0_26 = arith.constant 0 : index
    %c0_27 = arith.constant 0 : index
    %60 = vector.load %arg6[%c3, %c0_26, %c0_27] : memref<9x1x64xf32, #tpu.memory_space<vmem>>, vector<1x1x64xf32>
    %61 = vector.shape_cast %60 : vector<1x1x64xf32> to vector<1x64xf32>
    %62 = vector.shape_cast %61 : vector<1x64xf32> to vector<1x1x64xf32>
    %63 = vector.broadcast %62 : vector<1x1x64xf32> to vector<8x16x64xf32>
    %64 = arith.mulf %59, %63 : vector<8x16x64xf32>
    %65 = arith.addf %58, %64 : vector<8x16x64xf32>
    %66 = vector.extract_strided_slice %35 {offsets = [1, 0, 0], sizes = [8, 16, 64], strides = [1, 1, 1]} : vector<10x16x64xf32> to vector<8x16x64xf32>
    %c4 = arith.constant 4 : index
    %c0_28 = arith.constant 0 : index
    %c0_29 = arith.constant 0 : index
    %67 = vector.load %arg6[%c4, %c0_28, %c0_29] : memref<9x1x64xf32, #tpu.memory_space<vmem>>, vector<1x1x64xf32>
    %68 = vector.shape_cast %67 : vector<1x1x64xf32> to vector<1x64xf32>
    %69 = vector.shape_cast %68 : vector<1x64xf32> to vector<1x1x64xf32>
    %70 = vector.broadcast %69 : vector<1x1x64xf32> to vector<8x16x64xf32>
    %71 = arith.mulf %66, %70 : vector<8x16x64xf32>
    %72 = arith.addf %65, %71 : vector<8x16x64xf32>
    %73 = vector.extract_strided_slice %36 {offsets = [1, 0, 0], sizes = [8, 16, 64], strides = [1, 1, 1]} : vector<10x16x64xf32> to vector<8x16x64xf32>
    %c5 = arith.constant 5 : index
    %c0_30 = arith.constant 0 : index
    %c0_31 = arith.constant 0 : index
    %74 = vector.load %arg6[%c5, %c0_30, %c0_31] : memref<9x1x64xf32, #tpu.memory_space<vmem>>, vector<1x1x64xf32>
    %75 = vector.shape_cast %74 : vector<1x1x64xf32> to vector<1x64xf32>
    %76 = vector.shape_cast %75 : vector<1x64xf32> to vector<1x1x64xf32>
    %77 = vector.broadcast %76 : vector<1x1x64xf32> to vector<8x16x64xf32>
    %78 = arith.mulf %73, %77 : vector<8x16x64xf32>
    %79 = arith.addf %72, %78 : vector<8x16x64xf32>
    %80 = vector.extract_strided_slice %34 {offsets = [2, 0, 0], sizes = [8, 16, 64], strides = [1, 1, 1]} : vector<10x16x64xf32> to vector<8x16x64xf32>
    %c6 = arith.constant 6 : index
    %c0_32 = arith.constant 0 : index
    %c0_33 = arith.constant 0 : index
    %81 = vector.load %arg6[%c6, %c0_32, %c0_33] : memref<9x1x64xf32, #tpu.memory_space<vmem>>, vector<1x1x64xf32>
    %82 = vector.shape_cast %81 : vector<1x1x64xf32> to vector<1x64xf32>
    %83 = vector.shape_cast %82 : vector<1x64xf32> to vector<1x1x64xf32>
    %84 = vector.broadcast %83 : vector<1x1x64xf32> to vector<8x16x64xf32>
    %85 = arith.mulf %80, %84 : vector<8x16x64xf32>
    %86 = arith.addf %79, %85 : vector<8x16x64xf32>
    %87 = vector.extract_strided_slice %35 {offsets = [2, 0, 0], sizes = [8, 16, 64], strides = [1, 1, 1]} : vector<10x16x64xf32> to vector<8x16x64xf32>
    %c7 = arith.constant 7 : index
    %c0_34 = arith.constant 0 : index
    %c0_35 = arith.constant 0 : index
    %88 = vector.load %arg6[%c7, %c0_34, %c0_35] : memref<9x1x64xf32, #tpu.memory_space<vmem>>, vector<1x1x64xf32>
    %89 = vector.shape_cast %88 : vector<1x1x64xf32> to vector<1x64xf32>
    %90 = vector.shape_cast %89 : vector<1x64xf32> to vector<1x1x64xf32>
    %91 = vector.broadcast %90 : vector<1x1x64xf32> to vector<8x16x64xf32>
    %92 = arith.mulf %87, %91 : vector<8x16x64xf32>
    %93 = arith.addf %86, %92 : vector<8x16x64xf32>
    %94 = vector.extract_strided_slice %36 {offsets = [2, 0, 0], sizes = [8, 16, 64], strides = [1, 1, 1]} : vector<10x16x64xf32> to vector<8x16x64xf32>
    %c8 = arith.constant 8 : index
    %c0_36 = arith.constant 0 : index
    %c0_37 = arith.constant 0 : index
    %95 = vector.load %arg6[%c8, %c0_36, %c0_37] : memref<9x1x64xf32, #tpu.memory_space<vmem>>, vector<1x1x64xf32>
    %96 = vector.shape_cast %95 : vector<1x1x64xf32> to vector<1x64xf32>
    %97 = vector.shape_cast %96 : vector<1x64xf32> to vector<1x1x64xf32>
    %98 = vector.broadcast %97 : vector<1x1x64xf32> to vector<8x16x64xf32>
    %99 = arith.mulf %94, %98 : vector<8x16x64xf32>
    %100 = arith.addf %93, %99 : vector<8x16x64xf32>
    %c0_38 = arith.constant 0 : index
    %c0_39 = arith.constant 0 : index
    %101 = vector.load %arg7[%c0_38, %c0_39] : memref<1x64xf32, #tpu.memory_space<vmem>>, vector<1x64xf32>
    %102 = vector.shape_cast %101 : vector<1x64xf32> to vector<1x1x64xf32>
    %103 = vector.broadcast %102 : vector<1x1x64xf32> to vector<8x16x64xf32>
    %104 = arith.addf %100, %103 : vector<8x16x64xf32>
    %cst_40 = arith.constant 0.000000e+00 : f32
    %cst_41 = arith.constant 6.000000e+00 : f32
    %105 = vector.broadcast %cst_40 : f32 to vector<8x16x64xf32>
    %106 = arith.maximumf %105, %104 : vector<8x16x64xf32>
    %107 = vector.broadcast %cst_41 : f32 to vector<8x16x64xf32>
    %108 = arith.minimumf %107, %106 : vector<8x16x64xf32>
    %109 = vector.shape_cast %108 : vector<8x16x64xf32> to vector<128x64xf32>
    %110 = arith.truncf %109 : vector<128x64xf32> to vector<128x64xbf16>
    %c0_42 = arith.constant 0 : index
    %c0_43 = arith.constant 0 : index
    %111 = vector.load %arg8[%c0_42, %c0_43] : memref<64x32xbf16, #tpu.memory_space<vmem>>, vector<64x32xbf16>
    %cst_44 = arith.constant dense<0.000000e+00> : vector<128x32xf32>
    %112 = tpu.matmul %110, %111, %cst_44 {dimension_numbers = #tpu.dot_dimension_numbers<[1], [0], [0], [1], [0, 0, 1, 1], [], []>} : vector<128x64xbf16>, vector<64x32xbf16>, vector<128x32xf32> -> vector<128x32xf32>
    %c0_45 = arith.constant 0 : index
    %c0_46 = arith.constant 0 : index
    %113 = vector.load %arg9[%c0_45, %c0_46] : memref<1x32xf32, #tpu.memory_space<vmem>>, vector<1x32xf32>
    %114 = vector.broadcast %113 : vector<1x32xf32> to vector<128x32xf32>
    %115 = arith.addf %112, %114 : vector<128x32xf32>
    %116 = arith.addf %115, %11 : vector<128x32xf32>
    %117 = vector.shape_cast %116 : vector<128x32xf32> to vector<8x16x32xf32>
    %118 = arith.truncf %117 : vector<8x16x32xf32> to vector<8x16x32xbf16>
    %c0_47 = arith.constant 0 : index
    %c0_48 = arith.constant 0 : index
    %c0_49 = arith.constant 0 : index
    %c0_50 = arith.constant 0 : index
    %119 = vector.load %arg10[%c0_47, %c0_48, %c0_49, %c0_50] : memref<1x8x16x32xbf16, #tpu.memory_space<vmem>>, vector<1x8x16x32xbf16>
    %120 = vector.shape_cast %119 : vector<1x8x16x32xbf16> to vector<8x16x32xbf16>
    %121 = vector.shape_cast %118 : vector<8x16x32xbf16> to vector<1x8x16x32xbf16>
    tpu.vector_store %arg10[%c0_47, %c0_48, %c0_49, %c0_50], %121 {strides = array<i32>} : memref<1x8x16x32xbf16, #tpu.memory_space<vmem>>, vector<1x8x16x32xbf16>,
    return
  }
  func.func @transform_0(%arg0: i32) -> (i32, i32, i32, i32) {
    %c0_i32 = arith.constant 0 : i32
    %c0_i32_0 = arith.constant 0 : i32
    %c0_i32_1 = arith.constant 0 : i32
    %c0_i32_2 = arith.constant 0 : i32
    return %arg0, %c0_i32, %c0_i32_0, %c0_i32_1 : i32, i32, i32, i32
  }
  func.func @transform_1(%arg0: i32) -> (i32, i32) {
    %c0_i32 = arith.constant 0 : i32
    %c0_i32_0 = arith.constant 0 : i32
    %c0_i32_1 = arith.constant 0 : i32
    return %c0_i32, %c0_i32_0 : i32, i32
  }
  func.func @transform_2(%arg0: i32) -> (i32, i32) {
    %c0_i32 = arith.constant 0 : i32
    %c0_i32_0 = arith.constant 0 : i32
    %c0_i32_1 = arith.constant 0 : i32
    return %c0_i32, %c0_i32_0 : i32, i32
  }
  func.func @transform_3(%arg0: i32) -> (i32, i32) {
    %c0_i32 = arith.constant 0 : i32
    %c0_i32_0 = arith.constant 0 : i32
    %c0_i32_1 = arith.constant 0 : i32
    return %c0_i32, %c0_i32_0 : i32, i32
  }
  func.func @transform_4(%arg0: i32) -> (i32, i32) {
    %c0_i32 = arith.constant 0 : i32
    %c0_i32_0 = arith.constant 0 : i32
    %c0_i32_1 = arith.constant 0 : i32
    return %c0_i32, %c0_i32_0 : i32, i32
  }
  func.func @transform_5(%arg0: i32) -> (i32, i32, i32) {
    %c0_i32 = arith.constant 0 : i32
    %c0_i32_0 = arith.constant 0 : i32
    %c0_i32_1 = arith.constant 0 : i32
    %c0_i32_2 = arith.constant 0 : i32
    return %c0_i32, %c0_i32_0, %c0_i32_1 : i32, i32, i32
  }
  func.func @transform_6(%arg0: i32) -> (i32, i32) {
    %c0_i32 = arith.constant 0 : i32
    %c0_i32_0 = arith.constant 0 : i32
    %c0_i32_1 = arith.constant 0 : i32
    return %c0_i32, %c0_i32_0 : i32, i32
  }
  func.func @transform_7(%arg0: i32) -> (i32, i32) {
    %c0_i32 = arith.constant 0 : i32
    %c0_i32_0 = arith.constant 0 : i32
    %c0_i32_1 = arith.constant 0 : i32
    return %c0_i32, %c0_i32_0 : i32, i32
  }
  func.func @transform_8(%arg0: i32) -> (i32, i32) {
    %c0_i32 = arith.constant 0 : i32
    %c0_i32_0 = arith.constant 0 : i32
    %c0_i32_1 = arith.constant 0 : i32
    return %c0_i32, %c0_i32_0 : i32, i32
  }
  func.func @transform_9(%arg0: i32) -> (i32, i32, i32, i32) {
    %c0_i32 = arith.constant 0 : i32
    %c0_i32_0 = arith.constant 0 : i32
    %c0_i32_1 = arith.constant 0 : i32
    %c0_i32_2 = arith.constant 0 : i32
    return %arg0, %c0_i32, %c0_i32_0, %c0_i32_1 : i32, i32, i32, i32
  }
}

module attributes {stable_mosaic.version = 11 : i64} {
  func.func @_head_kernel(%arg0: i32, %arg1: i32, %arg2: memref<1x128x32xbf16, #tpu.memory_space<vmem>>, %arg3: memref<128x1xf32, #tpu.memory_space<vmem>>, %arg4: memref<32x1280xbf16, #tpu.memory_space<vmem>>, %arg5: memref<1x1280xf32, #tpu.memory_space<vmem>>, %arg6: memref<1280x32xbf16, #tpu.memory_space<vmem>>, %arg7: memref<1x32xf32, #tpu.memory_space<vmem>>, %arg8: memref<1x1x32xf32, #tpu.memory_space<vmem>>, %arg9: memref<1x1280xf32, #tpu.memory_space<vmem>>) attributes {dimension_semantics = [#tpu.dimension_semantics<parallel>, #tpu.dimension_semantics<arbitrary>], iteration_bounds = array<i64: 2, 1>, scalar_prefetch = 0 : i64, scratch_operands = 1 : i64, tpu.core_type = #tpu.core_type<tc>, window_params = [{transform_indices = @transform_0, window_bounds = array<i64: 1, 128, 32>}, {transform_indices = @transform_1, window_bounds = array<i64: 128, 1>}, {pipeline_mode = #tpu.pipeline_mode<synchronous>, transform_indices = @transform_2, window_bounds = array<i64: 32, 1280>}, {pipeline_mode = #tpu.pipeline_mode<synchronous>, transform_indices = @transform_3, window_bounds = array<i64: 1, 1280>}, {pipeline_mode = #tpu.pipeline_mode<synchronous>, transform_indices = @transform_4, window_bounds = array<i64: 1280, 32>}, {pipeline_mode = #tpu.pipeline_mode<synchronous>, transform_indices = @transform_5, window_bounds = array<i64: 1, 32>}, {transform_indices = @transform_6, window_bounds = array<i64: 1, 1, 32>}]} {
    %c0_i32 = arith.constant 0 : i32
    %0 = arith.cmpi eq, %arg1, %c0_i32 : i32
    %1 = arith.extui %0 : i1 to i32
    %c0_i32_0 = arith.constant 0 : i32
    %2 = arith.cmpi ne, %1, %c0_i32_0 : i32
    scf.if %2 {
      %cst_18 = arith.constant 0.000000e+00 : f32
      %25 = vector.broadcast %cst_18 : f32 to vector<1x1280xf32>
      %c0_19 = arith.constant 0 : index
      %c0_20 = arith.constant 0 : index
      %26 = vector.load %arg9[%c0_19, %c0_20] : memref<1x1280xf32, #tpu.memory_space<vmem>>, vector<1x1280xf32>
      tpu.vector_store %arg9[%c0_19, %c0_20], %25 {strides = array<i32>} : memref<1x1280xf32, #tpu.memory_space<vmem>>, vector<1x1280xf32>,
    } else {
    }
    %c0 = arith.constant 0 : index
    %c0_1 = arith.constant 0 : index
    %c0_2 = arith.constant 0 : index
    %3 = vector.load %arg2[%c0, %c0_1, %c0_2] : memref<1x128x32xbf16, #tpu.memory_space<vmem>>, vector<1x128x32xbf16>
    %4 = vector.shape_cast %3 : vector<1x128x32xbf16> to vector<128x32xbf16>
    %c0_3 = arith.constant 0 : index
    %c0_4 = arith.constant 0 : index
    %5 = vector.load %arg4[%c0_3, %c0_4] : memref<32x1280xbf16, #tpu.memory_space<vmem>>, vector<32x1280xbf16>
    %cst = arith.constant dense<0.000000e+00> : vector<128x1280xf32>
    %6 = tpu.matmul %4, %5, %cst {dimension_numbers = #tpu.dot_dimension_numbers<[1], [0], [0], [1], [0, 0, 1, 1], [], []>} : vector<128x32xbf16>, vector<32x1280xbf16>, vector<128x1280xf32> -> vector<128x1280xf32>
    %c0_5 = arith.constant 0 : index
    %c0_6 = arith.constant 0 : index
    %7 = vector.load %arg5[%c0_5, %c0_6] : memref<1x1280xf32, #tpu.memory_space<vmem>>, vector<1x1280xf32>
    %8 = vector.broadcast %7 : vector<1x1280xf32> to vector<128x1280xf32>
    %9 = arith.addf %6, %8 : vector<128x1280xf32>
    %cst_7 = arith.constant 0.000000e+00 : f32
    %cst_8 = arith.constant 6.000000e+00 : f32
    %10 = vector.broadcast %cst_7 : f32 to vector<128x1280xf32>
    %11 = arith.maximumf %10, %9 : vector<128x1280xf32>
    %12 = vector.broadcast %cst_8 : f32 to vector<128x1280xf32>
    %13 = arith.minimumf %12, %11 : vector<128x1280xf32>
    %c0_9 = arith.constant 0 : index
    %c0_10 = arith.constant 0 : index
    %14 = vector.load %arg9[%c0_9, %c0_10] : memref<1x1280xf32, #tpu.memory_space<vmem>>, vector<1x1280xf32>
    %c0_11 = arith.constant 0 : index
    %c0_12 = arith.constant 0 : index
    %15 = vector.load %arg3[%c0_11, %c0_12] : memref<128x1xf32, #tpu.memory_space<vmem>>, vector<128x1xf32>
    %16 = vector.broadcast %15 : vector<128x1xf32> to vector<128x1280xf32>
    %17 = arith.mulf %13, %16 : vector<128x1280xf32>
    %cst_13 = arith.constant dense<0.000000e+00> : vector<1280xf32>
    %18 = vector.multi_reduction <add>, %17, %cst_13 [0] : vector<128x1280xf32> to vector<1280xf32>
    %19 = vector.shape_cast %18 : vector<1280xf32> to vector<1x1280xf32>
    %20 = arith.addf %14, %19 : vector<1x1280xf32>
    %c0_14 = arith.constant 0 : index
    %c0_15 = arith.constant 0 : index
    %21 = vector.load %arg9[%c0_14, %c0_15] : memref<1x1280xf32, #tpu.memory_space<vmem>>, vector<1x1280xf32>
    tpu.vector_store %arg9[%c0_14, %c0_15], %20 {strides = array<i32>} : memref<1x1280xf32, #tpu.memory_space<vmem>>, vector<1x1280xf32>,
    %c0_i32_16 = arith.constant 0 : i32
    %22 = arith.cmpi eq, %arg1, %c0_i32_16 : i32
    %23 = arith.extui %22 : i1 to i32
    %c0_i32_17 = arith.constant 0 : i32
    %24 = arith.cmpi ne, %23, %c0_i32_17 : i32
    scf.if %24 {
      %c0_18 = arith.constant 0 : index
      %c0_19 = arith.constant 0 : index
      %25 = vector.load %arg9[%c0_18, %c0_19] : memref<1x1280xf32, #tpu.memory_space<vmem>>, vector<1x1280xf32>
      %26 = arith.truncf %25 : vector<1x1280xf32> to vector<1x1280xbf16>
      %c0_20 = arith.constant 0 : index
      %c0_21 = arith.constant 0 : index
      %27 = vector.load %arg6[%c0_20, %c0_21] : memref<1280x32xbf16, #tpu.memory_space<vmem>>, vector<1280x32xbf16>
      %cst_22 = arith.constant dense<0.000000e+00> : vector<1x32xf32>
      %28 = tpu.matmul %26, %27, %cst_22 {dimension_numbers = #tpu.dot_dimension_numbers<[1], [0], [0], [1], [0, 0, 1, 1], [], []>} : vector<1x1280xbf16>, vector<1280x32xbf16>, vector<1x32xf32> -> vector<1x32xf32>
      %c0_23 = arith.constant 0 : index
      %c0_24 = arith.constant 0 : index
      %29 = vector.load %arg7[%c0_23, %c0_24] : memref<1x32xf32, #tpu.memory_space<vmem>>, vector<1x32xf32>
      %30 = arith.addf %28, %29 : vector<1x32xf32>
      %cst_25 = arith.constant 0.000000e+00 : f32
      %31 = vector.broadcast %cst_25 : f32 to vector<1x32xf32>
      %32 = arith.maximumf %30, %31 : vector<1x32xf32>
      %c0_26 = arith.constant 0 : index
      %c0_27 = arith.constant 0 : index
      %c0_28 = arith.constant 0 : index
      %33 = vector.load %arg8[%c0_26, %c0_27, %c0_28] : memref<1x1x32xf32, #tpu.memory_space<vmem>>, vector<1x1x32xf32>
      %34 = vector.shape_cast %33 : vector<1x1x32xf32> to vector<1x32xf32>
      %35 = vector.shape_cast %32 : vector<1x32xf32> to vector<1x1x32xf32>
      tpu.vector_store %arg8[%c0_26, %c0_27, %c0_28], %35 {strides = array<i32>} : memref<1x1x32xf32, #tpu.memory_space<vmem>>, vector<1x1x32xf32>,
    } else {
    }
    return
  }
  func.func @transform_0(%arg0: i32, %arg1: i32) -> (i32, i32, i32) {
    %c0_i32 = arith.constant 0 : i32
    %c0_i32_0 = arith.constant 0 : i32
    return %arg0, %arg1, %c0_i32 : i32, i32, i32
  }
  func.func @transform_1(%arg0: i32, %arg1: i32) -> (i32, i32) {
    %c0_i32 = arith.constant 0 : i32
    %c0_i32_0 = arith.constant 0 : i32
    return %arg1, %c0_i32 : i32, i32
  }
  func.func @transform_2(%arg0: i32, %arg1: i32) -> (i32, i32) {
    %c0_i32 = arith.constant 0 : i32
    %c0_i32_0 = arith.constant 0 : i32
    %c0_i32_1 = arith.constant 0 : i32
    return %c0_i32, %c0_i32_0 : i32, i32
  }
  func.func @transform_3(%arg0: i32, %arg1: i32) -> (i32, i32) {
    %c0_i32 = arith.constant 0 : i32
    %c0_i32_0 = arith.constant 0 : i32
    %c0_i32_1 = arith.constant 0 : i32
    return %c0_i32, %c0_i32_0 : i32, i32
  }
  func.func @transform_4(%arg0: i32, %arg1: i32) -> (i32, i32) {
    %c0_i32 = arith.constant 0 : i32
    %c0_i32_0 = arith.constant 0 : i32
    %c0_i32_1 = arith.constant 0 : i32
    return %c0_i32, %c0_i32_0 : i32, i32
  }
  func.func @transform_5(%arg0: i32, %arg1: i32) -> (i32, i32) {
    %c0_i32 = arith.constant 0 : i32
    %c0_i32_0 = arith.constant 0 : i32
    %c0_i32_1 = arith.constant 0 : i32
    return %c0_i32, %c0_i32_0 : i32, i32
  }
  func.func @transform_6(%arg0: i32, %arg1: i32) -> (i32, i32, i32) {
    %c0_i32 = arith.constant 0 : i32
    %c0_i32_0 = arith.constant 0 : i32
    %c0_i32_1 = arith.constant 0 : i32
    return %arg0, %c0_i32, %c0_i32_0 : i32, i32, i32
  }
}

</mosaic_0001>

<bundles_post_ra>
// kernel: tile.8
= control target key start
LH: loop header
LB: loop body
LE: loop exit
PB: predicated region body
PF: predicated region fallthrough
CT: control target
= control target key end

     0   :  { %s22_s0 = inlined_call_operand.vmem [shape: f32[16], index: 0, kind: input, shape index: {}]   ;;  %s23_s1 = inlined_call_operand.vmem [shape: f32[8,16], index: 1, kind: output, shape index: {}]  }
   0x1   :  { %v4_v0 = vld [vmem:[%s22_s0] ss:$0 sm:$0xff] }
   0x2   :  { %5 = vst [vmem:[%s23_s1] sm:$0xff] %v4_v0 }

// kernel: tile.0
= control target key start
LH: loop header
LB: loop body
LE: loop exit
PB: predicated region body
PF: predicated region fallthrough
CT: control target
= control target key end

     0   :  { %vm3_vm0 = vcmask 7168   ;;  %s264_s8 = smov 125   ;;  %s265_s17 = smov 126   ;;  %s547_s0 = inlined_call_operand.vmem [shape: f32[8,16], index: 0, kind: input, shape index: {}]   ;;  %s548_s1 = inlined_call_operand.vmem [shape: f32[128,1], index: 1, kind: output, shape index: {}]  }
   0x1   :  { %v8_v0 = vld [vmem:[%s547_s0] sm:$0xff]   ;;  %s263_s0 = smov 127   ;;  %s266_s18 = smov 124  }
   0x2   :  { %9 = vrot.lane.b32.xlu0 %v8_v0, %s263_s0  ;;  %33 = vrot.lane.b32.xlu1 %v8_v0, %s264_s8  ;;  %4 = vst.msk [vmem:[%s548_s1] ss:$16 sm:$0x3] %vm3_vm0, %v8_v0   ;;  %5 = vst.msk [vmem:[%s548_s1] ss:$16 sm:$0xc] %vm3_vm0, %v8_v0  }
   0x3   :  { %6 = vst.msk [vmem:[%s548_s1] ss:$16 sm:$0x30] %vm3_vm0, %v8_v0   ;;  %7 = vst.msk [vmem:[%s548_s1] ss:$16 sm:$0xc0] %vm3_vm0, %v8_v0  }
   0x4   :  { %s267_s19 = smov 123   ;;  %s268_s20 = smov 122  }
   0x5   :  { %s269_s21 = smov 121   ;;  %s270_s22 = smov 120  }
   0x6   :  { %21 = vrot.lane.b32.xlu0 %v8_v0, %s265_s17  ;;  %45 = vrot.lane.b32.xlu1 %v8_v0, %s266_s18  ;;  %s271_s23 = smov 119   ;;  %s272_s24 = smov 118  }
   0x7   :  { %s273_s25 = smov 117   ;;  %s274_s26 = smov 116  }
   0x8   :  { %s275_s27 = smov 115   ;;  %s276_s28 = smov 114  }
   0x9   :  { %s277_s29 = smov 113  }
   0xa   :  { %57 = vrot.lane.b32.xlu0 %v8_v0, %s267_s19  ;;  %69 = vrot.lane.b32.xlu1 %v8_v0, %s268_s20 }
   0xe   :  { %81 = vrot.lane.b32.xlu0 %v8_v0, %s269_s21  ;;  %93 = vrot.lane.b32.xlu1 %v8_v0, %s270_s22 }
  0x12   :  { %105 = vrot.lane.b32.xlu0 %v8_v0, %s271_s23  ;;  %117 = vrot.lane.b32.xlu1 %v8_v0, %s272_s24 }
  0x16   :  { %129 = vrot.lane.b32.xlu0 %v8_v0, %s273_s25  ;;  %141 = vrot.lane.b32.xlu1 %v8_v0, %s274_s26 }
  0x1a   :  { %153 = vrot.lane.b32.xlu0 %v8_v0, %s275_s27  ;;  %165 = vrot.lane.b32.xlu1 %v8_v0, %s276_s28 }
  0x1e   :  { %177 = vrot.lane.b32.xlu0 %v8_v0, %s277_s29 }
  0x74   :  { %v10_v1 = vpop.permute.xlu0 %9   ;;  %v34_v2 = vpop.permute.xlu1 %33  }
  0x75   :  { %188 = vst.msk [vmem:[%s548_s1 + $0x1] ss:$16 sm:$0x3] %vm3_vm0, %v10_v1   ;;  %189 = vst.msk [vmem:[%s548_s1 + $0x1] ss:$16 sm:$0xc] %vm3_vm0, %v10_v1  }
  0x76   :  { %190 = vst.msk [vmem:[%s548_s1 + $0x1] ss:$16 sm:$0x30] %vm3_vm0, %v10_v1   ;;  %191 = vst.msk [vmem:[%s548_s1 + $0x1] ss:$16 sm:$0xc0] %vm3_vm0, %v10_v1  }
  0x77   :  { %196 = vst.msk [vmem:[%s548_s1 + $0x3] ss:$16 sm:$0x3] %vm3_vm0, %v34_v2   ;;  %197 = vst.msk [vmem:[%s548_s1 + $0x3] ss:$16 sm:$0xc] %vm3_vm0, %v34_v2  }
  0x78   :  { %198 = vst.msk [vmem:[%s548_s1 + $0x3] ss:$16 sm:$0x30] %vm3_vm0, %v34_v2   ;;  %199 = vst.msk [vmem:[%s548_s1 + $0x3] ss:$16 sm:$0xc0] %vm3_vm0, %v34_v2   ;;  %v22_v3 = vpop.permute.xlu0 %21   ;;  %v46_v4 = vpop.permute.xlu1 %45  }
  0x79   :  { %192 = vst.msk [vmem:[%s548_s1 + $0x2] ss:$16 sm:$0x3] %vm3_vm0, %v22_v3   ;;  %193 = vst.msk [vmem:[%s548_s1 + $0x2] ss:$16 sm:$0xc] %vm3_vm0, %v22_v3  }
  0x7a   :  { %194 = vst.msk [vmem:[%s548_s1 + $0x2] ss:$16 sm:$0x30] %vm3_vm0, %v22_v3   ;;  %195 = vst.msk [vmem:[%s548_s1 + $0x2] ss:$16 sm:$0xc0] %vm3_vm0, %v22_v3  }
  0x7b   :  { %200 = vst.msk [vmem:[%s548_s1 + $0x4] ss:$16 sm:$0x3] %vm3_vm0, %v46_v4   ;;  %201 = vst.msk [vmem:[%s548_s1 + $0x4] ss:$16 sm:$0xc] %vm3_vm0, %v46_v4  }
  0x7c   :  { %202 = vst.msk [vmem:[%s548_s1 + $0x4] ss:$16 sm:$0x30] %vm3_vm0, %v46_v4   ;;  %203 = vst.msk [vmem:[%s548_s1 + $0x4] ss:$16 sm:$0xc0] %vm3_vm0, %v46_v4   ;;  %v58_v5 = vpop.permute.xlu0 %57   ;;  %v70_v6 = vpop.permute.xlu1 %69  }
  0x7d   :  { %204 = vst.msk [vmem:[%s548_s1 + $0x5] ss:$16 sm:$0x3] %vm3_vm0, %v58_v5   ;;  %205 = vst.msk [vmem:[%s548_s1 + $0x5] ss:$16 sm:$0xc] %vm3_vm0, %v58_v5  }
  0x7e   :  { %206 = vst.msk [vmem:[%s548_s1 + $0x5] ss:$16 sm:$0x30] %vm3_vm0, %v58_v5   ;;  %207 = vst.msk [vmem:[%s548_s1 + $0x5] ss:$16 sm:$0xc0] %vm3_vm0, %v58_v5  }
  0x7f   :  { %208 = vst.msk [vmem:[%s548_s1 + $0x6] ss:$16 sm:$0x3] %vm3_vm0, %v70_v6   ;;  %209 = vst.msk [vmem:[%s548_s1 + $0x6] ss:$16 sm:$0xc] %vm3_vm0, %v70_v6  }
  0x80   :  { %210 = vst.msk [vmem:[%s548_s1 + $0x6] ss:$16 sm:$0x30] %vm3_vm0, %v70_v6   ;;  %211 = vst.msk [vmem:[%s548_s1 + $0x6] ss:$16 sm:$0xc0] %vm3_vm0, %v70_v6   ;;  %v82_v7 = vpop.permute.xlu0 %81   ;;  %v94_v8 = vpop.permute.xlu1 %93  }
  0x81   :  { %212 = vst.msk [vmem:[%s548_s1 + $0x7] ss:$16 sm:$0x3] %vm3_vm0, %v82_v7   ;;  %213 = vst.msk [vmem:[%s548_s1 + $0x7] ss:$16 sm:$0xc] %vm3_vm0, %v82_v7  }
  0x82   :  { %214 = vst.msk [vmem:[%s548_s1 + $0x7] ss:$16 sm:$0x30] %vm3_vm0, %v82_v7   ;;  %215 = vst.msk [vmem:[%s548_s1 + $0x7] ss:$16 sm:$0xc0] %vm3_vm0, %v82_v7  }
  0x83   :  { %216 = vst.msk [vmem:[%s548_s1 + $0x8] ss:$16 sm:$0x3] %vm3_vm0, %v94_v8   ;;  %217 = vst.msk [vmem:[%s548_s1 + $0x8] ss:$16 sm:$0xc] %vm3_vm0, %v94_v8  }
  0x84   :  { %218 = vst.msk [vmem:[%s548_s1 + $0x8] ss:$16 sm:$0x30] %vm3_vm0, %v94_v8   ;;  %219 = vst.msk [vmem:[%s548_s1 + $0x8] ss:$16 sm:$0xc0] %vm3_vm0, %v94_v8   ;;  %v106_v9 = vpop.permute.xlu0 %105   ;;  %v118_v10 = vpop.permute.xlu1 %117  }
  0x85   :  { %220 = vst.msk [vmem:[%s548_s1 + $0x9] ss:$16 sm:$0x3] %vm3_vm0, %v106_v9   ;;  %221 = vst.msk [vmem:[%s548_s1 + $0x9] ss:$16 sm:$0xc] %vm3_vm0, %v106_v9  }
  0x86   :  { %222 = vst.msk [vmem:[%s548_s1 + $0x9] ss:$16 sm:$0x30] %vm3_vm0, %v106_v9   ;;  %223 = vst.msk [vmem:[%s548_s1 + $0x9] ss:$16 sm:$0xc0] %vm3_vm0, %v106_v9  }
  0x87   :  { %224 = vst.msk [vmem:[%s548_s1 + $0xa] ss:$16 sm:$0x3] %vm3_vm0, %v118_v10   ;;  %225 = vst.msk [vmem:[%s548_s1 + $0xa] ss:$16 sm:$0xc] %vm3_vm0, %v118_v10  }
  0x88   :  { %226 = vst.msk [vmem:[%s548_s1 + $0xa] ss:$16 sm:$0x30] %vm3_vm0, %v118_v10   ;;  %227 = vst.msk [vmem:[%s548_s1 + $0xa] ss:$16 sm:$0xc0] %vm3_vm0, %v118_v10   ;;  %v130_v11 = vpop.permute.xlu0 %129   ;;  %v142_v12 = vpop.permute.xlu1 %141  }
  0x89   :  { %228 = vst.msk [vmem:[%s548_s1 + $0xb] ss:$16 sm:$0x3] %vm3_vm0, %v130_v11   ;;  %229 = vst.msk [vmem:[%s548_s1 + $0xb] ss:$16 sm:$0xc] %vm3_vm0, %v130_v11  }
  0x8a   :  { %230 = vst.msk [vmem:[%s548_s1 + $0xb] ss:$16 sm:$0x30] %vm3_vm0, %v130_v11   ;;  %231 = vst.msk [vmem:[%s548_s1 + $0xb] ss:$16 sm:$0xc0] %vm3_vm0, %v130_v11  }
  0x8b   :  { %232 = vst.msk [vmem:[%s548_s1 + $0xc] ss:$16 sm:$0x3] %vm3_vm0, %v142_v12   ;;  %233 = vst.msk [vmem:[%s548_s1 + $0xc] ss:$16 sm:$0xc] %vm3_vm0, %v142_v12  }
  0x8c   :  { %234 = vst.msk [vmem:[%s548_s1 + $0xc] ss:$16 sm:$0x30] %vm3_vm0, %v142_v12   ;;  %235 = vst.msk [vmem:[%s548_s1 + $0xc] ss:$16 sm:$0xc0] %vm3_vm0, %v142_v12   ;;  %v154_v13 = vpop.permute.xlu0 %153   ;;  %v166_v14 = vpop.permute.xlu1 %165  }
  0x8d   :  { %236 = vst.msk [vmem:[%s548_s1 + $0xd] ss:$16 sm:$0x3] %vm3_vm0, %v154_v13   ;;  %237 = vst.msk [vmem:[%s548_s1 + $0xd] ss:$16 sm:$0xc] %vm3_vm0, %v154_v13  }
  0x8e   :  { %238 = vst.msk [vmem:[%s548_s1 + $0xd] ss:$16 sm:$0x30] %vm3_vm0, %v154_v13   ;;  %239 = vst.msk [vmem:[%s548_s1 + $0xd] ss:$16 sm:$0xc0] %vm3_vm0, %v154_v13  }
  0x8f   :  { %240 = vst.msk [vmem:[%s548_s1 + $0xe] ss:$16 sm:$0x3] %vm3_vm0, %v166_v14   ;;  %241 = vst.msk [vmem:[%s548_s1 + $0xe] ss:$16 sm:$0xc] %vm3_vm0, %v166_v14  }
  0x90   :  { %242 = vst.msk [vmem:[%s548_s1 + $0xe] ss:$16 sm:$0x30] %vm3_vm0, %v166_v14   ;;  %243 = vst.msk [vmem:[%s548_s1 + $0xe] ss:$16 sm:$0xc0] %vm3_vm0, %v166_v14   ;;  %v178_v15 = vpop.permute.xlu0 %177  }
  0x91   :  { %244 = vst.msk [vmem:[%s548_s1 + $0xf] ss:$16 sm:$0x3] %vm3_vm0, %v178_v15   ;;  %245 = vst.msk [vmem:[%s548_s1 + $0xf] ss:$16 sm:$0xc] %vm3_vm0, %v178_v15  }
  0x92   :  { %246 = vst.msk [vmem:[%s548_s1 + $0xf] ss:$16 sm:$0x30] %vm3_vm0, %v178_v15   ;;  %247 = vst.msk [vmem:[%s548_s1 + $0xf] ss:$16 sm:$0xc0] %vm3_vm0, %v178_v15  }

// kernel: _forward.2
= control target key start
LH: loop header
LB: loop body
LE: loop exit
PB: predicated region body
PF: predicated region fallthrough
CT: control target
= control target key end

     0   :  { %s1874_s30 = smov 0   ;;  %s2681_s0 = inlined_call_operand.vmem [shape: bf16[2,8,16,48], index: 0, kind: input, shape index: {}]   ;;  %s2682_s1 = inlined_call_operand.vmem [shape: bf16[48,32], index: 1, kind: input, shape index: {}]   ;;  %s2683_s2 = inlined_call_operand.vmem [shape: f32[1,32], index: 2, kind: input, shape index: {}]   ;;  %s2684_s3 = inlined_call_operand.vmem [shape: bf16[32,64], index: 3, kind: input, shape index: {}]   ;;  %s2685_s4 = inlined_call_operand.vmem [shape: f32[1,64], index: 4, kind: input, shape index: {}]   ;;  %s2686_s5 = inlined_call_operand.vmem [shape: f32[9,1,64], index: 5, kind: input, shape index: {}]   ;;  %s2687_s6 = inlined_call_operand.vmem [shape: f32[1,64], index: 6, kind: input, shape index: {}]   ;;  %s2688_s7 = inlined_call_operand.vmem [shape: bf16[64,32], index: 7, kind: input, shape index: {}]   ;;  %s2689_s8 = inlined_call_operand.vmem [shape: f32[1,32], index: 8, kind: input, shape index: {}]   ;;  %s2690_s9 = inlined_call_operand.vmem [shape: bf16[2,8,16,32], index: 9, kind: output, shape index: {}]  }
   0x1 LB: > { %s1581_s10 = sadd.s32 4294967295, %s1822_s30   ;;  %p1585_p0 = scmp.ge.s32.totalorder %s1822_s30, 1  ;;  %s1822_s30 = sphi %s1874_s30, %s19_s30  }
   0x2   : > { %p287_p1 = scmp.lt.s32.totalorder %s1822_s30, 3 }
   0x4   : > { %p288_p2 = pnand %p1585_p0, %p287_p1 }
   0x6   : > { %291 = sbr.rel (%p288_p2) target bundleno = 808 (0x328), region = 56 }
   0xd   : > { %v1799_v0 = vld [vmem:[%s2682_s1] sm:$0xff]   ;;  %p323_p3 = scmp.lt.s32.totalorder %s1581_s10, 1  ;;  %v1800_v1 = vld [vmem:[%s2682_s1 + $0x8] sm:$0xff]   ;;  %v1801_v2 = vld [vmem:[%s2682_s1 + $0x10] sm:$0xff]   ;;  %vm421_vm0 = vcmask 392192   ;;  %vm606_vm1 = vcmask 261120  }
   0xe   : > { %1721 = vmatprep.subr.bf16.mxu0 %v1799_v0  ;;  %v1810_v3 = vld [vmem:[%s2684_s3] sm:$0xff]   ;;  %v1811_v4 = vld [vmem:[%s2684_s3 + $0x8] sm:$0xff]   ;;  %vm1307_vm6 = vcmask 523264   ;;  %vm1509_vm7 = vcmask 257024  }
   0xf   : > { %s2783_s10 = smov (!%p323_p3, %s1581_s10), 1  ;;  %1722 = vmatpush3.bf16.msra.mxu0 %v1799_v0  ;;  %1787 = vmatprep.subr.bf16.mxu1 %v1810_v3  ;;  %v1916_v13 = vld [vmem:[%s2683_s2] ss:$0 sm:$0xff] }
  0x10   : > { %1723 = vmatprep.subr.bf16.mxu0 %v1800_v1  ;;  %s1670_s19 = sshll.u32 %s2783_s10, 6  ;;  %1789 = vmatpush3.bf16.msra.mxu1 %v1810_v3 }
  0x11   : > { %s327_s24 = scalar_lea.vmem %s2681_s0, %s1670_s19  ;;  %1788 = vmatprep.subr.bf16.mxu1 %v1811_v4  ;;  %s2616_s25 = scalar_lea.vmem %s2690_s9, %s1670_s19 }
  0x12   : > { %v1802_v5 = vld [vmem:[%s327_s24] sm:$0xff]   ;;  %v1803_v6 = vld [vmem:[%s327_s24 + $0x8] sm:$0xff]   ;;  %v1804_v7 = vld [vmem:[%s327_s24 + $0x10] sm:$0xff]  }
  0x13   : > { %1724 = vmatpush3.bf16.msra.mxu0 %v1800_v1  ;;  %1727 = vmatprep.mubr.msk.bf16.mxu0 %vm421_vm0, %v1802_v5  ;;  %v1805_v8 = vld [vmem:[%s327_s24 + $0x18] sm:$0xff]   ;;  %v1806_v9 = vld [vmem:[%s327_s24 + $0x20] sm:$0xff]   ;;  %v1807_v10 = vld [vmem:[%s327_s24 + $0x28] sm:$0xff]  }
  0x14   : > { %1725 = vmatprep.subr.bf16.mxu0 %v1801_v2  ;;  %1790 = vmatpush3.bf16.msra.mxu1 %v1811_v4  ;;  %v1808_v11 = vld [vmem:[%s327_s24 + $0x30] sm:$0xff]   ;;  %v1809_v12 = vld [vmem:[%s327_s24 + $0x38] sm:$0xff]  }
  0x17   : > { %1726 = vmatpush3.bf16.msra.mxu0 %v1801_v2 }
  0x18   : > { %1743 = vmatprep.subr.bf16.mxu0 %v1810_v3 }
  0x1a   : > { %1728 = vmatmul.mubr.msk.bf16.vlgmr.msra.gmra.mrb[0].mxu0 %vm421_vm0, %v1803_v6 }
  0x1b   : > { %1731 = vmatprep.mubr.msk.bf16.mxu0 %vm421_vm0, %v1804_v7  ;;  %1744 = vmatpush3.bf16.msra.mxu0 %v1810_v3 }
  0x1c   : > { %1745 = vmatprep.subr.bf16.mxu0 %v1811_v4 }
  0x1f   : > { %1746 = vmatpush3.bf16.msra.mxu0 %v1811_v4 }
  0x22   : > { %1732 = vmatmul.mubr.msk.bf16.gmra.mrb[4].mxu0 %vm421_vm0, %v1805_v8 }
  0x23   : > { %1735 = vmatprep.mubr.msk.bf16.mxu0 %vm421_vm0, %v1806_v9 }
  0x2a   : > { %1736 = vmatmul.mubr.msk.bf16.gmra.mrb[8].mxu0 %vm421_vm0, %v1807_v10 }
  0x2b   : > { %1739 = vmatprep.mubr.msk.bf16.mxu0 %vm421_vm0, %v1808_v11 }
  0x32   : > { %1740 = vmatmul.mubr.msk.bf16.gmra.mrb[12].mxu0 %vm421_vm0, %v1809_v12 }
  0xed   : > { %v1729_v14 = vpop.f32.mrb[0].mxu0 }
  0xee   : > { %v489_v15 = vadd.f32 %v1729_v14, %v1916_v13  ;;  %v480_v16 = vpop.f32.mrb[1].mxu0 }
  0xef   : > { %v481_v17 = vadd.f32 %v1916_v13, %v480_v16  ;;  %v1730_v18 = vpop.f32.mrb[2].mxu0 }
  0xf0   : > { %v492_v19 = vadd.f32 %v1730_v18, %v1916_v13  ;;  %v483_v20 = vpop.f32.mrb[3].mxu0  ;;  %v545_v23 = vmax.f32 %v489_v15, 0.0 }
  0xf1   : > { %v543_v21 = vmax.f32 %v481_v17, 0.0  ;;  %v484_v22 = vadd.f32 %v1916_v13, %v483_v20 }
  0xf2   : > { %v546_v24 = vmax.f32 %v492_v19, 0.0  ;;  %v1928_v30 = vmin.f32 %v545_v23, 6.0  ;;  %v1813_v23 = vld [vmem:[%s2688_s7 + $0x8] sm:$0xff]  }
  0xf3   : > { %v544_v25 = vmax.f32 %v484_v22, 0.0  ;;  %v1924_v27 = vmin.f32 %v543_v21, 6.0  ;;  %v1812_v22 = vld [vmem:[%s2688_s7] sm:$0xff]  }
  0xf4   : > { %v1922_v26 = vmin.f32 %v546_v24, 6.0  ;;  %2719 = vst [vmem:[#allocation5_spill] sm:$0xff] %v1928_v30  ;;  %1763 = vmatprep.subr.bf16.mxu1 %v1812_v22  ;;  %v1814_v24 = vld [vmem:[%s2688_s7 + $0x10] sm:$0xff]  }
  0xf5   : > { %2717 = vst [vmem:[#allocation3_spill] sm:$0xff] %v1924_v27  ;;  %v1926_v28 = vmin.f32 %v544_v25, 6.0  ;;  %v1733_v29 = vpop.f32.mrb[4].mxu0  ;;  %v1815_v25 = vld [vmem:[%s2688_s7 + $0x18] sm:$0xff]  }
  0xf6   : > { %2716 = vst [vmem:[#allocation2_spill] sm:$0xff] %v1922_v26  ;;  %v505_v31 = vadd.f32 %v1733_v29, %v1916_v13  ;;  %v496_v32 = vpop.f32.mrb[5].mxu0  ;;  %v576_v36 = vpack.c.bf16 %v1922_v26, %v1928_v30  ;;  %v760_v29 = vlaneseq }
  0xf7   : > { %2718 = vst [vmem:[#allocation4_spill] sm:$0xff] %v1926_v28  ;;  %v575_v33 = vpack.c.bf16 %v1926_v28, %v1924_v27  ;;  %v497_v34 = vadd.f32 %v1916_v13, %v496_v32  ;;  %v1734_v35 = vpop.f32.mrb[6].mxu0  ;;  %v2010_v32 = vld [vmem:[%s2686_s5 + $0x1] ss:$0 sm:$0xff] }
  0xf8   : > { %v508_v37 = vadd.f32 %v1734_v35, %v1916_v13  ;;  %v499_v38 = vpop.f32.mrb[7].mxu0  ;;  %v549_v41 = vmax.f32 %v505_v31, 0.0  ;;  %v2005_v31 = vld [vmem:[%s2686_s5] ss:$0 sm:$0xff] }
  0xf9   : > { %v547_v39 = vmax.f32 %v497_v34, 0.0  ;;  %v500_v40 = vadd.f32 %v1916_v13, %v499_v38  ;;  %1747 = vmatprep.mubr.msk.bf16.mxu0 %vm606_vm1, %v575_v33  ;;  %v2015_v33 = vld [vmem:[%s2685_s4] ss:$0 sm:$0xff]  ;;  %v2017_v34 = vshrl.u32 %v760_v29, 7  ;;  %v862_v35 = vmul.f32 0.0, %v2005_v31 }
  0xfa   : > { %v550_v42 = vmax.f32 %v508_v37, 0.0  ;;  %1748 = vmatmul.mubr.msk.bf16.vlgmr.msra.gmra.mrb[16].mxu0 %vm606_vm1, %v576_v36  ;;  %v1946_v48 = vmin.f32 %v549_v41, 6.0  ;;  %v900_v36 = vmul.f32 0.0, %v2010_v32  ;;  %v2024_v37 = vld [vmem:[%s2686_s5 + $0x2] ss:$0 sm:$0xff] }
  0xfb   : > { %v548_v43 = vmax.f32 %v500_v40, 0.0  ;;  %v1942_v45 = vmin.f32 %v547_v39, 6.0  ;;  %vm763_vm2 = vcmp.ge.s32.totalorder %v2017_v34, 1  ;;  %vm805_vm3 = vcmp.lt.s32.totalorder %v2017_v34, 7 }
  0xfc   : > { %v1940_v44 = vmin.f32 %v550_v42, 6.0  ;;  %2723 = vst [vmem:[#allocation9_spill] sm:$0xff] %v1946_v48  ;;  %v915_v42 = vadd.f32 %v900_v36, %v862_v35  ;;  %vm838_vm4 = vcmp.lt.s32.totalorder %v2017_v34, 6 }
  0xfd   : > { %2721 = vst [vmem:[#allocation7_spill] sm:$0xff] %v1942_v45  ;;  %v1944_v46 = vmin.f32 %v548_v43, 6.0  ;;  %v1737_v47 = vpop.f32.mrb[8].mxu0  ;;  %v938_v43 = vmul.f32 0.0, %v2024_v37 }
  0xfe   : > { %2720 = vst [vmem:[#allocation6_spill] sm:$0xff] %v1940_v44  ;;  %v521_v49 = vadd.f32 %v1737_v47, %v1916_v13  ;;  %v512_v50 = vpop.f32.mrb[9].mxu0  ;;  %v578_v54 = vpack.c.bf16 %v1940_v44, %v1946_v48 }
  0xff   : > { %2722 = vst [vmem:[#allocation8_spill] sm:$0xff] %v1944_v46  ;;  %v577_v51 = vpack.c.bf16 %v1944_v46, %v1942_v45  ;;  %v513_v52 = vadd.f32 %v1916_v13, %v512_v50  ;;  %v1738_v53 = vpop.f32.mrb[10].mxu0 }
 0x100   : > { %v524_v55 = vadd.f32 %v1738_v53, %v1916_v13  ;;  %v515_v56 = vpop.f32.mrb[11].mxu0  ;;  %v553_v59 = vmax.f32 %v521_v49, 0.0  ;;  %v2030_v49 = vadd.s32 8, %v2017_v34  ;;  %v2037_v53 = vld [vmem:[%s2686_s5 + $0x3] ss:$0 sm:$0xff] }
 0x101   : > { %v551_v57 = vmax.f32 %v513_v52, 0.0  ;;  %v516_v58 = vadd.f32 %v1916_v13, %v515_v56  ;;  %1751 = vmatprep.mubr.msk.bf16.mxu0 %vm606_vm1, %v577_v51 }
 0x102   : > { %v554_v60 = vmax.f32 %v524_v55, 0.0  ;;  %1752 = vmatmul.mubr.msk.bf16.gmra.mrb[20].mxu0 %vm606_vm1, %v578_v54  ;;  %v1964_v2 = vmin.f32 %v553_v59, 6.0  ;;  %vm766_vm5 = vcmp.le.s32.totalorder %v2030_v49, 8 }
 0x103   : > { %v552_v61 = vmax.f32 %v516_v58, 0.0  ;;  %v1960_v63 = vmin.f32 %v551_v57, 6.0  ;;  %v2045_v57 = vld [vmem:[%s2686_s5 + $0x6] ss:$0 sm:$0xff] }
 0x104   : > { %v1958_v62 = vmin.f32 %v554_v60, 6.0  ;;  %2727 = vst [vmem:[#allocation13_spill] sm:$0xff] %v1964_v2  ;;  %v953_v60 = vadd.f32 %v938_v43, %v915_v42 }
 0x105   : > { %2725 = vst [vmem:[#allocation11_spill] sm:$0xff] %v1960_v63  ;;  %v1962_v0 = vmin.f32 %v552_v61, 6.0  ;;  %v1741_v1 = vpop.f32.mrb[12].mxu0 }
 0x106   : > { %2724 = vst [vmem:[#allocation10_spill] sm:$0xff] %v1958_v62  ;;  %v537_v3 = vadd.f32 %v1741_v1, %v1916_v13  ;;  %v528_v4 = vpop.f32.mrb[13].mxu0  ;;  %v580_v8 = vpack.c.bf16 %v1958_v62, %v1964_v2  ;;  %v2051_v1 = vld [vmem:[%s2686_s5 + $0x7] ss:$0 sm:$0xff] }
 0x107   : > { %2726 = vst [vmem:[#allocation12_spill] sm:$0xff] %v1962_v0  ;;  %v529_v5 = vadd.f32 %v1916_v13, %v528_v4  ;;  %v1742_v6 = vpop.f32.mrb[14].mxu0  ;;  %v579_v7 = vpack.c.bf16 %v1962_v0, %v1960_v63 }
 0x108   : > { %v540_v9 = vadd.f32 %v1742_v6, %v1916_v13  ;;  %v531_v10 = vpop.f32.mrb[15].mxu0  ;;  %v557_v14 = vmax.f32 %v537_v3, 0.0  ;;  %v2059_v6 = vmul.f32 0.0, %v2051_v1 }
 0x109   : > { %v555_v11 = vmax.f32 %v529_v5, 0.0  ;;  %v532_v12 = vadd.f32 %v1916_v13, %v531_v10  ;;  %1755 = vmatprep.mubr.msk.bf16.mxu1 %vm606_vm1, %v579_v7  ;;  %v2056_v5 = vmul.f32 0.0, %v2045_v57 }
 0x10a   : > { %v558_v15 = vmax.f32 %v540_v9, 0.0  ;;  %1756 = vmatmul.mubr.msk.bf16.vlgmr.msra.gmra.mrb[0].mxu1 %vm606_vm1, %v580_v8  ;;  %v1982_v20 = vmin.f32 %v557_v14, 6.0  ;;  %2733 = vst [vmem:[#allocation19_spill] sm:$0xff] %v2059_v6 }
 0x10b   : > { %v556_v16 = vmax.f32 %v532_v12, 0.0  ;;  %v1978_v18 = vmin.f32 %v555_v11, 6.0  ;;  %1764 = vmatpush3.bf16.msra.mxu1 %v1812_v22  ;;  %2732 = vst [vmem:[#allocation18_spill] sm:$0xff] %v2056_v5 }
 0x10c   : > { %v1976_v17 = vmin.f32 %v558_v15, 6.0  ;;  %2731 = vst [vmem:[#allocation17_spill] sm:$0xff] %v1982_v20  ;;  %1765 = vmatprep.subr.bf16.mxu1 %v1813_v23 }
 0x10d   : > { %2729 = vst [vmem:[#allocation15_spill] sm:$0xff] %v1978_v18  ;;  %v1980_v19 = vmin.f32 %v556_v16, 6.0 }
 0x10e   : > { %2728 = vst [vmem:[#allocation14_spill] sm:$0xff] %v1976_v17  ;;  %v582_v13 = vpack.c.bf16 %v1976_v17, %v1982_v20 }
 0x10f   : > { %2730 = vst [vmem:[#allocation16_spill] sm:$0xff] %v1980_v19  ;;  %v581_v21 = vpack.c.bf16 %v1980_v19, %v1978_v18  ;;  %1766 = vmatpush3.bf16.msra.mxu1 %v1813_v23 }
 0x110   : > { %1767 = vmatprep.subr.bf16.mxu1 %v1814_v24 }
 0x111   : > { %1759 = vmatprep.mubr.msk.bf16.mxu1 %vm606_vm1, %v581_v21 }
 0x112   : > { %1760 = vmatmul.mubr.msk.bf16.gmra.mrb[4].mxu1 %vm606_vm1, %v582_v13 }
 0x113   : > { %1768 = vmatpush3.bf16.msra.mxu1 %v1814_v24 }
 0x114   : > { %1769 = vmatprep.subr.bf16.mxu1 %v1815_v25 }
 0x117   : > { %1770 = vmatpush3.bf16.msra.mxu1 %v1815_v25 }
 0x1cd   : > { %v1749_v38 = vpop.f32.mrb[16].mxu0 }
 0x1ce   : > { %v674_v39 = vadd.f32 %v1749_v38, %v2015_v33  ;;  %v665_v40 = vpop.f32.mrb[17].mxu0 }
 0x1cf   : > { %v666_v41 = vadd.f32 %v2015_v33, %v665_v40  ;;  %v1750_v47 = vpop.f32.mrb[18].mxu0 }
 0x1d0   : > { %v730_v50 = vmax.f32 %v674_v39, 0.0  ;;  %v677_v51 = vadd.f32 %v1750_v47, %v2015_v33  ;;  %v668_v52 = vpop.f32.mrb[19].mxu0  ;;  %v2081_v39 = vld [vmem:[%s2686_s5 + $0x4] ss:$0 sm:$0xff] }
 0x1d1   : > { %v728_v54 = vmax.f32 %v666_v41, 0.0  ;;  %v669_v55 = vadd.f32 %v2015_v33, %v668_v52 }
 0x1d2   : > { %v746_v56 = vmin.f32 %v730_v50, 6.0  ;;  %v731_v58 = vmax.f32 %v677_v51, 0.0 }
 0x1d3   : > { %v744_v59 = vmin.f32 %v728_v54, 6.0  ;;  %v729_v61 = vmax.f32 %v669_v55, 0.0 }
 0x1d4   : > { %v775_v3 = vsel %vm763_vm2, %v746_v56, 0.0  ;;  %v747_v4 = vmin.f32 %v731_v58, 6.0 }
 0x1d5   : > { %v790_v7 = vrot.slane %v775_v3, 1  ;;  %v823_v8 = vrot.slane %v775_v3, 2  ;;  %v865_v9 = vmul.f32 %v2005_v31, %v775_v3  ;;  %v2063_v10 = vmul.f32 %v2037_v53, %v775_v3  ;;  %v1753_v11 = vpop.f32.mrb[20].mxu0 }
 0x1d6   : > { %v2066_v12 = vmul.f32 %v2045_v57, %v775_v3  ;;  %v773_v14 = vsel %vm763_vm2, %v744_v59, 0.0  ;;  %v776_v15 = vsel %vm766_vm5, %v747_v4, 0.0  ;;  %v745_v16 = vmin.f32 %v729_v61, 6.0  ;;  %v681_v21 = vpop.f32.mrb[21].mxu0 }
 0x1d7   : > { %v789_v13 = vrot.slane %v773_v14, 1  ;;  %v822_v22 = vrot.slane %v773_v14, 2  ;;  %v863_v23 = vmul.f32 %v2005_v31, %v773_v14  ;;  %v976_v24 = vmul.f32 %v2037_v53, %v773_v14  ;;  %v2074_v25 = vpop.f32.mrb[22].mxu0 }
 0x1d8   : > { %v798_v29 = vrot.slane %v776_v15, 1  ;;  %v831_v35 = vrot.slane %v776_v15, 2  ;;  %v866_v36 = vmul.f32 %v2005_v31, %v776_v15  ;;  %v979_v38 = vmul.f32 %v2037_v53, %v776_v15  ;;  %v2083_v40 = vpop.f32.mrb[23].mxu0 }
 0x1d9   : > { %v992_v41 = vadd.f32 %v976_v24, %v953_v60  ;;  %v1097_v42 = vmul.f32 %v2045_v57, %v776_v15  ;;  %v774_v43 = vsel %vm766_vm5, %v745_v16, 0.0  ;;  %v690_v47 = vadd.f32 %v1753_v11, %v2015_v33  ;;  %v2120_v11 = vld [vmem:[%s2686_s5 + $0x5] ss:$0 sm:$0xff] }
 0x1da   : > { %v2091_v50 = vsel %vm805_vm3, %v790_v7, %v798_v29  ;;  %v2095_v51 = vsel %vm805_vm3, %v798_v29, %v790_v7  ;;  %v2099_v52 = vsel %vm838_vm4, %v823_v8, %v831_v35  ;;  %v2103_v54 = vsel %vm838_vm4, %v831_v35, %v823_v8 }
 0x1db   : > { %v903_v55 = vmul.f32 %v2010_v32, %v2091_v50  ;;  %v904_v56 = vmul.f32 %v2010_v32, %v2095_v51  ;;  %v1018_v58 = vmul.f32 %v2081_v39, %v2091_v50  ;;  %v1019_v59 = vmul.f32 %v2081_v39, %v2095_v51 }
 0x1dc   : > { %v797_v61 = vrot.slane %v774_v43, 1  ;;  %v830_v3 = vrot.slane %v774_v43, 2  ;;  %v864_v4 = vmul.f32 %v2005_v31, %v774_v43  ;;  %v977_v7 = vmul.f32 %v2037_v53, %v774_v43 }
 0x1dd   : > { %v2115_v8 = vadd.f32 %v904_v56, %v866_v36  ;;  %v734_v14 = vmax.f32 %v690_v47, 0.0  ;;  %v682_v15 = vadd.f32 %v2015_v33, %v681_v21  ;;  %v918_v16 = vadd.f32 %v903_v55, %v865_v9  ;;  %v1757_v24 = vpop.f32.mrb[0].mxu1 }
 0x1de   : > { %v806_v29 = vsel %vm805_vm3, %v789_v13, %v797_v61  ;;  %v814_v35 = vsel %vm805_vm3, %v797_v61, %v789_v13  ;;  %v839_v36 = vsel %vm838_vm4, %v822_v22, %v830_v3  ;;  %v847_v43 = vsel %vm838_vm4, %v830_v3, %v822_v22  ;;  %v697_v56 = vpop.f32.mrb[1].mxu1 }
 0x1df   : > { %v901_v19 = vmul.f32 %v2010_v32, %v806_v29  ;;  %v902_v47 = vmul.f32 %v2010_v32, %v814_v35  ;;  %v939_v9 = vmul.f32 %v2024_v37, %v839_v36  ;;  %v940_v21 = vmul.f32 %v2024_v37, %v847_v43  ;;  %v1758_v55 = vpop.f32.mrb[2].mxu1 }
 0x1e0   : > { %v993_v17 = vadd.f32 %v977_v7, %v953_v60  ;;  %v1016_v18 = vmul.f32 %v2081_v39, %v806_v29  ;;  %v1017_v13 = vmul.f32 %v2081_v39, %v814_v35  ;;  %v1056_v61 = vmul.f32 %v2120_v11, %v839_v36  ;;  %v700_v20 = vpop.f32.mrb[3].mxu1 }
 0x1e1   : > { %v916_v0 = vadd.f32 %v901_v19, %v863_v23  ;;  %v917_v22 = vadd.f32 %v902_v47, %v864_v4  ;;  %v1057_v3 = vmul.f32 %v2120_v11, %v847_v43  ;;  %v750_v62 = vmin.f32 %v734_v14, 6.0 }
 0x1e2   : > { %v1032_v63 = vadd.f32 %v1016_v18, %v992_v41  ;;  %v1033_v2 = vadd.f32 %v1017_v13, %v993_v17  ;;  %v732_v46 = vmax.f32 %v682_v15, 0.0  ;;  %v941_v44 = vmul.f32 %v2024_v37, %v2099_v52 }
 0x1e3   : > { %v954_v45 = vadd.f32 %v939_v9, %v916_v0  ;;  %v955_v60 = vadd.f32 %v940_v21, %v917_v22  ;;  %v2143_v7 = vsel %vm763_vm2, %v750_v62, 0.0  ;;  %v1058_v29 = vmul.f32 %v2120_v11, %v2099_v52 }
 0x1e4   : > { %v2147_v19 = vadd.f32 %v1056_v61, %v1032_v63  ;;  %v1073_v23 = vadd.f32 %v1057_v3, %v1033_v2  ;;  %v792_v4 = vrot.slane %v2143_v7, 1  ;;  %v825_v17 = vrot.slane %v2143_v7, 2 }
 0x1e5   : > { %v994_v18 = vadd.f32 %v2063_v10, %v954_v45  ;;  %v995_v41 = vadd.f32 %v979_v38, %v955_v60  ;;  %v2154_v0 = vmul.f32 %v2005_v31, %v2143_v7  ;;  %v2158_v62 = vmul.f32 %v2037_v53, %v2143_v7  ;;  %v1761_v14 = vpop.f32.mrb[4].mxu1 }
 0x1e6   : > { %v2160_v15 = vadd.f32 %v1097_v42, %v1073_v23  ;;  %v2164_v63 = vmul.f32 %v2045_v57, %v2143_v7  ;;  %v748_v2 = vmin.f32 %v732_v46, 6.0  ;;  %v956_v35 = vadd.f32 %v941_v44, %v918_v16  ;;  %v713_v36 = vpop.f32.mrb[5].mxu1 }
 0x1e7   : > { %v1035_v45 = vadd.f32 %v1019_v59, %v995_v41  ;;  %v1034_v10 = vadd.f32 %v1018_v58, %v994_v18  ;;  %v693_v38 = vadd.f32 %v2074_v25, %v2015_v33  ;;  %v685_v43 = vadd.f32 %v2015_v33, %v2083_v40  ;;  %v2170_v47 = vpop.f32.mrb[6].mxu1 }
 0x1e8   : > { %2734 = vst [vmem:[#allocation20_spill] sm:$0xff] %v2164_v63  ;;  %v777_v42 = vsel %vm763_vm2, %v748_v2, 0.0  ;;  %v942_v9 = vmul.f32 %v2024_v37, %v2103_v54  ;;  %v1059_v44 = vmul.f32 %v2120_v11, %v2103_v54  ;;  %v706_v46 = vadd.f32 %v1757_v24, %v2015_v33  ;;  %v2179_v58 = vpop.f32.mrb[7].mxu1 }
 0x1e9   : > { %v791_v59 = vrot.slane %v777_v42, 1  ;;  %v824_v25 = vrot.slane %v777_v42, 2  ;;  %v867_v16 = vmul.f32 %v2005_v31, %v777_v42  ;;  %v980_v40 = vmul.f32 %v2037_v53, %v777_v42 }
 0x1ea   : > { %v1074_v21 = vadd.f32 %v1058_v29, %v1034_v10  ;;  %v1098_v13 = vmul.f32 %v2045_v57, %v777_v42  ;;  %v735_v61 = vmax.f32 %v693_v38, 0.0  ;;  %v733_v22 = vmax.f32 %v685_v43, 0.0 }
 0x1eb   : > { %v996_v3 = vadd.f32 %v980_v40, %v956_v35  ;;  %v957_v60 = vadd.f32 %v942_v9, %v2115_v8  ;;  %v1075_v7 = vadd.f32 %v1059_v44, %v1035_v45  ;;  %v738_v23 = vmax.f32 %v706_v46, 0.0 }
 0x1ec   : > { %v1113_v18 = vadd.f32 %v1098_v13, %v1074_v21  ;;  %v751_v24 = vmin.f32 %v735_v61, 6.0  ;;  %v749_v41 = vmin.f32 %v733_v22, 6.0  ;;  %v698_v2 = vadd.f32 %v2015_v33, %v697_v56 }
 0x1ed   : > { %v754_v48 = vmin.f32 %v738_v23, 6.0  ;;  %v2187_v28 = vadd.f32 %v1758_v55, %v2015_v33  ;;  %v2190_v29 = vadd.f32 %v2015_v33, %v700_v20  ;;  %v2193_v10 = vadd.f32 %v1761_v14, %v2015_v33 }
 0x1ee   : > { %v780_v8 = vsel %vm766_vm5, %v751_v24, 0.0  ;;  %v778_v35 = vsel %vm766_vm5, %v749_v41, 0.0  ;;  %v736_v45 = vmax.f32 %v698_v2, 0.0  ;;  %v2200_v38 = vadd.f32 %v2015_v33, %v713_v36 }
 0x1ef   : > { %v800_v56 = vrot.slane %v780_v8, 1  ;;  %v833_v43 = vrot.slane %v780_v8, 2  ;;  %v870_v55 = vmul.f32 %v2005_v31, %v780_v8  ;;  %v983_v20 = vmul.f32 %v2037_v53, %v780_v8 }
 0x1f0   : > { %v2205_v42 = vmul.f32 %v2045_v57, %v780_v8  ;;  %v799_v14 = vrot.slane %v778_v35, 1  ;;  %v832_v9 = vrot.slane %v778_v35, 2  ;;  %v868_v44 = vmul.f32 %v2005_v31, %v778_v35 }
 0x1f1   : > { %v2210_v46 = vsel %vm805_vm3, %v792_v4, %v800_v56  ;;  %v2214_v36 = vsel %vm805_vm3, %v800_v56, %v792_v4  ;;  %v2218_v40 = vsel %vm838_vm4, %v825_v17, %v833_v43  ;;  %v2222_v21 = vsel %vm838_vm4, %v833_v43, %v825_v17 }
 0x1f2   : > { %2735 = vst [vmem:[#allocation21_spill] sm:$0xff] %v2205_v42  ;;  %2736 = vst [vmem:[#allocation22_spill] sm:$0xff] %v2210_v46  ;;  %v907_v13 = vmul.f32 %v2010_v32, %v2210_v46  ;;  %v908_v61 = vmul.f32 %v2010_v32, %v2214_v36  ;;  %v1022_v22 = vmul.f32 %v2081_v39, %v2210_v46  ;;  %v2258_v46 = vld [vmem:[%s2686_s5 + $0x8] ss:$0 sm:$0xff] }
 0x1f3   : > { %2737 = vst [vmem:[#allocation23_spill] sm:$0xff] %v2214_v36  ;;  %2738 = vst [vmem:[#allocation24_spill] sm:$0xff] %v2218_v40  ;;  %v1023_v4 = vmul.f32 %v2081_v39, %v2214_v36  ;;  %v808_v23 = vsel %vm805_vm3, %v791_v59, %v799_v14  ;;  %v816_v24 = vsel %vm805_vm3, %v799_v14, %v791_v59 }
 0x1f4   : > { %2739 = vst [vmem:[#allocation25_spill] sm:$0xff] %v2222_v21  ;;  %v841_v17 = vsel %vm838_vm4, %v824_v25, %v832_v9  ;;  %v849_v41 = vsel %vm838_vm4, %v832_v9, %v824_v25  ;;  %v923_v2 = vadd.f32 %v908_v61, %v870_v55  ;;  %v905_v8 = vmul.f32 %v2010_v32, %v808_v23 }
 0x1f5   : > { %v906_v56 = vmul.f32 %v2010_v32, %v816_v24  ;;  %v943_v43 = vmul.f32 %v2024_v37, %v841_v17  ;;  %v944_v26 = vmul.f32 %v2024_v37, %v849_v41  ;;  %v981_v27 = vmul.f32 %v2037_v53, %v778_v35 }
 0x1f6   : > { %v1020_v30 = vmul.f32 %v2081_v39, %v808_v23  ;;  %v1021_v59 = vmul.f32 %v2081_v39, %v816_v24  ;;  %v920_v14 = vadd.f32 %v905_v8, %v867_v16  ;;  %v2248_v5 = vmul.f32 %v2120_v11, %v841_v17 }
 0x1f7   : > { %v921_v6 = vadd.f32 %v906_v56, %v868_v44  ;;  %v1061_v25 = vmul.f32 %v2120_v11, %v849_v41  ;;  %v997_v55 = vadd.f32 %v981_v27, %v957_v60  ;;  %v1099_v61 = vmul.f32 %v2045_v57, %v778_v35 }
 0x1f8   : > { %2740 = vst [vmem:[#allocation26_spill] sm:$0xff] %v2248_v5  ;;  %v2251_v9 = vadd.f32 %v1020_v30, %v996_v3  ;;  %v1137_v36 = vmul.f32 %v2051_v1, %v808_v23  ;;  %v958_v42 = vadd.f32 %v943_v43, %v920_v14  ;;  %v1138_v44 = vmul.f32 %v2051_v1, %v816_v24 }
 0x1f9   : > { %v959_v16 = vadd.f32 %v944_v26, %v921_v6  ;;  %v1176_v8 = vmul.f32 %v2258_v46, %v841_v17  ;;  %v1037_v56 = vadd.f32 %v1021_v59, %v997_v55  ;;  %v1114_v63 = vadd.f32 %v1099_v61, %v1075_v7 }
 0x1fa   : > { %v1152_v27 = vadd.f32 %v1137_v36, %v1113_v18  ;;  %v1177_v30 = vmul.f32 %v2258_v46, %v849_v41  ;;  %v783_v60 = vsel %vm763_vm2, %v754_v48, 0.0  ;;  %v752_v35 = vmin.f32 %v736_v45, 6.0 }
 0x1fb   : > { %v999_v3 = vadd.f32 %v983_v20, %v959_v16  ;;  %v922_v23 = vadd.f32 %v907_v13, %v2154_v0  ;;  %v2266_v5 = vadd.f32 %v1061_v25, %v1037_v56  ;;  %v1153_v43 = vadd.f32 %v1138_v44, %v1114_v63  ;;  %v2287_v20 = vld [vmem:[%s2687_s6] ss:$0 sm:$0xff] }
 0x1fc   : > { %v2268_v26 = vadd.f32 %v1176_v8, %v1152_v27  ;;  %v794_v6 = vrot.slane %v783_v60, 1  ;;  %v827_v24 = vrot.slane %v783_v60, 2  ;;  %v2271_v17 = vmul.f32 %v2005_v31, %v783_v60 }
 0x1fd   : > { %v2274_v7 = vmul.f32 %v2037_v53, %v783_v60  ;;  %v2277_v18 = vmul.f32 %v2045_v57, %v783_v60  ;;  %v1192_v48 = vadd.f32 %v1177_v30, %v1153_v43  ;;  %v781_v0 = vsel %vm763_vm2, %v752_v35, 0.0 }
 0x1fe   : > { %v945_v63 = vmul.f32 %v2024_v37, %v2218_v40  ;;  %v998_v45 = vadd.f32 %v2158_v62, %v958_v42  ;;  %v793_v36 = vrot.slane %v781_v0, 1  ;;  %v826_v13 = vrot.slane %v781_v0, 2 }
 0x1ff   : > { %2741 = vst [vmem:[#allocation27_spill] sm:$0xff] %v2277_v18  ;;  %v871_v41 = vmul.f32 %v2005_v31, %v781_v0  ;;  %v984_v59 = vmul.f32 %v2037_v53, %v781_v0  ;;  %v1215_v14 = vadd.f32 %v2287_v20, %v1192_v48  ;;  %v1062_v61 = vmul.f32 %v2120_v11, %v2218_v40 }
 0x200   : > { %v960_v25 = vadd.f32 %v945_v63, %v922_v23  ;;  %v1038_v55 = vadd.f32 %v1022_v22, %v998_v45  ;;  %v1102_v62 = vmul.f32 %v2045_v57, %v781_v0  ;;  %v739_v42 = vmax.f32 %v2187_v28, 0.0 }
 0x201   : > { %v737_v16 = vmax.f32 %v2190_v29, 0.0  ;;  %v946_v44 = vmul.f32 %v2024_v37, %v2222_v21  ;;  %v1231_v8 = vmax.f32 %v1215_v14, 0.0  ;;  %v1039_v30 = vadd.f32 %v1023_v4, %v999_v3 }
 0x202   : > { %v1000_v56 = vadd.f32 %v984_v59, %v960_v25  ;;  %v1078_v27 = vadd.f32 %v1062_v61, %v1038_v55  ;;  %v755_v60 = vmin.f32 %v739_v42, 6.0  ;;  %v1063_v22 = vmul.f32 %v2120_v11, %v2222_v21 }
 0x203   : > { %v753_v35 = vmin.f32 %v737_v16, 6.0  ;;  %v961_v23 = vadd.f32 %v946_v44, %v923_v2  ;;  %v2301_v43 = vmin.f32 %v1231_v8, 6.0  ;;  %v742_v28 = vmax.f32 %v2193_v10, 0.0 }
 0x204   : > { %v2303_v48 = vadd.f32 %v1102_v62, %v1078_v27  ;;  %v740_v29 = vmax.f32 %v2200_v38, 0.0  ;;  %v784_v0 = vsel %vm766_vm5, %v755_v60, 0.0  ;;  %v1079_v3 = vadd.f32 %v1063_v22, %v1039_v30 }
 0x205   : > { %2742 = vst [vmem:[#allocation28_spill] sm:$0xff] %v2301_v43  ;;  %v782_v4 = vsel %vm766_vm5, %v753_v35, 0.0  ;;  %v2313_v2 = vadd.f32 %v2170_v47, %v2015_v33  ;;  %v802_v63 = vrot.slane %v784_v0, 1  ;;  %v835_v45 = vrot.slane %v784_v0, 2 }
 0x206   : > { %2743 = vst [vmem:[#allocation29_spill] sm:$0xff] %v2303_v48  ;;  %v874_v59 = vmul.f32 %v2005_v31, %v784_v0  ;;  %v987_v14 = vmul.f32 %v2037_v53, %v784_v0  ;;  %v2318_v10 = vmul.f32 %v2045_v57, %v784_v0  ;;  %v801_v38 = vrot.slane %v782_v4, 1 }
 0x207   : > { %v834_v25 = vrot.slane %v782_v4, 2  ;;  %v872_v55 = vmul.f32 %v2005_v31, %v782_v4  ;;  %v2323_v61 = vsel %vm805_vm3, %v794_v6, %v802_v63  ;;  %v2327_v47 = vsel %vm805_vm3, %v802_v63, %v794_v6 }
 0x208   : > { %2744 = vst [vmem:[#allocation30_spill] sm:$0xff] %v2318_v10  ;;  %2745 = vst [vmem:[#allocation31_spill] sm:$0xff] %v2323_v61  ;;  %v2331_v62 = vsel %vm838_vm4, %v827_v24, %v835_v45  ;;  %v2335_v42 = vsel %vm838_vm4, %v835_v45, %v827_v24  ;;  %v911_v16 = vmul.f32 %v2010_v32, %v2323_v61  ;;  %v758_v40 = vmin.f32 %v742_v28, 6.0 }
 0x209   : > { %2746 = vst [vmem:[#allocation32_spill] sm:$0xff] %v2327_v47  ;;  %v912_v44 = vmul.f32 %v2010_v32, %v2327_v47  ;;  %v1026_v8 = vmul.f32 %v2081_v39, %v2323_v61  ;;  %v1027_v6 = vmul.f32 %v2081_v39, %v2327_v47  ;;  %v2347_v27 = vsel %vm805_vm3, %v793_v36, %v801_v38 }
 0x20a   : > { %2747 = vst [vmem:[#allocation33_spill] sm:$0xff] %v2347_v27  ;;  %v818_v24 = vsel %vm805_vm3, %v801_v38, %v793_v36  ;;  %v2353_v30 = vsel %vm838_vm4, %v826_v13, %v834_v25  ;;  %v2357_v60 = vsel %vm838_vm4, %v834_v25, %v826_v13  ;;  %v909_v22 = vmul.f32 %v2010_v32, %v2347_v27 }
 0x20b   : > { %v927_v35 = vadd.f32 %v912_v44, %v874_v59  ;;  %v910_v0 = vmul.f32 %v2010_v32, %v818_v24  ;;  %v947_v63 = vmul.f32 %v2024_v37, %v2353_v30  ;;  %v948_v36 = vmul.f32 %v2024_v37, %v2357_v60 }
 0x20c   : > { %v985_v45 = vmul.f32 %v2037_v53, %v782_v4  ;;  %v1024_v38 = vmul.f32 %v2081_v39, %v2347_v27  ;;  %v1025_v13 = vmul.f32 %v2081_v39, %v818_v24  ;;  %v924_v25 = vadd.f32 %v909_v22, %v871_v41 }
 0x20d   : > { %v925_v59 = vadd.f32 %v910_v0, %v872_v55  ;;  %v2372_v44 = vmul.f32 %v2120_v11, %v2353_v30  ;;  %v1065_v18 = vmul.f32 %v2120_v11, %v2357_v60  ;;  %v1103_v10 = vmul.f32 %v2045_v57, %v782_v4 }
 0x20e   : > { %v1001_v47 = vadd.f32 %v985_v45, %v961_v23  ;;  %v2376_v61 = vadd.f32 %v1024_v38, %v1000_v56  ;;  %v1142_v48 = vmul.f32 %v2051_v1, %v818_v24  ;;  %v962_v21 = vadd.f32 %v947_v63, %v924_v25 }
 0x20f   : > { %2748 = vst [vmem:[#allocation34_spill] sm:$0xff] %v2372_v44  ;;  %v963_v27 = vadd.f32 %v948_v36, %v925_v59  ;;  %v756_v43 = vmin.f32 %v740_v29, 6.0  ;;  %v1118_v55 = vadd.f32 %v1103_v10, %v1079_v3  ;;  %v926_v22 = vadd.f32 %v911_v16, %v2271_v17 }
 0x210   : > { %v1041_v41 = vadd.f32 %v1025_v13, %v1001_v47  ;;  %v949_v0 = vmul.f32 %v2024_v37, %v2331_v62  ;;  %v787_v56 = vsel %vm763_vm2, %v758_v40, 0.0  ;;  %v1002_v4 = vadd.f32 %v2274_v7, %v962_v21 }
 0x211   : > { %v1003_v44 = vadd.f32 %v987_v14, %v963_v27  ;;  %v2387_v23 = vsel %vm763_vm2, %v756_v43, 0.0  ;;  %v2392_v28 = vadd.f32 %v1142_v48, %v1118_v55  ;;  %v796_v29 = vrot.slane %v787_v56, 1 }
 0x212   : > { %v2390_v24 = vadd.f32 %v1065_v18, %v1041_v41  ;;  %v829_v3 = vrot.slane %v787_v56, 2  ;;  %v2395_v17 = vmul.f32 %v2037_v53, %v787_v56  ;;  %v2398_v14 = vmul.f32 %v2045_v57, %v787_v56 }
 0x213   : > { %v795_v40 = vrot.slane %v2387_v23, 1  ;;  %v828_v10 = vrot.slane %v2387_v23, 2  ;;  %v2404_v43 = vmul.f32 %v2005_v31, %v2387_v23  ;;  %v964_v21 = vadd.f32 %v949_v0, %v926_v22 }
 0x214   : > { %v988_v7 = vmul.f32 %v2037_v53, %v2387_v23  ;;  %v1042_v18 = vadd.f32 %v1026_v8, %v1002_v4  ;;  %v1066_v48 = vmul.f32 %v2120_v11, %v2331_v62  ;;  %v1106_v47 = vmul.f32 %v2045_v57, %v2387_v23 }
 0x215   : > { %v743_v16 = vmax.f32 %v2313_v2, 0.0  ;;  %v717_v27 = vadd.f32 %v2015_v33, %v2179_v58  ;;  %v950_v36 = vmul.f32 %v2024_v37, %v2335_v42  ;;  %v1043_v45 = vadd.f32 %v1027_v6, %v1003_v44 }
 0x216   : > { %v1004_v63 = vadd.f32 %v988_v7, %v964_v21  ;;  %v1067_v38 = vmul.f32 %v2120_v11, %v2335_v42  ;;  %v1082_v8 = vadd.f32 %v1066_v48, %v1042_v18  ;;  %v1111_v59 = vadd.f32 %v2066_v12, %v2147_v19 }
 0x217   : > { %v759_v13 = vmin.f32 %v743_v16, 6.0  ;;  %v741_v25 = vmax.f32 %v717_v27, 0.0  ;;  %v965_v41 = vadd.f32 %v950_v36, %v927_v35  ;;  %v1135_v2 = vmul.f32 %v2051_v1, %v2091_v50 }
 0x218   : > { %v1083_v55 = vadd.f32 %v1067_v38, %v1043_v45  ;;  %v1136_v33 = vmul.f32 %v2051_v1, %v2095_v51  ;;  %v2425_v58 = vadd.f32 %v1106_v47, %v1082_v8  ;;  %v1174_v22 = vmul.f32 %v2258_v46, %v2099_v52 }
 0x219   : > { %v788_v6 = vsel %vm766_vm5, %v759_v13, 0.0  ;;  %v757_v44 = vmin.f32 %v741_v25, 6.0  ;;  %v1150_v51 = vadd.f32 %v1135_v2, %v1111_v59  ;;  %v1175_v23 = vmul.f32 %v2258_v46, %v2103_v54 }
 0x21a   : > { %v804_v0 = vrot.slane %v788_v6, 1  ;;  %v837_v56 = vrot.slane %v788_v6, 2  ;;  %v991_v12 = vmul.f32 %v2037_v53, %v788_v6  ;;  %v2433_v19 = vmul.f32 %v2045_v57, %v788_v6 }
 0x21b   : > { %v786_v50 = vsel %vm766_vm5, %v757_v44, 0.0  ;;  %v1151_v35 = vadd.f32 %v1136_v33, %v2160_v15  ;;  %v1189_v8 = vadd.f32 %v1174_v22, %v1150_v51  ;;  %v1214_v25 = vadd.f32 %v2287_v20, %v2268_v26 }
 0x21c   : > { %v813_v4 = vsel %vm805_vm3, %v796_v29, %v804_v0  ;;  %v821_v52 = vsel %vm805_vm3, %v804_v0, %v796_v29  ;;  %v846_v21 = vsel %vm838_vm4, %v829_v3, %v837_v56  ;;  %v854_v7 = vsel %vm838_vm4, %v837_v56, %v829_v3 }
 0x21d   : > { %v2449_v49 = vmul.f32 %v2081_v39, %v813_v4  ;;  %v1031_v15 = vmul.f32 %v2081_v39, %v821_v52  ;;  %v2453_v18 = vmul.f32 %v2120_v11, %v846_v21  ;;  %v2456_v54 = vmul.f32 %v2120_v11, %v854_v7 }
 0x21e   : > { %v2459_v48 = vmul.f32 %v2051_v1, %v813_v4  ;;  %v2462_v29 = vmul.f32 %v2051_v1, %v821_v52  ;;  %v2465_v47 = vmul.f32 %v2258_v46, %v846_v21  ;;  %v2468_v3 = vmul.f32 %v2258_v46, %v854_v7 }
 0x21f   : > { %v803_v16 = vrot.slane %v786_v50, 1  ;;  %v836_v27 = vrot.slane %v786_v50, 2  ;;  %v876_v36 = vmul.f32 %v2005_v31, %v786_v50  ;;  %v989_v45 = vmul.f32 %v2037_v53, %v786_v50 }
 0x220   : > { %v1107_v38 = vmul.f32 %v2045_v57, %v786_v50  ;;  %v1190_v13 = vadd.f32 %v1175_v23, %v1151_v35  ;;  %v1212_v51 = vadd.f32 %v2287_v20, %v1189_v8  ;;  %v1230_v4 = vmax.f32 %v1214_v25, 0.0  ;;  %v2751_v8 = vld [vmem:[#allocation21_spill] sm:$0xff]  ;;  %v2752_v25 = vld [vmem:[#allocation22_spill] sm:$0xff] }
 0x221   : > { %v2477_v59 = vsel %vm805_vm3, %v795_v40, %v803_v16  ;;  %v820_v2 = vsel %vm805_vm3, %v803_v16, %v795_v40  ;;  %v2483_v33 = vsel %vm838_vm4, %v828_v10, %v836_v27  ;;  %v2487_v31 = vsel %vm838_vm4, %v836_v27, %v828_v10 }
 0x222   : > { %v913_v53 = vmul.f32 %v2010_v32, %v2477_v59  ;;  %v914_v57 = vmul.f32 %v2010_v32, %v820_v2  ;;  %v951_v26 = vmul.f32 %v2024_v37, %v2483_v33  ;;  %v952_v6 = vmul.f32 %v2024_v37, %v2487_v31 }
 0x223   : > { %v1005_v40 = vadd.f32 %v989_v45, %v965_v41  ;;  %v1028_v44 = vmul.f32 %v2081_v39, %v2477_v59  ;;  %v1029_v22 = vmul.f32 %v2081_v39, %v820_v2  ;;  %v2501_v34 = vmul.f32 %v2120_v11, %v2483_v33  ;;  %v2750_v45 = vld [vmem:[#allocation20_spill] sm:$0xff] }
 0x224   : > { %v928_v10 = vadd.f32 %v913_v53, %v2404_v43  ;;  %v929_v32 = vadd.f32 %v914_v57, %v876_v36  ;;  %v1069_v0 = vmul.f32 %v2120_v11, %v2487_v31  ;;  %v1122_v56 = vadd.f32 %v1107_v38, %v1083_v55  ;;  %v2749_v11 = vld [vmem:[#allocation26_spill] sm:$0xff] }
 0x225   : > { %v2506_v50 = vadd.f32 %v1028_v44, %v1004_v63  ;;  %v1045_v37 = vadd.f32 %v1029_v22, %v1005_v40  ;;  %v1146_v41 = vmul.f32 %v2051_v1, %v820_v2  ;;  %v1213_v23 = vadd.f32 %v2287_v20, %v1190_v13  ;;  %v2755_v40 = vld [vmem:[#allocation24_spill] sm:$0xff]  ;;  %v2756_v22 = vld [vmem:[#allocation25_spill] sm:$0xff] }
 0x226   : > { %v966_v39 = vadd.f32 %v951_v26, %v928_v10  ;;  %v967_v35 = vadd.f32 %v952_v6, %v929_v32  ;;  %v1228_v21 = vmax.f32 %v1212_v51, 0.0  ;;  %v1076_v55 = vadd.f32 %v2749_v11, %v2251_v9  ;;  %v2753_v26 = vld [vmem:[#allocation28_spill] sm:$0xff]  ;;  %v2754_v6 = vld [vmem:[#allocation23_spill] sm:$0xff]  ;;  %v2757_v32 = vld [vmem:[#allocation33_spill] sm:$0xff] }
 0x227   : > { %v2511_v52 = vadd.f32 %v1069_v0, %v1045_v37  ;;  %v2513_v43 = vadd.f32 %v1146_v41, %v1122_v56  ;;  %v1229_v16 = vmax.f32 %v1213_v23, 0.0  ;;  %v1246_v27 = vmin.f32 %v1230_v4, 6.0  ;;  %v2758_v51 = vld [vmem:[#allocation29_spill] sm:$0xff]  ;;  %v2760_v4 = vld [vmem:[#allocation30_spill] sm:$0xff] }
 0x228   : > { %v2518_v63 = vadd.f32 %v2395_v17, %v966_v39  ;;  %v1007_v7 = vadd.f32 %v991_v12, %v967_v35  ;;  %v1244_v36 = vmin.f32 %v1228_v21, 6.0  ;;  %v1115_v38 = vadd.f32 %v2750_v45, %v1076_v55  ;;  %v2759_v35 = vld [vmem:[#allocation34_spill] sm:$0xff] }
 0x229   : > { %v1116_v13 = vadd.f32 %v2751_v8, %v2266_v5  ;;  %v1139_v2 = vmul.f32 %v2051_v1, %v2752_v25  ;;  %v1245_v57 = vmin.f32 %v1229_v16, 6.0  ;;  %v1261_v9 = vpack.c.bf16 %v2753_v26, %v1246_v27  ;;  %v2762_v16 = vld [vmem:[#allocation32_spill] sm:$0xff] }
 0x22a   : > { %v2525_v53 = vadd.f32 %v1031_v15, %v1007_v7  ;;  %v1140_v17 = vmul.f32 %v2051_v1, %v2754_v6  ;;  %v1178_v44 = vmul.f32 %v2258_v46, %v2755_v40  ;;  %v1179_v10 = vmul.f32 %v2258_v46, %v2756_v22  ;;  %v2761_v7 = vld [vmem:[#allocation31_spill] sm:$0xff] }
 0x22b   : > { %v1154_v12 = vadd.f32 %v1139_v2, %v1115_v38  ;;  %v1141_v5 = vmul.f32 %v2051_v1, %v2757_v32  ;;  %v1260_v0 = vpack.c.bf16 %v1245_v57, %v1244_v36  ;;  %v1180_v15 = vmul.f32 %v2258_v46, %v2353_v30 }
 0x22c   : > { %v1155_v56 = vadd.f32 %v1140_v17, %v1116_v13  ;;  %v1181_v37 = vmul.f32 %v2258_v46, %v2357_v60  ;;  %v1080_v23 = vadd.f32 %v2759_v35, %v2376_v61  ;;  %v1120_v21 = vadd.f32 %v2760_v4, %v2390_v24  ;;  %v2763_v61 = vld [vmem:[#allocation27_spill] sm:$0xff] }
 0x22d   : > { %v1193_v41 = vadd.f32 %v1178_v44, %v1154_v12  ;;  %v1156_v39 = vadd.f32 %v1141_v5, %v2758_v51  ;;  %1771 = vmatprep.mubr.msk.bf16.mxu1 %vm1307_vm6, %v1260_v0  ;;  %v1143_v30 = vmul.f32 %v2051_v1, %v2761_v7  ;;  %v1144_v60 = vmul.f32 %v2051_v1, %v2762_v16 }
 0x22e   : > { %v1194_v11 = vadd.f32 %v1179_v10, %v1155_v56  ;;  %v1196_v55 = vadd.f32 %v1181_v37, %v2392_v28  ;;  %1772 = vmatmul.mubr.msk.bf16.vlgmr.msra.gmra.mrb[8].mxu1 %vm1307_vm6, %v1261_v9  ;;  %v1119_v45 = vadd.f32 %v2763_v61, %v1080_v23  ;;  %v1182_v24 = vmul.f32 %v2258_v46, %v2331_v62 }
 0x22f   : > { %v1216_v27 = vadd.f32 %v2287_v20, %v1193_v41  ;;  %v1195_v36 = vadd.f32 %v1180_v15, %v1156_v39  ;;  %v1159_v8 = vadd.f32 %v1144_v60, %v1120_v21  ;;  %v1183_v13 = vmul.f32 %v2258_v46, %v2335_v42 }
 0x230   : > { %v1217_v38 = vadd.f32 %v2287_v20, %v1194_v11  ;;  %v1219_v28 = vadd.f32 %v2287_v20, %v1196_v55  ;;  %v1158_v57 = vadd.f32 %v1143_v30, %v1119_v45  ;;  %v1145_v26 = vmul.f32 %v2051_v1, %v2477_v59 }
 0x231   : > { %v1232_v25 = vmax.f32 %v1216_v27, 0.0  ;;  %v1218_v2 = vadd.f32 %v2287_v20, %v1195_v36  ;;  %v1198_v17 = vadd.f32 %v1183_v13, %v1159_v8  ;;  %v1184_v62 = vmul.f32 %v2258_v46, %v2483_v33 }
 0x232   : > { %v1233_v9 = vmax.f32 %v1217_v38, 0.0  ;;  %v1235_v6 = vmax.f32 %v1219_v28, 0.0  ;;  %v1197_v44 = vadd.f32 %v1182_v24, %v1158_v57  ;;  %v1160_v22 = vadd.f32 %v1145_v26, %v2425_v58 }
 0x233   : > { %v1248_v12 = vmin.f32 %v1232_v25, 6.0  ;;  %v1234_v40 = vmax.f32 %v1218_v2, 0.0  ;;  %v1221_v32 = vadd.f32 %v2287_v20, %v1198_v17  ;;  %v1185_v5 = vmul.f32 %v2258_v46, %v2487_v31 }
 0x234   : > { %v1249_v10 = vmin.f32 %v1233_v9, 6.0  ;;  %v1251_v42 = vmin.f32 %v1235_v6, 6.0  ;;  %v1220_v1 = vadd.f32 %v2287_v20, %v1197_v44  ;;  %v1199_v59 = vadd.f32 %v1184_v62, %v1160_v22  ;;  %v2605_v9 = vld [vmem:[%s2689_s8] ss:$0 sm:$0xff] }
 0x235   : > { %v1250_v0 = vmin.f32 %v1234_v40, 6.0  ;;  %v1084_v56 = vadd.f32 %v2501_v34, %v2506_v50  ;;  %v1237_v15 = vmax.f32 %v1221_v32, 0.0  ;;  %v1200_v37 = vadd.f32 %v1185_v5, %v2513_v43  ;;  %v2766_v40 = vld [vmem:[#allocation5_spill] sm:$0xff] }
 0x236   : > { %v1262_v33 = vpack.c.bf16 %v1249_v10, %v1248_v12  ;;  %v1124_v58 = vadd.f32 %v2433_v19, %v2511_v52  ;;  %v1236_v51 = vmax.f32 %v1220_v1, 0.0  ;;  %v1222_v39 = vadd.f32 %v2287_v20, %v1199_v59  ;;  %v2768_v1 = vld [vmem:[#allocation2_spill] sm:$0xff] }
 0x237   : > { %v1263_v41 = vpack.c.bf16 %v1251_v42, %v1250_v0  ;;  %v1123_v31 = vadd.f32 %v2398_v14, %v1084_v56  ;;  %v1253_v35 = vmin.f32 %v1237_v15, 6.0  ;;  %v1223_v23 = vadd.f32 %v2287_v20, %v1200_v37  ;;  %v2767_v42 = vld [vmem:[#allocation3_spill] sm:$0xff] }
 0x238   : > { %1775 = vmatprep.mubr.msk.bf16.mxu1 %vm1307_vm6, %v1262_v33  ;;  %v1163_v34 = vadd.f32 %v2462_v29, %v1124_v58  ;;  %v1046_v50 = vadd.f32 %v2449_v49, %v2518_v63  ;;  %v1252_v43 = vmin.f32 %v1236_v51, 6.0  ;;  %v1238_v19 = vmax.f32 %v1222_v39, 0.0  ;;  %v2764_v63 = vld [vmem:[#allocation18_spill] sm:$0xff]  ;;  %v2769_v33 = vld [vmem:[#allocation4_spill] sm:$0xff] }
 0x239   : > { %1776 = vmatmul.mubr.msk.bf16.gmra.mrb[12].mxu1 %vm1307_vm6, %v1263_v41  ;;  %v1162_v52 = vadd.f32 %v2459_v48, %v1123_v31  ;;  %v1087_v4 = vadd.f32 %v2456_v54, %v2525_v53  ;;  %v1239_v14 = vmax.f32 %v1223_v23, 0.0  ;;  %v1188_v55 = vmul.f32 0.0, %v2258_v46  ;;  %v2770_v23 = vld [vmem:[#allocation9_spill] sm:$0xff] }
 0x23a   : > { %v1202_v21 = vadd.f32 %v2468_v3, %v1163_v34  ;;  %v1086_v11 = vadd.f32 %v2453_v18, %v1046_v50  ;;  %v1264_v29 = vpack.c.bf16 %v1253_v35, %v1252_v43  ;;  %v1254_v7 = vmin.f32 %v1238_v19, 6.0  ;;  %v2765_v3 = vld [vmem:[#allocation19_spill] sm:$0xff] }
 0x23b   : > { %v1201_v49 = vadd.f32 %v2465_v47, %v1162_v52  ;;  %v1126_v30 = vadd.f32 %v2764_v63, %v1087_v4  ;;  %v1255_v16 = vmin.f32 %v1239_v14, 6.0  ;;  %v2771_v19 = vld [vmem:[#allocation7_spill] sm:$0xff] }
 0x23c   : > { %v1225_v60 = vadd.f32 %v2287_v20, %v1202_v21  ;;  %v1125_v48 = vadd.f32 %v2764_v63, %v1086_v11  ;;  %1779 = vmatprep.mubr.msk.bf16.mxu1 %vm1307_vm6, %v1264_v29  ;;  %v2772_v21 = vld [vmem:[#allocation6_spill] sm:$0xff]  ;;  %v2773_v29 = vld [vmem:[#allocation8_spill] sm:$0xff] }
 0x23d   : > { %v1224_v54 = vadd.f32 %v2287_v20, %v1201_v49  ;;  %v1165_v53 = vadd.f32 %v2765_v3, %v1126_v30  ;;  %v1265_v18 = vpack.c.bf16 %v1255_v16, %v1254_v7 }
 0x23e   : > { %v1241_v27 = vmax.f32 %v1225_v60, 0.0  ;;  %v1164_v46 = vadd.f32 %v2765_v3, %v1125_v48  ;;  %v2774_v3 = vld [vmem:[#allocation13_spill] sm:$0xff] }
 0x23f   : > { %v1240_v36 = vmax.f32 %v1224_v54, 0.0  ;;  %v1204_v61 = vadd.f32 %v1188_v55, %v1165_v53 }
 0x240   : > { %v1257_v47 = vmin.f32 %v1241_v27, 6.0  ;;  %v1203_v45 = vadd.f32 %v1188_v55, %v1164_v46  ;;  %v2775_v46 = vld [vmem:[#allocation11_spill] sm:$0xff] }
 0x241   : > { %1780 = vmatmul.mubr.msk.bf16.gmra.mrb[16].mxu1 %vm1307_vm6, %v1265_v18  ;;  %v1256_v24 = vmin.f32 %v1240_v36, 6.0  ;;  %v1227_v38 = vadd.f32 %v2287_v20, %v1204_v61 }
 0x242   : > { %v1226_v28 = vadd.f32 %v2287_v20, %v1203_v45  ;;  %v2776_v45 = vld [vmem:[#allocation10_spill] sm:$0xff] }
 0x243   : > { %v1266_v8 = vpack.c.bf16 %v1257_v47, %v1256_v24  ;;  %v1243_v13 = vmax.f32 %v1227_v38, 0.0 }
 0x244   : > { %v1242_v25 = vmax.f32 %v1226_v28, 0.0  ;;  %v2777_v28 = vld [vmem:[#allocation12_spill] sm:$0xff] }
 0x245   : > { %1783 = vmatprep.mubr.msk.bf16.mxu1 %vm1307_vm6, %v1266_v8  ;;  %v1259_v2 = vmin.f32 %v1243_v13, 6.0 }
 0x246   : > { %v1258_v57 = vmin.f32 %v1242_v25, 6.0 }
 0x248   : > { %v1267_v26 = vpack.c.bf16 %v1259_v2, %v1258_v57 }
 0x24a   : > { %1784 = vmatmul.mubr.msk.bf16.gmra.mrb[20].mxu1 %vm1307_vm6, %v1267_v26 }
 0x301   : > { %v1773_v6 = vpop.f32.mrb[8].mxu1 }
 0x302   : > { %v1375_v17 = vadd.f32 %v1773_v6, %v2605_v9  ;;  %v1366_v20 = vpop.f32.mrb[9].mxu1 }
 0x303   : > { %v1367_v62 = vadd.f32 %v2605_v9, %v1366_v20  ;;  %v1774_v12 = vpop.f32.mrb[10].mxu1  ;;  %v2778_v20 = vld [vmem:[#allocation17_spill] sm:$0xff] }
 0x304   : > { %v1431_v44 = vadd.f32 %v1375_v17, %v2766_v40  ;;  %v1378_v22 = vadd.f32 %v1774_v12, %v2605_v9  ;;  %v1369_v10 = vpop.f32.mrb[11].mxu1 }
 0x305   : > { %v1429_v32 = vadd.f32 %v1367_v62, %v2767_v42  ;;  %v1370_v5 = vadd.f32 %v2605_v9, %v1369_v10 }
 0x306   : > { %v1674_v0 = vpack.c.bf16 %v1431_v44, %v1431_v44  ;;  %v1432_v59 = vadd.f32 %v1378_v22, %v2768_v1  ;;  %v2779_v44 = vld [vmem:[#allocation15_spill] sm:$0xff]  ;;  %v2781_v1 = vld [vmem:[#allocation16_spill] sm:$0xff] }
 0x307   : > { %v1672_v56 = vpack.c.bf16 %v1429_v32, %v1429_v32  ;;  %v1430_v15 = vadd.f32 %v1370_v5, %v2769_v33  ;;  %v2780_v32 = vld [vmem:[#allocation14_spill] sm:$0xff] }
 0x308   : > { %1512 = vst.msk [vmem:[%s2616_s25 + $0x8] sm:$0xf] %vm1509_vm7, %v1674_v0  ;;  %v1675_v37 = vpack.c.bf16 %v1432_v59, %v1432_v59 }
 0x309   : > { %1510 = vst.msk [vmem:[%s2616_s25] sm:$0xf] %vm1509_vm7, %v1672_v56  ;;  %v1673_v58 = vpack.c.bf16 %v1430_v15, %v1430_v15 }
 0x30a   : > { %1513 = vst.msk [vmem:[%s2616_s25 + $0xc] sm:$0xf] %vm1509_vm7, %v1675_v37 }
 0x30b   : > { %1511 = vst.msk [vmem:[%s2616_s25 + $0x4] sm:$0xf] %vm1509_vm7, %v1673_v58 }
 0x30c   : > { %v1777_v41 = vpop.f32.mrb[12].mxu1 }
 0x30d   : > { %v1391_v51 = vadd.f32 %v1777_v41, %v2605_v9  ;;  %v1382_v39 = vpop.f32.mrb[13].mxu1 }
 0x30e   : > { %v1383_v31 = vadd.f32 %v2605_v9, %v1382_v39  ;;  %v1778_v35 = vpop.f32.mrb[14].mxu1 }
 0x30f   : > { %v1435_v34 = vadd.f32 %v1391_v51, %v2770_v23  ;;  %v1394_v50 = vadd.f32 %v1778_v35, %v2605_v9  ;;  %v1385_v43 = vpop.f32.mrb[15].mxu1 }
 0x310   : > { %v1433_v52 = vadd.f32 %v1383_v31, %v2771_v19  ;;  %v1386_v4 = vadd.f32 %v2605_v9, %v1385_v43 }
 0x311   : > { %v1678_v14 = vpack.c.bf16 %v1435_v34, %v1435_v34  ;;  %v1436_v11 = vadd.f32 %v1394_v50, %v2772_v21 }
 0x312   : > { %v1676_v55 = vpack.c.bf16 %v1433_v52, %v1433_v52  ;;  %v1434_v7 = vadd.f32 %v1386_v4, %v2773_v29 }
 0x313   : > { %1516 = vst.msk [vmem:[%s2616_s25 + $0x18] sm:$0xf] %vm1509_vm7, %v1678_v14  ;;  %v1679_v49 = vpack.c.bf16 %v1436_v11, %v1436_v11 }
 0x314   : > { %1514 = vst.msk [vmem:[%s2616_s25 + $0x10] sm:$0xf] %vm1509_vm7, %v1676_v55  ;;  %v1677_v63 = vpack.c.bf16 %v1434_v7, %v1434_v7  ;;  %v1781_v30 = vpop.f32.mrb[16].mxu1 }
 0x315   : > { %1517 = vst.msk [vmem:[%s2616_s25 + $0x1c] sm:$0xf] %vm1509_vm7, %v1679_v49  ;;  %v1407_v16 = vadd.f32 %v1781_v30, %v2605_v9  ;;  %v1398_v60 = vpop.f32.mrb[17].mxu1 }
 0x316   : > { %1515 = vst.msk [vmem:[%s2616_s25 + $0x14] sm:$0xf] %vm1509_vm7, %v1677_v63  ;;  %v1399_v48 = vadd.f32 %v2605_v9, %v1398_v60  ;;  %v1782_v54 = vpop.f32.mrb[18].mxu1 }
 0x317   : > { %v1439_v53 = vadd.f32 %v1407_v16, %v2774_v3  ;;  %v1410_v18 = vadd.f32 %v1782_v54, %v2605_v9  ;;  %v1401_v27 = vpop.f32.mrb[19].mxu1 }
 0x318   : > { %v1437_v36 = vadd.f32 %v1399_v48, %v2775_v46  ;;  %v1402_v61 = vadd.f32 %v2605_v9, %v1401_v27 }
 0x319   : > { %v1682_v47 = vpack.c.bf16 %v1439_v53, %v1439_v53  ;;  %v1440_v24 = vadd.f32 %v1410_v18, %v2776_v45 }
 0x31a   : > { %v1680_v38 = vpack.c.bf16 %v1437_v36, %v1437_v36  ;;  %v1438_v8 = vadd.f32 %v1402_v61, %v2777_v28 }
 0x31b   : > { %1520 = vst.msk [vmem:[%s2616_s25 + $0x28] sm:$0xf] %vm1509_vm7, %v1682_v47  ;;  %v1683_v13 = vpack.c.bf16 %v1440_v24, %v1440_v24 }
 0x31c   : > { %1518 = vst.msk [vmem:[%s2616_s25 + $0x20] sm:$0xf] %vm1509_vm7, %v1680_v38  ;;  %v1681_v25 = vpack.c.bf16 %v1438_v8, %v1438_v8 }
 0x31d   : > { %1521 = vst.msk [vmem:[%s2616_s25 + $0x2c] sm:$0xf] %vm1509_vm7, %v1683_v13  ;;  %v1785_v2 = vpop.f32.mrb[20].mxu1 }
 0x31e   : > { %1519 = vst.msk [vmem:[%s2616_s25 + $0x24] sm:$0xf] %vm1509_vm7, %v1681_v25  ;;  %v1423_v57 = vadd.f32 %v1785_v2, %v2605_v9  ;;  %v1414_v26 = vpop.f32.mrb[21].mxu1 }
 0x31f   : > { %v1415_v6 = vadd.f32 %v2605_v9, %v1414_v26  ;;  %v1786_v17 = vpop.f32.mrb[22].mxu1 }
 0x320   : > { %v1443_v62 = vadd.f32 %v1423_v57, %v2778_v20  ;;  %v1426_v12 = vadd.f32 %v1786_v17, %v2605_v9  ;;  %v1417_v40 = vpop.f32.mrb[23].mxu1 }
 0x321   : > { %v1441_v22 = vadd.f32 %v1415_v6, %v2779_v44  ;;  %v1418_v10 = vadd.f32 %v2605_v9, %v1417_v40 }
 0x322   : > { %v1686_v42 = vpack.c.bf16 %v1443_v62, %v1443_v62  ;;  %v1444_v5 = vadd.f32 %v1426_v12, %v2780_v32 }
 0x323   : > { %v1684_v0 = vpack.c.bf16 %v1441_v22, %v1441_v22  ;;  %v1442_v59 = vadd.f32 %v1418_v10, %v2781_v1 }
 0x324   : > { %1524 = vst.msk [vmem:[%s2616_s25 + $0x38] sm:$0xf] %vm1509_vm7, %v1686_v42  ;;  %v1687_v56 = vpack.c.bf16 %v1444_v5, %v1444_v5 }
 0x325   : > { %1522 = vst.msk [vmem:[%s2616_s25 + $0x30] sm:$0xf] %vm1509_vm7, %v1684_v0  ;;  %v1685_v33 = vpack.c.bf16 %v1442_v59, %v1442_v59 }
 0x326   : > { %1525 = vst.msk [vmem:[%s2616_s25 + $0x3c] sm:$0xf] %vm1509_vm7, %v1687_v56 }
 0x327   : > { %1523 = vst.msk [vmem:[%s2616_s25 + $0x34] sm:$0xf] %vm1509_vm7, %v1685_v33 }
 0x328 PF: > { %s19_s30 = sadd.s32 1, %s1822_s30  }
 0x329   : > { %p16_p4 = scmp.ge.s32.totalorder %s19_s30, 4  }
 0x32b   :  { %18 = sbr.rel (!%p16_p4) target bundleno = 1 (0x1), region = 94 }

// kernel: _forward.3
= control target key start
LH: loop header
LB: loop body
LE: loop exit
PB: predicated region body
PF: predicated region fallthrough
CT: control target
= control target key end

     0   :  { %11 = vsyncpa [#allocation4], 0  ;;  %s4971_s0 = inlined_call_operand.vmem [shape: bf16[2,128,32], index: 0, kind: input, shape index: {}]   ;;  %s4972_s1 = inlined_call_operand.vmem [shape: f32[128,1], index: 1, kind: input, shape index: {}]   ;;  %s4973_s2 = inlined_call_operand.vmem [shape: bf16[32,1280], index: 2, kind: input, shape index: {}]   ;;  %s4974_s3 = inlined_call_operand.vmem [shape: f32[1,1280], index: 3, kind: input, shape index: {}]   ;;  %s4975_s4 = inlined_call_operand.vmem [shape: bf16[1280,32], index: 4, kind: input, shape index: {}]   ;;  %s4976_s5 = inlined_call_operand.vmem [shape: f32[1,32], index: 5, kind: input, shape index: {}]   ;;  %s4977_s6 = inlined_call_operand.hbm [shape: f32[2,1,32], index: 6, kind: output, shape index: {}]  }
   0x1   :  { %13 = vsyncpa [#allocation4 + $0x1], 0  ;;  %s3581_s21 = smov 0   ;;  %s3583_s22 = smov 0  }
   0x2   :  { %s3585_s23 = smov 0   ;;  %s3587_s24 = smov 0  }
   0x3   :  { %s3589_s25 = smov 0   ;;  %s3591_s26 = smov 0  }
   0x4 LB: > { %s3010_s27 = sadd.s32 4294967295, %s3540_s26   ;;  %s3011_s28 = sadd.s32 4294967294, %s3540_s26   ;;  %s3540_s26 = sphi %s3591_s26, %s19_s26   ;;  %s3536_s25 = sphi %s3589_s25, %s5102_s25   ;;  %s3532_s24 = sphi %s3587_s24, %s5101_s24   ;;  %s3528_s23 = sphi %s3585_s23, %s5100_s23   ;;  %s3524_s22 = sphi %s3583_s22, %s5099_s22   ;;  %s3520_s21 = sphi %s3581_s21, %s5098_s21  }
   0x5   : > { %s31_s29 = sadd.s32 1, %s3536_s25  ;;  %s176_s30 = sadd.s32 1, %s3528_s23 }
   0x6   : > { %p33_p0 = scmp.ge.s32.totalorder %s31_s29, 2  ;;  %p186_p1 = scmp.ne.s32.totalorder %s3528_s23, %s3524_s22 }
   0x7   : > { %p187_p2 = scmp.eq.s32.totalorder %s3010_s27, 1  ;;  %p192_p3 = scmp.ne.s32.totalorder %s3524_s22, %s3520_s21 }
   0x8   : > { %s5104_s29 = smov (%p33_p0, %s31_s29), 0  ;;  %p193_p5 = scmp.eq.s32.totalorder %s3011_s28, 1 }
   0x9   : > { %p3621_p4 = por %p187_p2, %p186_p1  ;;  %s173_s8 = ssub.s32 %s3536_s25, %s5104_s29 }
   0xa   : > { %p3015_p6 = scmp.ge.s32.totalorder %s3540_s26, 1  ;;  %p174_p7 = scmp.eq.s32.totalorder %s173_s8, 0 }
   0xb   : > { %p3628_p8 = por %p193_p5, %p192_p3  ;;  %p245_p9 = scmp.lt.s32.totalorder %s3540_s26, 3 }
   0xc   : > { %s3634_s10 = scalar_select %p174_p7, %s3528_s23, %s176_s30  }
   0xd   : > { %p246_p10 = pnand %p3015_p6, %p245_p9 }
   0xf   : > { %249 = sbr.rel (%p246_p10) target bundleno = 766 (0x2fe), region = 44 }
  0x16   : > { %v3344_v0 = vld [vmem:[%s4973_s2 + $0x4] ss:$40 sps:$4 sm:$0xff]   ;;  %p284_p11 = scmp.lt.s32.totalorder %s3532_s24, 1  ;;  %v3346_v1 = vld [vmem:[%s4973_s2] ss:$40 sps:$4 sm:$0xff]   ;;  %v3542_v2 = vmov 0   ;;  %v4984_v51 = vlaneseq }
  0x17   : > { %597 = vmatprep.mubr.bf16.mxu0 %v3542_v2  ;;  %657 = vmatprep.mubr.bf16.mxu1 %v3542_v2  ;;  %v3347_v3 = vld [vmem:[%s4973_s2 + $0x54] ss:$40 sps:$4 sm:$0xff]   ;;  %v3349_v4 = vld [vmem:[%s4973_s2 + $0x50] ss:$40 sps:$4 sm:$0xff]   ;;  %vm540_vm0 = vcmask 261120   ;;  %v1452_v18 = vld [vmem:[%s4972_s1] sm:$0xff] }
  0x18   : > { %565 = vmatprep.subr.bf16.mxu0 %v3344_v0  ;;  %3280 = vmatprep.subr.bf16.mxu1 %v3344_v0  ;;  %s285_s17 = scalar_select %p284_p11, %s3532_s24, 1  ;;  %v3354_v5 = vld [vmem:[%s4973_s2 + $0xc] ss:$40 sps:$4 sm:$0xff]   ;;  %v3352_v6 = vld [vmem:[%s4973_s2 + $0x8] ss:$40 sps:$4 sm:$0xff]   ;;  %v1455_v22 = vld [vmem:[%s4972_s1 + $0x18] sm:$0xff] }
  0x19   : > { %566 = vmatpush1.bf16.msra.mxu0 %v3346_v1  ;;  %3282 = vmatpush1.bf16.msra.mxu1 %v3346_v1  ;;  %v3359_v9 = vld [vmem:[%s4973_s2 + $0x5c] ss:$40 sps:$4 sm:$0xff]   ;;  %v3357_v10 = vld [vmem:[%s4973_s2 + $0x58] ss:$40 sps:$4 sm:$0xff]   ;;  %v1454_v19 = vld [vmem:[%s4972_s1 + $0x10] sm:$0xff]  ;;  %v3914_v54 = vshrl.u32 %v4984_v51, 7 }
  0x1a   : > { %567 = vmatprep.subr.bf16.mxu0 %v3347_v3  ;;  %3281 = vmatprep.subr.bf16.mxu1 %v3347_v3  ;;  %s3169_s20 = sshll.u32 %s285_s17, 6  ;;  %v3363_v12 = vld [vmem:[%s4973_s2 + $0x1c] ss:$40 sps:$4 sm:$0xff]   ;;  %v3366_v14 = vld [vmem:[%s4973_s2 + $0x10] ss:$40 sps:$4 sm:$0xff]   ;;  %v1453_v21 = vld [vmem:[%s4972_s1 + $0x8] sm:$0xff] }
  0x1b   : > { %s3658_s11 = scalar_lea.vmem %s4971_s0, %s3169_s20  ;;  %3342 = vset.pattern.permute.xlu0 %v3542_v2  ;;  %3343 = vset.pattern.permute.xlu1 %v3542_v2  ;;  %v3368_v15 = vld [vmem:[%s4973_s2 + $0x14] ss:$40 sps:$4 sm:$0xff]   ;;  %v3370_v16 = vld [vmem:[%s4973_s2 + $0x60] ss:$40 sps:$4 sm:$0xff]   ;;  %v3372_v17 = vld [vmem:[%s4973_s2 + $0x64] ss:$40 sps:$4 sm:$0xff]  }
  0x1c   : > { %v3666_v7 = vld [vmem:[%s3658_s11] sm:$0xff]   ;;  %v3669_v8 = vld [vmem:[%s3658_s11 + $0x30] sm:$0xff]   ;;  %v3684_v11 = vld [vmem:[%s3658_s11 + $0x8] sm:$0xff]   ;;  %1470 = vperm.xlu0 %3342, %v1452_v18   ;;  %1480 = vperm.xlu1 %3343, %v1454_v19   ;;  %5027 = vst [vmem:[#allocation12_spill] sm:$0xff] %v3914_v54  ;;  %v3543_v56 = vmov 1966171168  }
  0x1d   : > { %568 = vmatpush1.bf16.msra.mxu0 %v3349_v4  ;;  %3283 = vmatpush1.bf16.msra.mxu1 %v3349_v4  ;;  %v3690_v13 = vld [vmem:[%s3658_s11 + $0x38] sm:$0xff]   ;;  %v3717_v20 = vld [vmem:[%s3658_s11 + $0x10] sm:$0xff]   ;;  %v3378_v24 = vld [vmem:[%s4973_s2 + $0x24] ss:$40 sps:$4 sm:$0xff]   ;;  %v1933_v57 = vunpack.c.l.s4 %v3543_v56  ;;  %v3921_v59 = vsub.s32 0, %v3914_v54  ;;  %v3927_v61 = vsub.s32 1, %v3914_v54 }
  0x1e   : > { %678 = vmatprep.subr.bf16.mxu1 %v3354_v5  ;;  %791 = vmatprep.subr.bf16.mxu0 %v3368_v15  ;;  %v3361_v23 = vld [vmem:[%s4973_s2 + $0x18] ss:$40 sps:$4 sm:$0xff]   ;;  %v3375_v25 = vld [vmem:[%s4973_s2 + $0x6c] ss:$40 sps:$4 sm:$0xff]   ;;  %v3373_v26 = vld [vmem:[%s4973_s2 + $0x68] ss:$40 sps:$4 sm:$0xff]  }
  0x1f   : > { %v1456_v27 = vld [vmem:[%s4972_s1 + $0x20] sm:$0xff]  ;;  %v1457_v28 = vld [vmem:[%s4972_s1 + $0x28] sm:$0xff]  ;;  %v3750_v29 = vld [vmem:[%s3658_s11 + $0x18] sm:$0xff]   ;;  %5028 = vst [vmem:[#allocation13_spill] sm:$0xff] %v3921_v59  ;;  %v4980_v62 = vsub.s32 2, %v3914_v54  ;;  %v4981_v63 = vsub.s32 3, %v3914_v54  ;;  %v1934_v0 = vunpack.c.0.s8 %v1933_v57 }
  0x20   : > { %3046 = vmatmul.mubr.msk.bf16.vlgmr.msra.gmra.mrb[0].mxu0 %vm540_vm0, %v3666_v7  ;;  %3052 = vmatmul.mubr.msk.bf16.vlgmr.msra.gmra.mrb[0].mxu1 %vm540_vm0, %v3669_v8  ;;  %v1458_v30 = vld [vmem:[%s4972_s1 + $0x30] sm:$0xff]  ;;  %v1459_v31 = vld [vmem:[%s4972_s1 + $0x38] sm:$0xff]  ;;  %v1460_v32 = vld [vmem:[%s4972_s1 + $0x40] sm:$0xff]  ;;  %5029 = vst [vmem:[#allocation14_spill] sm:$0xff] %v3927_v61  ;;  %v4983_v3 = vsub.s32 5, %v3914_v54  ;;  %s281_s19 = sand.u32 1, %s3524_s22  }
  0x21   : > { %679 = vmatpush1.bf16.msra.mxu1 %v3352_v6  ;;  %607 = vmatprep.mubr.bf16.mxu0 %v3542_v2  ;;  %v1461_v33 = vld [vmem:[%s4972_s1 + $0x48] sm:$0xff]  ;;  %v3771_v34 = vld [vmem:[%s3658_s11 + $0x20] sm:$0xff]   ;;  %v1462_v35 = vld [vmem:[%s4972_s1 + $0x50] sm:$0xff]  ;;  %v4978_v6 = vsub.s32 6, %v3914_v54  ;;  %s3166_s20 = sshll.u32 %s3532_s24, 4  ;;  %s282_s27 = scalar_lea.vmem [#allocation3], %s281_s19 }
  0x22   : > { %667 = vmatprep.mubr.bf16.mxu1 %v3542_v2  ;;  %680 = vmatprep.subr.bf16.mxu1 %v3359_v9  ;;  %v1463_v36 = vld [vmem:[%s4972_s1 + $0x58] sm:$0xff]  ;;  %v1464_v37 = vld [vmem:[%s4972_s1 + $0x60] sm:$0xff]  ;;  %v1465_v38 = vld [vmem:[%s4972_s1 + $0x68] sm:$0xff]  ;;  %s2926_s28 = sshll.u32 %s282_s27, 4  ;;  %vm2911_vm2 = vcmask 253952   ;;  %s4924_s12 = scalar_lea.hbm %s4977_s6, %s3166_s20  ;;  %s4926_s28 = int_to_ptr.vmem [resolvable:$true] %s2926_s28 }
  0x23   : > { %792 = vmatpush1.bf16.msra.mxu0 %v3366_v14  ;;  %1475 = vperm.xlu0 %3342, %v1453_v21   ;;  %v3792_v39 = vld [vmem:[%s3658_s11 + $0x28] sm:$0xff]   ;;  %v1466_v40 = vld [vmem:[%s4972_s1 + $0x70] sm:$0xff]  ;;  %v1467_v41 = vld [vmem:[%s4972_s1 + $0x78] sm:$0xff]  ;;  %s2914_s13 = scalar_lea.sflag [#allocation4], %s281_s19  ;;  %s3462_s14 = scalar_lea.vmem %s4926_s28, 16 }
  0x24   : > { %793 = vmatprep.subr.bf16.mxu0 %v3372_v17  ;;  %1485 = vperm.xlu1 %3343, %v1455_v22   ;;  %v3376_v42 = vld [vmem:[%s4973_s2 + $0x20] ss:$40 sps:$4 sm:$0xff]   ;;  %v3381_v43 = vld [vmem:[%s4973_s2 + $0x74] ss:$40 sps:$4 sm:$0xff]   ;;  %v3379_v44 = vld [vmem:[%s4973_s2 + $0x70] ss:$40 sps:$4 sm:$0xff]   ;;  %p3463_p12 = scmp.ne.s32.totalorder %s4926_s28, %s3462_s14 }
  0x25   : > { %681 = vmatpush1.bf16.msra.mxu1 %v3357_v10  ;;  %v346_v60 = vld [vmem:[%s4974_s3] sm:$0xff]  ;;  %s3545_s24 = smov [#allocation3]  }
  0x26   : > { %904 = vmatprep.subr.bf16.mxu1 %v3363_v12  ;;  %v3932_v1 = vrot.slane %v346_v60, %v3921_v59  ;;  %v3937_v4 = vrot.slane %v346_v60, %v3927_v61  ;;  %v3947_v10 = vrot.slane %v346_v60, %v4980_v62  ;;  %v3964_v19 = vrot.slane %v346_v60, %v4983_v3  ;;  %p3464_p13 = pnand %p3463_p12, %p3621_p4  ;;  %s3466_s15 = sshll.u32 %s3545_s24, 4  ;;  %s3467_s15 = int_to_ptr.vmem [resolvable:$false] %s3466_s15 }
  0x27   : > { %794 = vmatpush1.bf16.msra.mxu0 %v3370_v16  ;;  %1490 = vperm.xlu0 %3342, %v1456_v27   ;;  %s3468_s11 = scalar_lea.vmem %s3467_s15, 32  ;;  %p3469_p1 = scmp.lt.s32.totalorder %s4926_s28, %s3467_s15 }
  0x28   : > { %3047 = vmatmul.mubr.msk.bf16.gmra.mrb[4].mxu0 %vm540_vm0, %v3684_v11  ;;  %3053 = vmatmul.mubr.msk.bf16.gmra.mrb[4].mxu1 %vm540_vm0, %v3690_v13  ;;  %p3465_p0 = pneg %p3464_p13  ;;  %p3470_p2 = scmp.lt.s32.totalorder %s3468_s11, %s3462_s14 }
  0x29   : > { %617 = vmatprep.mubr.bf16.mxu0 %v3542_v2  ;;  %710 = vmatprep.mubr.bf16.mxu1 %v3542_v2 }
  0x2a   : > { %1017 = vmatprep.subr.bf16.mxu0 %v3378_v24  ;;  %1495 = vperm.xlu1 %3343, %v1457_v28   ;;  %v3970_v24 = vrot.slane %v346_v60, %v4978_v6  ;;  %p3471_p3 = por %p3470_p2, %p3469_p1 }
  0x2b   : > { %1500 = vperm.xlu0 %3342, %v1458_v30  }
  0x2c   : > { %p3472_p5 = pnand %p3471_p3, %p3465_p0 }
  0x2e   : > { %1505 = vperm.xlu1 %3343, %v1459_v31  }
  0x2f   : > { %1510 = vperm.xlu0 %3342, %v1460_v32  }
  0x30   : > { %3048 = vmatmul.mubr.msk.bf16.gmra.mrb[8].mxu0 %vm540_vm0, %v3717_v20  ;;  %3054 = vmatmul.mubr.msk.bf16.vlgmr.msra.gmra.mrb[8].mxu1 %vm540_vm0, %v3666_v7 }
  0x31   : > { %905 = vmatpush1.bf16.msra.mxu1 %v3361_v23  ;;  %627 = vmatprep.mubr.bf16.mxu0 %v3542_v2 }
  0x32   : > { %720 = vmatprep.mubr.bf16.mxu1 %v3542_v2  ;;  %906 = vmatprep.subr.bf16.mxu1 %v3375_v25 }
  0x33   : > { %1515 = vperm.xlu1 %3343, %v1461_v33   ;;  %1520 = vperm.xlu0 %3342, %v1462_v35  }
  0x35   : > { %907 = vmatpush1.bf16.msra.mxu1 %v3373_v26 }
  0x37   : > { %1525 = vperm.xlu1 %3343, %v1463_v36   ;;  %1530 = vperm.xlu0 %3342, %v1464_v37  }
  0x38   : > { %3049 = vmatmul.mubr.msk.bf16.gmra.mrb[12].mxu0 %vm540_vm0, %v3750_v29  ;;  %3055 = vmatmul.mubr.msk.bf16.gmra.mrb[12].mxu1 %vm540_vm0, %v3684_v11 }
  0x39   : > { %637 = vmatprep.mubr.bf16.mxu0 %v3542_v2  ;;  %730 = vmatprep.mubr.bf16.mxu1 %v3542_v2 }
  0x3b   : > { %1535 = vperm.xlu1 %3343, %v1465_v38   ;;  %1540 = vperm.xlu0 %3342, %v1466_v40  }
  0x3f   : > { %1545 = vperm.xlu1 %3343, %v1467_v41  }
  0x40   : > { %3050 = vmatmul.mubr.msk.bf16.gmra.mrb[16].mxu0 %vm540_vm0, %v3771_v34  ;;  %3056 = vmatmul.mubr.msk.bf16.gmra.mrb[16].mxu1 %vm540_vm0, %v3717_v20 }
  0x41   : > { %647 = vmatprep.mubr.bf16.mxu0 %v3542_v2  ;;  %740 = vmatprep.mubr.bf16.mxu1 %v3542_v2 }
  0x48   : > { %3051 = vmatmul.mubr.msk.bf16.gmra.mrb[20].mxu0 %vm540_vm0, %v3792_v39  ;;  %3057 = vmatmul.mubr.msk.bf16.gmra.mrb[20].mxu1 %vm540_vm0, %v3750_v29 }
  0x49   : > { %750 = vmatprep.mubr.bf16.mxu1 %v3542_v2  ;;  %823 = vmatprep.mubr.bf16.mxu0 %v3542_v2 }
  0x50   : > { %3058 = vmatmul.mubr.msk.bf16.gmra.mrb[24].mxu1 %vm540_vm0, %v3771_v34  ;;  %3062 = vmatmul.mubr.msk.bf16.vlgmr.msra.gmra.mrb[24].mxu0 %vm540_vm0, %v3666_v7 }
  0x51   : > { %760 = vmatprep.mubr.bf16.mxu1 %v3542_v2  ;;  %833 = vmatprep.mubr.bf16.mxu0 %v3542_v2 }
  0x52   : > { %1018 = vmatpush1.bf16.msra.mxu0 %v3376_v42 }
  0x53   : > { %1019 = vmatprep.subr.bf16.mxu0 %v3381_v43 }
  0x56   : > { %1020 = vmatpush1.bf16.msra.mxu0 %v3379_v44 }
  0x58   : > { %3059 = vmatmul.mubr.msk.bf16.gmra.mrb[28].mxu1 %vm540_vm0, %v3792_v39  ;;  %3063 = vmatmul.mubr.msk.bf16.gmra.mrb[28].mxu0 %vm540_vm0, %v3684_v11 }
  0x59   : > { %770 = vmatprep.mubr.bf16.mxu1 %v3542_v2  ;;  %843 = vmatprep.mubr.bf16.mxu0 %v3542_v2 }
  0x60   : > { %3060 = vmatmul.mubr.msk.bf16.gmra.mrb[32].mxu1 %vm540_vm0, %v3669_v8  ;;  %3064 = vmatmul.mubr.msk.bf16.gmra.mrb[32].mxu0 %vm540_vm0, %v3717_v20 }
  0x61   : > { %780 = vmatprep.mubr.bf16.mxu1 %v3542_v2  ;;  %853 = vmatprep.mubr.bf16.mxu0 %v3542_v2 }
  0x68   : > { %3061 = vmatmul.mubr.msk.bf16.gmra.mrb[36].mxu1 %vm540_vm0, %v3690_v13  ;;  %3065 = vmatmul.mubr.msk.bf16.gmra.mrb[36].mxu0 %vm540_vm0, %v3750_v29 }
  0x69   : > { %863 = vmatprep.mubr.bf16.mxu0 %v3542_v2  ;;  %936 = vmatprep.mubr.bf16.mxu1 %v3542_v2 }
  0x70   : > { %3066 = vmatmul.mubr.msk.bf16.gmra.mrb[40].mxu0 %vm540_vm0, %v3771_v34  ;;  %3070 = vmatmul.mubr.msk.bf16.vlgmr.msra.gmra.mrb[40].mxu1 %vm540_vm0, %v3666_v7 }
  0x71   : > { %873 = vmatprep.mubr.bf16.mxu0 %v3542_v2  ;;  %946 = vmatprep.mubr.bf16.mxu1 %v3542_v2 }
  0x78   : > { %3067 = vmatmul.mubr.msk.bf16.gmra.mrb[44].mxu0 %vm540_vm0, %v3792_v39  ;;  %3071 = vmatmul.mubr.msk.bf16.gmra.mrb[44].mxu1 %vm540_vm0, %v3684_v11 }
  0x79   : > { %883 = vmatprep.mubr.bf16.mxu0 %v3542_v2  ;;  %956 = vmatprep.mubr.bf16.mxu1 %v3542_v2 }
  0x80   : > { %3068 = vmatmul.mubr.msk.bf16.gmra.mrb[48].mxu0 %vm540_vm0, %v3669_v8  ;;  %3072 = vmatmul.mubr.msk.bf16.gmra.mrb[48].mxu1 %vm540_vm0, %v3717_v20 }
  0x81   : > { %893 = vmatprep.mubr.bf16.mxu0 %v3542_v2  ;;  %966 = vmatprep.mubr.bf16.mxu1 %v3542_v2 }
  0x88   : > { %3069 = vmatmul.mubr.msk.bf16.gmra.mrb[52].mxu0 %vm540_vm0, %v3690_v13  ;;  %3073 = vmatmul.mubr.msk.bf16.gmra.mrb[52].mxu1 %vm540_vm0, %v3750_v29 }
  0x89   : > { %976 = vmatprep.mubr.bf16.mxu1 %v3542_v2  ;;  %1049 = vmatprep.mubr.bf16.mxu0 %v3542_v2 }
  0x90   : > { %3074 = vmatmul.mubr.msk.bf16.gmra.mrb[56].mxu1 %vm540_vm0, %v3771_v34  ;;  %3078 = vmatmul.mubr.msk.bf16.vlgmr.msra.gmra.mrb[56].mxu0 %vm540_vm0, %v3666_v7  ;;  %v4979_v7 = vsub.s32 7, %v3914_v54 }
  0x91   : > { %986 = vmatprep.mubr.bf16.mxu1 %v3542_v2  ;;  %1059 = vmatprep.mubr.bf16.mxu0 %v3542_v2 }
  0x92   : > { %v3974_v25 = vrot.slane %v346_v60, %v4979_v7 }
  0x98   : > { %3075 = vmatmul.mubr.msk.bf16.gmra.mrb[60].mxu1 %vm540_vm0, %v3792_v39  ;;  %3079 = vmatmul.mubr.msk.bf16.gmra.mrb[60].mxu0 %vm540_vm0, %v3684_v11  ;;  %v3951_v11 = vrot.slane %v346_v60, %v4981_v63 }
  0x99   : > { %996 = vmatprep.mubr.bf16.mxu1 %v3542_v2  ;;  %1069 = vmatprep.mubr.bf16.mxu0 %v3542_v2 }
  0x9b   : > { %v3897_v45 = vpop.permute.xlu0 %1470  ;;  %v3899_v46 = vpop.permute.xlu1 %1480 }
  0x9c   : > { %5021 = vst [vmem:[#allocation6_spill] sm:$0xff] %v3897_v45  ;;  %5022 = vst [vmem:[#allocation7_spill] sm:$0xff] %v3899_v46 }
  0xa0   : > { %3076 = vmatmul.mubr.msk.bf16.gmra.mrb[64].mxu1 %vm540_vm0, %v3669_v8  ;;  %3080 = vmatmul.mubr.msk.bf16.gmra.mrb[64].mxu0 %vm540_vm0, %v3717_v20 }
  0xa1   : > { %1006 = vmatprep.mubr.bf16.mxu1 %v3542_v2  ;;  %1079 = vmatprep.mubr.bf16.mxu0 %v3542_v2 }
  0xa2   : > { %v3901_v47 = vpop.permute.xlu0 %1475 }
  0xa3   : > { %v3903_v48 = vpop.permute.xlu1 %1485 }
  0xa4   : > { %5023 = vst [vmem:[#allocation8_spill] sm:$0xff] %v3903_v48 }
  0xa6   : > { %v3905_v49 = vpop.permute.xlu0 %1490 }
  0xa7   : > { %5024 = vst [vmem:[#allocation9_spill] sm:$0xff] %v3905_v49 }
  0xa8   : > { %3077 = vmatmul.mubr.msk.bf16.gmra.mrb[68].mxu1 %vm540_vm0, %v3690_v13  ;;  %3081 = vmatmul.mubr.msk.bf16.gmra.mrb[68].mxu0 %vm540_vm0, %v3750_v29 }
  0xa9   : > { %1089 = vmatprep.mubr.bf16.mxu0 %v3542_v2  ;;  %v3907_v50 = vpop.permute.xlu1 %1495 }
  0xaa   : > { %5025 = vst [vmem:[#allocation10_spill] sm:$0xff] %v3907_v50  ;;  %v3909_v52 = vpop.permute.xlu0 %1500 }
  0xab   : > { %5026 = vst [vmem:[#allocation11_spill] sm:$0xff] %v3909_v52 }
  0xad   : > { %v3911_v53 = vpop.permute.xlu1 %1505 }
  0xae   : > { %v3916_v55 = vpop.permute.xlu0 %1510 }
  0xb0   : > { %3082 = vmatmul.mubr.msk.bf16.gmra.mrb[72].mxu0 %vm540_vm0, %v3771_v34 }
  0xb1   : > { %1099 = vmatprep.mubr.bf16.mxu0 %v3542_v2 }
  0xb2   : > { %v3918_v58 = vpop.permute.xlu1 %1515  ;;  %v3939_v5 = vpop.permute.xlu0 %1520 }
  0xb6   : > { %v3979_v34 = vpop.permute.xlu0 %1530 }
  0xb7   : > { %5032 = vst [vmem:[#allocation17_spill] sm:$0xff] %v3979_v34 }
  0xb8   : > { %3083 = vmatmul.mubr.msk.bf16.gmra.mrb[76].mxu0 %vm540_vm0, %v3792_v39 }
  0xb9   : > { %1109 = vmatprep.mubr.bf16.mxu0 %v3542_v2 }
  0xc0   : > { %3084 = vmatmul.mubr.msk.bf16.gmra.mrb[80].mxu0 %vm540_vm0, %v3669_v8  ;;  %v3943_v8 = vpop.permute.xlu1 %1525 }
  0xc1   : > { %1119 = vmatprep.mubr.bf16.mxu0 %v3542_v2  ;;  %v4982_v2 = vsub.s32 4, %v3914_v54  ;;  %5030 = vst [vmem:[#allocation15_spill] sm:$0xff] %v3943_v8 }
  0xc3   : > { %v3960_v18 = vrot.slane %v346_v60, %v4982_v2 }
  0xc4   : > { %v3982_v43 = vpop.permute.xlu1 %1535 }
  0xc5   : > { %5033 = vst [vmem:[#allocation18_spill] sm:$0xff] %v3982_v43 }
  0xc8   : > { %3085 = vmatmul.mubr.msk.bf16.gmra.mrb[84].mxu0 %vm540_vm0, %v3690_v13  ;;  %v3954_v13 = vsub.s32 %v1934_v0, %v3914_v54 }
  0xca   : > { %5031 = vst [vmem:[#allocation16_spill] sm:$0xff] %v3954_v13 }
  0xf3   : > { %v659_v9 = vpop.f32.mrb[0].mxu1  ;;  %v599_v12 = vpop.f32.mrb[0].mxu0 }
  0xf4   : > { %v660_v14 = vadd.f32 %v659_v9, %v3932_v1  ;;  %v661_v15 = vpop.f32.mrb[1].mxu1  ;;  %v600_v16 = vadd.f32 %v599_v12, %v3932_v1  ;;  %v601_v17 = vpop.f32.mrb[1].mxu0 }
  0xf5   : > { %v662_v20 = vadd.f32 %v661_v15, %v3937_v4  ;;  %v663_v21 = vpop.f32.mrb[2].mxu1  ;;  %v602_v22 = vadd.f32 %v601_v17, %v3937_v4  ;;  %v603_v23 = vpop.f32.mrb[2].mxu0 }
  0xf6   : > { %v1250_v26 = vmax.f32 %v660_v14, 0.0  ;;  %v664_v27 = vadd.f32 %v663_v21, %v3932_v1  ;;  %v665_v28 = vpop.f32.mrb[3].mxu1  ;;  %v1130_v29 = vmax.f32 %v600_v16, 0.0  ;;  %v604_v30 = vadd.f32 %v603_v23, %v3932_v1  ;;  %v605_v31 = vpop.f32.mrb[3].mxu0 }
  0xf7   : > { %v1251_v32 = vmax.f32 %v662_v20, 0.0  ;;  %v666_v33 = vadd.f32 %v665_v28, %v3937_v4  ;;  %v1131_v35 = vmax.f32 %v602_v22, 0.0  ;;  %v606_v36 = vadd.f32 %v605_v31, %v3937_v4 }
  0xf8   : > { %v1410_v37 = vmin.f32 %v1250_v26, 6.0  ;;  %v1260_v38 = vmax.f32 %v664_v27, 0.0  ;;  %v1290_v39 = vmin.f32 %v1130_v29, 6.0  ;;  %v1140_v40 = vmax.f32 %v604_v30, 0.0 }
  0xf9   : > { %v1411_v41 = vmin.f32 %v1251_v32, 6.0  ;;  %v1261_v42 = vmax.f32 %v666_v33, 0.0  ;;  %v1291_v44 = vmin.f32 %v1131_v35, 6.0  ;;  %v1141_v56 = vmax.f32 %v606_v36, 0.0 }
  0xfa   : > { %v1420_v57 = vmin.f32 %v1260_v38, 6.0  ;;  %v1548_v60 = vmul.f32 %v3897_v45, %v1290_v39  ;;  %v1300_v0 = vmin.f32 %v1140_v40, 6.0  ;;  %v3986_v9 = vmul.f32 %v3979_v34, %v1410_v37 }
  0xfb   : > { %v1421_v12 = vmin.f32 %v1261_v42, 6.0  ;;  %v669_v14 = vpop.f32.mrb[4].mxu1  ;;  %v1549_v15 = vmul.f32 %v3897_v45, %v1291_v44  ;;  %v1301_v16 = vmin.f32 %v1141_v56, 6.0  ;;  %v609_v17 = vpop.f32.mrb[4].mxu0  ;;  %v3990_v20 = vmul.f32 %v3979_v34, %v1411_v41 }
  0xfc   : > { %v670_v21 = vadd.f32 %v669_v14, %v3932_v1  ;;  %v671_v22 = vpop.f32.mrb[5].mxu1  ;;  %v1558_v23 = vmul.f32 %v3901_v47, %v1300_v0  ;;  %v610_v26 = vadd.f32 %v609_v17, %v3932_v1  ;;  %v611_v27 = vpop.f32.mrb[5].mxu0  ;;  %v3996_v28 = vmul.f32 %v3982_v43, %v1420_v57 }
  0xfd   : > { %v672_v29 = vadd.f32 %v671_v22, %v3937_v4  ;;  %v673_v30 = vpop.f32.mrb[6].mxu1  ;;  %v1559_v31 = vmul.f32 %v3901_v47, %v1301_v16  ;;  %v612_v32 = vadd.f32 %v611_v27, %v3937_v4  ;;  %v613_v33 = vpop.f32.mrb[6].mxu0  ;;  %v4002_v35 = vmul.f32 %v3982_v43, %v1421_v12 }
  0xfe   : > { %v1270_v36 = vmax.f32 %v670_v21, 0.0  ;;  %v674_v37 = vadd.f32 %v673_v30, %v3932_v1  ;;  %v675_v38 = vpop.f32.mrb[7].mxu1  ;;  %v1708_v39 = vadd.f32 %v1558_v23, %v1548_v60  ;;  %v1150_v40 = vmax.f32 %v610_v26, 0.0  ;;  %v615_v41 = vpop.f32.mrb[7].mxu0 }
  0xff   : > { %v1271_v42 = vmax.f32 %v672_v29, 0.0  ;;  %v676_v44 = vadd.f32 %v675_v38, %v3937_v4  ;;  %v4006_v56 = vpop.permute.xlu0 %1540  ;;  %v1729_v57 = vadd.f32 %v1559_v31, %v1549_v15  ;;  %v1151_v0 = vmax.f32 %v612_v32, 0.0 }
 0x100   : > { %5034 = vst [vmem:[#allocation19_spill] sm:$0xff] %v4006_v56  ;;  %v1430_v14 = vmin.f32 %v1270_v36, 6.0  ;;  %v1280_v16 = vmax.f32 %v674_v37, 0.0  ;;  %v1310_v17 = vmin.f32 %v1150_v40, 6.0  ;;  %v614_v12 = vadd.f32 %v613_v33, %v3932_v1 }
 0x101   : > { %v1431_v22 = vmin.f32 %v1271_v42, 6.0  ;;  %v1281_v21 = vmax.f32 %v676_v44, 0.0  ;;  %v1311_v27 = vmin.f32 %v1151_v0, 6.0  ;;  %v616_v30 = vadd.f32 %v615_v41, %v3937_v4 }
 0x102   : > { %v4010_v60 = vmin.f32 %v1280_v16, 6.0  ;;  %v1568_v23 = vmul.f32 %v3899_v46, %v1310_v17  ;;  %v1160_v26 = vmax.f32 %v614_v12, 0.0  ;;  %v4014_v29 = vmul.f32 %v4006_v56, %v1430_v14 }
 0x103   : > { %v4016_v15 = vmin.f32 %v1281_v21, 6.0  ;;  %v712_v31 = vpop.f32.mrb[8].mxu1  ;;  %v1569_v32 = vmul.f32 %v3899_v46, %v1311_v27  ;;  %v1161_v36 = vmax.f32 %v616_v30, 0.0  ;;  %v619_v33 = vpop.f32.mrb[8].mxu0  ;;  %v4020_v37 = vmul.f32 %v4006_v56, %v1431_v22 }
 0x104   : > { %v713_v38 = vadd.f32 %v712_v31, %v3947_v10  ;;  %v714_v40 = vpop.f32.mrb[9].mxu1  ;;  %v1709_v41 = vadd.f32 %v1708_v39, %v1568_v23  ;;  %v1320_v42 = vmin.f32 %v1160_v26, 6.0  ;;  %v620_v44 = vadd.f32 %v619_v33, %v3932_v1  ;;  %v621_v0 = vpop.f32.mrb[9].mxu0 }
 0x105   : > { %v715_v14 = vadd.f32 %v714_v40, %v3951_v11  ;;  %v716_v16 = vpop.f32.mrb[10].mxu1  ;;  %v1730_v17 = vadd.f32 %v1729_v57, %v1569_v32  ;;  %v1321_v12 = vmin.f32 %v1161_v36, 6.0  ;;  %v622_v21 = vadd.f32 %v621_v0, %v3937_v4  ;;  %v623_v27 = vpop.f32.mrb[10].mxu0 }
 0x106   : > { %v1132_v30 = vmax.f32 %v713_v38, 0.0  ;;  %v717_v22 = vadd.f32 %v716_v16, %v3947_v10  ;;  %v718_v6 = vpop.f32.mrb[11].mxu1  ;;  %v1578_v31 = vmul.f32 %v3903_v48, %v1320_v42  ;;  %v1170_v7 = vmax.f32 %v620_v44, 0.0  ;;  %v625_v39 = vpop.f32.mrb[11].mxu0 }
 0x107   : > { %v1133_v23 = vmax.f32 %v715_v14, 0.0  ;;  %v719_v26 = vadd.f32 %v718_v6, %v3951_v11  ;;  %v1579_v33 = vmul.f32 %v3903_v48, %v1321_v12  ;;  %v1171_v40 = vmax.f32 %v622_v21, 0.0 }
 0x108   : > { %v1292_v62 = vmin.f32 %v1132_v30, 6.0  ;;  %v1142_v57 = vmax.f32 %v717_v22, 0.0  ;;  %v1710_v32 = vadd.f32 %v1709_v41, %v1578_v31  ;;  %v1330_v36 = vmin.f32 %v1170_v7, 6.0 }
 0x109   : > { %v1293_v0 = vmin.f32 %v1133_v23, 6.0  ;;  %v1143_v63 = vmax.f32 %v719_v26, 0.0  ;;  %v1731_v38 = vadd.f32 %v1730_v17, %v1579_v33  ;;  %v1331_v2 = vmin.f32 %v1171_v40, 6.0 }
 0x10a   : > { %v1550_v16 = vmul.f32 %v3897_v45, %v1292_v62  ;;  %v1302_v3 = vmin.f32 %v1142_v57, 6.0  ;;  %v1588_v42 = vmul.f32 %v3905_v49, %v1330_v36  ;;  %v624_v44 = vadd.f32 %v623_v27, %v3932_v1 }
 0x10b   : > { %v1551_v6 = vmul.f32 %v3897_v45, %v1293_v0  ;;  %v1303_v14 = vmin.f32 %v1143_v63, 6.0  ;;  %v722_v12 = vpop.f32.mrb[12].mxu1  ;;  %v1589_v21 = vmul.f32 %v3905_v49, %v1331_v2  ;;  %v626_v41 = vadd.f32 %v625_v39, %v3937_v4  ;;  %v629_v7 = vpop.f32.mrb[12].mxu0 }
 0x10c   : > { %v1560_v30 = vmul.f32 %v3901_v47, %v1302_v3  ;;  %v723_v17 = vadd.f32 %v722_v12, %v3947_v10  ;;  %v724_v22 = vpop.f32.mrb[13].mxu1  ;;  %v1711_v62 = vadd.f32 %v1710_v32, %v1588_v42  ;;  %v1180_v31 = vmax.f32 %v624_v44, 0.0  ;;  %v631_v23 = vpop.f32.mrb[13].mxu0 }
 0x10d   : > { %v1561_v26 = vmul.f32 %v3901_v47, %v1303_v14  ;;  %v725_v27 = vadd.f32 %v724_v22, %v3951_v11  ;;  %v726_v33 = vpop.f32.mrb[14].mxu1  ;;  %v1732_v63 = vadd.f32 %v1731_v38, %v1589_v21  ;;  %v1181_v40 = vmax.f32 %v626_v41, 0.0  ;;  %v633_v57 = vpop.f32.mrb[14].mxu0 }
 0x10e   : > { %v1750_v2 = vadd.f32 %v1560_v30, %v1550_v16  ;;  %v1152_v36 = vmax.f32 %v723_v17, 0.0  ;;  %v727_v39 = vadd.f32 %v726_v33, %v3947_v10  ;;  %v728_v0 = vpop.f32.mrb[15].mxu1  ;;  %v1340_v3 = vmin.f32 %v1180_v31, 6.0  ;;  %v635_v51 = vpop.f32.mrb[15].mxu0 }
 0x10f   : > { %v1771_v12 = vadd.f32 %v1561_v26, %v1551_v6  ;;  %v1153_v54 = vmax.f32 %v725_v27, 0.0  ;;  %v729_v32 = vadd.f32 %v728_v0, %v3951_v11  ;;  %v1341_v42 = vmin.f32 %v1181_v40, 6.0 }
 0x110   : > { %v1312_v44 = vmin.f32 %v1152_v36, 6.0  ;;  %v1162_v14 = vmax.f32 %v727_v39, 0.0  ;;  %v1598_v22 = vmul.f32 %v3907_v50, %v1340_v3  ;;  %v630_v38 = vadd.f32 %v629_v7, %v3932_v1 }
 0x111   : > { %v1313_v21 = vmin.f32 %v1153_v54, 6.0  ;;  %v1163_v41 = vmax.f32 %v729_v32, 0.0  ;;  %v1599_v16 = vmul.f32 %v3907_v50, %v1341_v42  ;;  %v632_v30 = vadd.f32 %v631_v23, %v3937_v4 }
 0x112   : > { %v1570_v17 = vmul.f32 %v3899_v46, %v1312_v44  ;;  %v1322_v31 = vmin.f32 %v1162_v14, 6.0  ;;  %v1712_v6 = vadd.f32 %v1711_v62, %v1598_v22  ;;  %v1190_v26 = vmax.f32 %v630_v38, 0.0 }
 0x113   : > { %v1571_v27 = vmul.f32 %v3899_v46, %v1313_v21  ;;  %v1323_v33 = vmin.f32 %v1163_v41, 6.0  ;;  %v1733_v40 = vadd.f32 %v1732_v63, %v1599_v16  ;;  %v732_v36 = vpop.f32.mrb[16].mxu1  ;;  %v1191_v39 = vmax.f32 %v632_v30, 0.0  ;;  %v639_v0 = vpop.f32.mrb[16].mxu0 }
 0x114   : > { %v1751_v3 = vadd.f32 %v1750_v2, %v1570_v17  ;;  %v1580_v54 = vmul.f32 %v3903_v48, %v1322_v31  ;;  %v1350_v7 = vmin.f32 %v1190_v26, 6.0  ;;  %v733_v32 = vadd.f32 %v732_v36, %v3947_v10  ;;  %v734_v42 = vpop.f32.mrb[17].mxu1  ;;  %v641_v23 = vpop.f32.mrb[17].mxu0 }
 0x115   : > { %v1772_v61 = vadd.f32 %v1771_v12, %v1571_v27  ;;  %v1581_v44 = vmul.f32 %v3903_v48, %v1323_v33  ;;  %v1351_v62 = vmin.f32 %v1191_v39, 6.0  ;;  %v735_v14 = vadd.f32 %v734_v42, %v3951_v11  ;;  %v736_v22 = vpop.f32.mrb[18].mxu1  ;;  %v643_v38 = vpop.f32.mrb[18].mxu0 }
 0x116   : > { %v1752_v63 = vadd.f32 %v1751_v3, %v1580_v54  ;;  %v1608_v21 = vmul.f32 %v3909_v52, %v1350_v7  ;;  %v1172_v41 = vmax.f32 %v733_v32, 0.0  ;;  %v634_v2 = vadd.f32 %v633_v57, %v3932_v1  ;;  %v738_v16 = vpop.f32.mrb[19].mxu1  ;;  %v645_v30 = vpop.f32.mrb[19].mxu0 }
 0x117   : > { %v1773_v17 = vadd.f32 %v1772_v61, %v1581_v44  ;;  %v1609_v31 = vmul.f32 %v3909_v52, %v1351_v62  ;;  %v1173_v26 = vmax.f32 %v735_v14, 0.0  ;;  %v737_v12 = vadd.f32 %v736_v22, %v3947_v10 }
 0x118   : > { %v1713_v27 = vadd.f32 %v1712_v6, %v1608_v21  ;;  %v1332_v33 = vmin.f32 %v1172_v41, 6.0  ;;  %v1200_v36 = vmax.f32 %v634_v2, 0.0  ;;  %v636_v39 = vadd.f32 %v635_v51, %v3937_v4 }
 0x119   : > { %v1734_v42 = vadd.f32 %v1733_v40, %v1609_v31  ;;  %v1333_v3 = vmin.f32 %v1173_v26, 6.0  ;;  %v1182_v54 = vmax.f32 %v737_v12, 0.0  ;;  %v739_v7 = vadd.f32 %v738_v16, %v3951_v11 }
 0x11a   : > { %v1590_v57 = vmul.f32 %v3905_v49, %v1332_v33  ;;  %v1360_v32 = vmin.f32 %v1200_v36, 6.0  ;;  %v1201_v59 = vmax.f32 %v636_v39, 0.0  ;;  %v640_v61 = vadd.f32 %v639_v0, %v3932_v1 }
 0x11b   : > { %v1591_v44 = vmul.f32 %v3905_v49, %v1333_v3  ;;  %v1342_v62 = vmin.f32 %v1182_v54, 6.0  ;;  %v1183_v14 = vmax.f32 %v739_v7, 0.0  ;;  %v642_v6 = vadd.f32 %v641_v23, %v3937_v4  ;;  %v649_v22 = vpop.f32.mrb[20].mxu0  ;;  %v742_v21 = vpop.f32.mrb[20].mxu1 }
 0x11c   : > { %v1753_v51 = vadd.f32 %v1752_v63, %v1590_v57  ;;  %v1618_v40 = vmul.f32 %v3911_v53, %v1360_v32  ;;  %v1361_v41 = vmin.f32 %v1201_v59, 6.0  ;;  %v1210_v2 = vmax.f32 %v640_v61, 0.0  ;;  %v651_v16 = vpop.f32.mrb[21].mxu0  ;;  %v744_v31 = vpop.f32.mrb[21].mxu1 }
 0x11d   : > { %v1774_v26 = vadd.f32 %v1773_v17, %v1591_v44  ;;  %v1600_v12 = vmul.f32 %v3907_v50, %v1342_v62  ;;  %v1343_v33 = vmin.f32 %v1183_v14, 6.0  ;;  %v1211_v0 = vmax.f32 %v642_v6, 0.0  ;;  %v653_v36 = vpop.f32.mrb[22].mxu0  ;;  %v746_v39 = vpop.f32.mrb[22].mxu1 }
 0x11e   : > { %v1714_v3 = vadd.f32 %v1713_v27, %v1618_v40  ;;  %v1619_v54 = vmul.f32 %v3911_v53, %v1361_v41  ;;  %v1370_v23 = vmin.f32 %v1210_v2, 6.0  ;;  %v644_v7 = vadd.f32 %v643_v38, %v3932_v1  ;;  %v655_v63 = vpop.f32.mrb[23].mxu0  ;;  %v748_v57 = vpop.f32.mrb[23].mxu1 }
 0x11f   : > { %v1754_v32 = vadd.f32 %v1753_v51, %v1600_v12  ;;  %v1601_v59 = vmul.f32 %v3907_v50, %v1343_v33  ;;  %v1371_v61 = vmin.f32 %v1211_v0, 6.0  ;;  %v646_v17 = vadd.f32 %v645_v30, %v3937_v4  ;;  %v3382_v51 = vld [vmem:[%s4975_s4 + $0x40] sm:$0xff]  }
 0x120   : > { %v1735_v44 = vadd.f32 %v1734_v42, %v1619_v54  ;;  %v1628_v62 = vmul.f32 %v3916_v55, %v1370_v23  ;;  %v1220_v14 = vmax.f32 %v644_v7, 0.0  ;;  %v650_v6 = vadd.f32 %v649_v22, %v3932_v1  ;;  %v3383_v30 = vld [vmem:[%s4975_s4] sm:$0xff]   ;;  %v4078_v42 = vpop.permute.xlu1 %1545  ;;  %3170 = vmatprep.subr.bf16.mxu1 %v3382_v51 }
 0x121   : > { %v1775_v27 = vadd.f32 %v1774_v26, %v1601_v59  ;;  %v1629_v40 = vmul.f32 %v3916_v55, %v1371_v61  ;;  %v1221_v41 = vmax.f32 %v646_v17, 0.0  ;;  %v743_v38 = vadd.f32 %v742_v21, %v3947_v10  ;;  %5035 = vst [vmem:[#allocation20_spill] sm:$0xff] %v4078_v42  ;;  %3171 = vmatpush3.bf16.msra.mxu1 %v3383_v30 }
 0x122   : > { %v1715_v2 = vadd.f32 %v1714_v3, %v1628_v62  ;;  %v1380_v12 = vmin.f32 %v1220_v14, 6.0  ;;  %v1230_v33 = vmax.f32 %v650_v6, 0.0  ;;  %v652_v22 = vadd.f32 %v651_v16, %v3937_v4 }
 0x123   : > { %v1736_v26 = vadd.f32 %v1735_v44, %v1629_v40  ;;  %v1381_v0 = vmin.f32 %v1221_v41, 6.0  ;;  %v1192_v54 = vmax.f32 %v743_v38, 0.0  ;;  %v745_v21 = vadd.f32 %v744_v31, %v3951_v11  ;;  %v752_v23 = vpop.f32.mrb[24].mxu1  ;;  %v4082_v7 = vpop.f32.mrb[24].mxu0 }
 0x124   : > { %v1638_v59 = vmul.f32 %v3918_v58, %v1380_v12  ;;  %v1390_v61 = vmin.f32 %v1230_v33, 6.0  ;;  %v1231_v17 = vmax.f32 %v652_v22, 0.0  ;;  %v654_v50 = vadd.f32 %v653_v36, %v3932_v1  ;;  %v754_v3 = vpop.f32.mrb[25].mxu1  ;;  %v4086_v62 = vpop.f32.mrb[25].mxu0 }
 0x125   : > { %v1639_v16 = vmul.f32 %v3918_v58, %v1381_v0  ;;  %v1352_v44 = vmin.f32 %v1192_v54, 6.0  ;;  %v1193_v14 = vmax.f32 %v745_v21, 0.0  ;;  %v4091_v31 = vmul.f32 %v4078_v42, %v4010_v60  ;;  %v756_v6 = vpop.f32.mrb[26].mxu1  ;;  %v4093_v40 = vpop.f32.mrb[26].mxu0 }
 0x126   : > { %v1716_v41 = vadd.f32 %v1715_v2, %v1638_v59  ;;  %v1648_v38 = vmul.f32 %v3939_v5, %v1390_v61  ;;  %v1391_v51 = vmin.f32 %v1231_v17, 6.0  ;;  %v1240_v1 = vmax.f32 %v654_v50, 0.0  ;;  %v758_v36 = vpop.f32.mrb[27].mxu1  ;;  %v4096_v12 = vpop.f32.mrb[27].mxu0 }
 0x127   : > { %v1737_v30 = vadd.f32 %v1736_v26, %v1639_v16  ;;  %v1610_v33 = vmul.f32 %v3909_v52, %v1352_v44  ;;  %v1353_v22 = vmin.f32 %v1193_v14, 6.0  ;;  %v747_v0 = vadd.f32 %v746_v39, %v3947_v10 }
 0x128   : > { %v1717_v54 = vadd.f32 %v1716_v41, %v1648_v38  ;;  %v1649_v60 = vmul.f32 %v3939_v5, %v1391_v51  ;;  %v1400_v21 = vmin.f32 %v1240_v1, 6.0  ;;  %v656_v49 = vadd.f32 %v655_v63, %v3937_v4  ;;  %v3385_v38 = vld [vmem:[%s4975_s4 + $0x8] sm:$0xff]  }
 0x129   : > { %v1755_v2 = vadd.f32 %v1754_v32, %v1610_v33  ;;  %v1611_v59 = vmul.f32 %v3909_v52, %v1353_v22  ;;  %v1202_v61 = vmax.f32 %v747_v0, 0.0  ;;  %v4105_v50 = vmul.f32 %v4078_v42, %v4016_v15  ;;  %v3384_v15 = vld [vmem:[%s4975_s4 + $0x48] sm:$0xff]  }
 0x12a   : > { %v1738_v26 = vadd.f32 %v1737_v30, %v1649_v60  ;;  %v1658_v17 = vmul.f32 %v3943_v8, %v1400_v21  ;;  %v1241_v16 = vmax.f32 %v656_v49, 0.0  ;;  %v749_v39 = vadd.f32 %v748_v57, %v3951_v11  ;;  %3172 = vmatprep.subr.bf16.mxu1 %v3384_v15 }
 0x12b   : > { %v1776_v44 = vadd.f32 %v1775_v27, %v1611_v59  ;;  %v1362_v14 = vmin.f32 %v1202_v61, 6.0  ;;  %v753_v41 = vadd.f32 %v752_v23, %v3947_v10  ;;  %v755_v4 = vadd.f32 %v754_v3, %v3951_v11  ;;  %v762_v63 = vpop.f32.mrb[28].mxu1  ;;  %v4111_v32 = vpop.f32.mrb[28].mxu0  ;;  %3173 = vmatpush3.bf16.msra.mxu1 %v3385_v38 }
 0x12c   : > { %v1718_v49 = vadd.f32 %v1717_v54, %v1658_v17  ;;  %v1401_v51 = vmin.f32 %v1241_v16, 6.0  ;;  %v1203_v57 = vmax.f32 %v749_v39, 0.0  ;;  %v757_v27 = vadd.f32 %v756_v6, %v3947_v10  ;;  %v764_v1 = vpop.f32.mrb[29].mxu1  ;;  %v4120_v23 = vpop.f32.mrb[29].mxu0 }
 0x12d   : > { %v1620_v3 = vmul.f32 %v3911_v53, %v1362_v14  ;;  %v1212_v30 = vmax.f32 %v753_v41, 0.0  ;;  %v1213_v33 = vmax.f32 %v755_v4, 0.0  ;;  %v759_v22 = vadd.f32 %v758_v36, %v3951_v11  ;;  %v766_v0 = vpop.f32.mrb[30].mxu1  ;;  %v4124_v60 = vpop.f32.mrb[30].mxu0 }
 0x12e   : > { %v1719_v21 = vadd.f32 %v1718_v49, %v3986_v9  ;;  %v1659_v54 = vmul.f32 %v3943_v8, %v1401_v51  ;;  %v1363_v59 = vmin.f32 %v1203_v57, 6.0  ;;  %v1222_v61 = vmax.f32 %v757_v27, 0.0  ;;  %v768_v6 = vpop.f32.mrb[31].mxu1  ;;  %v4128_v17 = vpop.f32.mrb[31].mxu0 }
 0x12f   : > { %v1756_v16 = vadd.f32 %v1755_v2, %v1620_v3  ;;  %v1372_v39 = vmin.f32 %v1212_v30, 6.0  ;;  %v1373_v14 = vmin.f32 %v1213_v33, 6.0  ;;  %v1223_v41 = vmax.f32 %v759_v22, 0.0 }
 0x130   : > { %v1720_v36 = vadd.f32 %v1719_v21, %v3996_v28  ;;  %v1739_v4 = vadd.f32 %v1738_v26, %v1659_v54  ;;  %v1621_v52 = vmul.f32 %v3911_v53, %v1363_v59  ;;  %v1382_v15 = vmin.f32 %v1222_v61, 6.0 }
 0x131   : > { %v1630_v9 = vmul.f32 %v3916_v55, %v1372_v39  ;;  %v1631_v49 = vmul.f32 %v3916_v55, %v1373_v14  ;;  %v1383_v51 = vmin.f32 %v1223_v41, 6.0  ;;  %v763_v57 = vadd.f32 %v762_v63, %v3947_v10  ;;  %v3390_v63 = vld [vmem:[%s4975_s4 + $0x140] sm:$0xff]  }
 0x132   : > { %v1721_v27 = vadd.f32 %v1720_v36, %v4014_v29  ;;  %v1740_v2 = vadd.f32 %v1739_v4, %v3990_v20  ;;  %v1777_v38 = vadd.f32 %v1776_v44, %v1621_v52  ;;  %v1640_v3 = vmul.f32 %v3918_v58, %v1382_v15  ;;  %3214 = vmatprep.subr.bf16.mxu0 %v3390_v63 }
 0x133   : > { %v1757_v30 = vadd.f32 %v1756_v16, %v1630_v9  ;;  %v1641_v28 = vmul.f32 %v3918_v58, %v1383_v51  ;;  %v1232_v26 = vmax.f32 %v763_v57, 0.0  ;;  %v765_v33 = vadd.f32 %v764_v1, %v3951_v11  ;;  %v772_v22 = vpop.f32.mrb[32].mxu1  ;;  %v4140_v21 = vpop.f32.mrb[32].mxu0  ;;  %v3392_v1 = vld [vmem:[%s4975_s4 + $0x100] sm:$0xff]  }
 0x134   : > { %v1722_v29 = vadd.f32 %v1721_v27, %v4091_v31  ;;  %v1741_v20 = vadd.f32 %v1740_v2, %v4002_v35  ;;  %v1778_v52 = vadd.f32 %v1777_v38, %v1631_v49  ;;  %v767_v44 = vadd.f32 %v766_v0, %v3947_v10  ;;  %v774_v54 = vpop.f32.mrb[33].mxu1  ;;  %v4148_v59 = vpop.f32.mrb[33].mxu0  ;;  %3215 = vmatpush3.bf16.msra.mxu0 %v3392_v1 }
 0x135   : > { %v1758_v61 = vadd.f32 %v1757_v30, %v1640_v3  ;;  %v1392_v16 = vmin.f32 %v1232_v26, 6.0  ;;  %v1233_v39 = vmax.f32 %v765_v33, 0.0  ;;  %v769_v14 = vadd.f32 %v768_v6, %v3951_v11  ;;  %v776_v41 = vpop.f32.mrb[34].mxu1  ;;  %v4154_v36 = vpop.f32.mrb[34].mxu0  ;;  %v3394_v6 = vld [vmem:[%s4975_s4 + $0x148] sm:$0xff]  }
 0x136   : > { %v1723_v35 = vrot.slane %v1722_v29, 4  ;;  %v1742_v31 = vadd.f32 %v1741_v20, %v4020_v37  ;;  %v1779_v0 = vadd.f32 %v1778_v52, %v1641_v28  ;;  %v1242_v4 = vmax.f32 %v767_v44, 0.0  ;;  %v778_v15 = vpop.f32.mrb[35].mxu1  ;;  %v4157_v9 = vpop.f32.mrb[35].mxu0  ;;  %v3395_v30 = vld [vmem:[%s4975_s4 + $0x108] sm:$0xff]   ;;  %3216 = vmatprep.subr.bf16.mxu0 %v3394_v6 }
 0x137   : > { %v1650_v49 = vmul.f32 %v3939_v5, %v1392_v16  ;;  %v1393_v51 = vmin.f32 %v1233_v39, 6.0  ;;  %v1243_v57 = vmax.f32 %v769_v14, 0.0  ;;  %v773_v27 = vadd.f32 %v772_v22, %v3947_v10  ;;  %v3387_v14 = vld [vmem:[%s4975_s4 + $0x10] sm:$0xff]  }
 0x138   : > { %v1724_v2 = vadd.f32 %v1723_v35, %v1722_v29  ;;  %v1743_v38 = vadd.f32 %v1742_v31, %v4105_v50  ;;  %v1402_v37 = vmin.f32 %v1242_v4, 6.0  ;;  %v775_v3 = vadd.f32 %v774_v54, %v3951_v11  ;;  %v3386_v50 = vld [vmem:[%s4975_s4 + $0x50] sm:$0xff]   ;;  %3217 = vmatpush3.bf16.msra.mxu0 %v3395_v30 }
 0x139   : > { %v1759_v28 = vadd.f32 %v1758_v61, %v1650_v49  ;;  %v1651_v26 = vmul.f32 %v3939_v5, %v1393_v51  ;;  %v1403_v33 = vmin.f32 %v1243_v57, 6.0  ;;  %v1252_v63 = vmax.f32 %v773_v27, 0.0  ;;  %v3396_v35 = vld [vmem:[%s4975_s4 + $0x150] sm:$0xff]   ;;  %3174 = vmatprep.subr.bf16.mxu1 %v3386_v50 }
 0x13a   : > { %v1725_v22 = vrot.slane %v1724_v2, 2  ;;  %v1744_v20 = vrot.slane %v1743_v38, 4  ;;  %v1660_v52 = vmul.f32 %v3943_v8, %v1402_v37  ;;  %v1253_v29 = vmax.f32 %v775_v3, 0.0  ;;  %3175 = vmatpush3.bf16.msra.mxu1 %v3387_v14  ;;  %3218 = vmatprep.subr.bf16.mxu0 %v3396_v35  ;;  %v3401_v35 = vld [vmem:[%s4975_s4 + $0x118] sm:$0xff]  }
 0x13b   : > { %v1780_v44 = vadd.f32 %v1779_v0, %v1651_v26  ;;  %v1661_v54 = vmul.f32 %v3943_v8, %v1403_v33  ;;  %v1412_v1 = vmin.f32 %v1252_v63, 6.0  ;;  %v777_v61 = vadd.f32 %v776_v41, %v3947_v10  ;;  %v782_v16 = vpop.f32.mrb[36].mxu1  ;;  %v4176_v39 = vpop.f32.mrb[36].mxu0  ;;  %v3398_v41 = vld [vmem:[%s4975_s4 + $0x110] sm:$0xff]  }
 0x13c   : > { %v1726_v31 = vadd.f32 %v1725_v22, %v1724_v2  ;;  %v1745_v4 = vadd.f32 %v1744_v20, %v1743_v38  ;;  %v1760_v49 = vadd.f32 %v1759_v28, %v1660_v52  ;;  %v1413_v0 = vmin.f32 %v1253_v29, 6.0  ;;  %v784_v51 = vpop.f32.mrb[37].mxu1  ;;  %v4184_v57 = vpop.f32.mrb[37].mxu0  ;;  %v3388_v20 = vld [vmem:[%s4975_s4 + $0x58] sm:$0xff]   ;;  %3219 = vmatpush3.bf16.msra.mxu0 %v3398_v41 }
 0x13d   : > { %v1781_v27 = vadd.f32 %v1780_v44, %v1661_v54  ;;  %v1670_v6 = vmul.f32 %v3979_v34, %v1412_v1  ;;  %v1262_v37 = vmax.f32 %v777_v61, 0.0  ;;  %v779_v3 = vadd.f32 %v778_v15, %v3951_v11  ;;  %v786_v30 = vpop.f32.mrb[38].mxu1  ;;  %v4191_v26 = vpop.f32.mrb[38].mxu0  ;;  %v3389_v44 = vld [vmem:[%s4975_s4 + $0x18] sm:$0xff]   ;;  %3176 = vmatprep.subr.bf16.mxu1 %v3388_v20 }
 0x13e   : > { %v1727_v2 = vrot.slane %v1726_v31, 1  ;;  %v1746_v38 = vrot.slane %v1745_v4, 2  ;;  %v1671_v28 = vmul.f32 %v3979_v34, %v1413_v0  ;;  %v783_v33 = vadd.f32 %v782_v16, %v3947_v10  ;;  %v788_v63 = vpop.f32.mrb[39].mxu1  ;;  %v4195_v22 = vpop.f32.mrb[39].mxu0  ;;  %v3400_v54 = vld [vmem:[%s4975_s4 + $0x158] sm:$0xff]   ;;  %3177 = vmatpush3.bf16.msra.mxu1 %v3389_v44 }
 0x13f   : > { %v1761_v15 = vadd.f32 %v1760_v49, %v1670_v6  ;;  %v1422_v52 = vmin.f32 %v1262_v37, 6.0  ;;  %v1263_v29 = vmax.f32 %v779_v3, 0.0  ;;  %v785_v50 = vadd.f32 %v784_v51, %v3951_v11  ;;  %3220 = vmatprep.subr.bf16.mxu0 %v3400_v54 }
 0x140   : > { %v1728_v1 = vadd.f32 %v1727_v2, %v1726_v31  ;;  %v1747_v61 = vadd.f32 %v1746_v38, %v1745_v4  ;;  %v1782_v16 = vadd.f32 %v1781_v27, %v1671_v28  ;;  %v1272_v14 = vmax.f32 %v783_v33, 0.0  ;;  %v3391_v27 = vld [vmem:[%s4975_s4 + $0x60] sm:$0xff]   ;;  %3221 = vmatpush3.bf16.msra.mxu0 %v3401_v35 }
 0x141   : > { %v1680_v49 = vmul.f32 %v3982_v43, %v1422_v52  ;;  %v1423_v0 = vmin.f32 %v1263_v29, 6.0  ;;  %v1273_v51 = vmax.f32 %v785_v50, 0.0  ;;  %v787_v41 = vadd.f32 %v786_v30, %v3947_v10  ;;  %3178 = vmatprep.subr.bf16.mxu1 %v3391_v27  ;;  %v3404_v50 = vld [vmem:[%s4975_s4 + $0x120] sm:$0xff]  }
 0x142   : > { %v1748_v6 = vrot.slane %v1747_v61, 1  ;;  %v1432_v37 = vmin.f32 %v1272_v14, 6.0  ;;  %v789_v31 = vadd.f32 %v788_v63, %v3951_v11  ;;  %v826_v4 = vadd.f32 %v4082_v7, %v3960_v18  ;;  %v3393_v11 = vld [vmem:[%s4975_s4 + $0x20] sm:$0xff]  }
 0x143   : > { %v1762_v3 = vadd.f32 %v1761_v15, %v1680_v49  ;;  %v1681_v2 = vmul.f32 %v3982_v43, %v1423_v0  ;;  %v1433_v38 = vmin.f32 %v1273_v51, 6.0  ;;  %v1282_v28 = vmax.f32 %v787_v41, 0.0  ;;  %v938_v10 = vpop.f32.mrb[40].mxu1  ;;  %v4219_v30 = vpop.f32.mrb[40].mxu0  ;;  %v3402_v7 = vld [vmem:[%s4975_s4 + $0x160] sm:$0xff]   ;;  %3179 = vmatpush3.bf16.msra.mxu1 %v3393_v11 }
 0x144   : > { %v1749_v33 = vadd.f32 %v1748_v6, %v1747_v61  ;;  %v1690_v63 = vmul.f32 %v4006_v56, %v1432_v37  ;;  %v1283_v20 = vmax.f32 %v789_v31, 0.0  ;;  %v1134_v15 = vmax.f32 %v826_v4, 0.0  ;;  %v940_v52 = vpop.f32.mrb[41].mxu1  ;;  %v4228_v29 = vpop.f32.mrb[41].mxu0  ;;  %3222 = vmatprep.subr.bf16.mxu0 %v3402_v7 }
 0x145   : > { %v1783_v44 = vadd.f32 %v1782_v16, %v1681_v2  ;;  %v1691_v54 = vmul.f32 %v4006_v56, %v1433_v38  ;;  %v1442_v14 = vmin.f32 %v1282_v28, 6.0  ;;  %v828_v35 = vadd.f32 %v4086_v62, %v3964_v19  ;;  %v4236_v61 = vpop.f32.mrb[42].mxu1  ;;  %v4238_v49 = vpop.f32.mrb[42].mxu0  ;;  %v3397_v16 = vld [vmem:[%s4975_s4 + $0x68] sm:$0xff]   ;;  %3223 = vmatpush3.bf16.msra.mxu0 %v3404_v50 }
 0x146   : > { %v1763_v0 = vadd.f32 %v1762_v3, %v1690_v63  ;;  %v1443_v51 = vmin.f32 %v1283_v20, 6.0  ;;  %v1928_v41 = vcombine.low %v1728_v1, %v1749_v33  ;;  %v1294_v6 = vmin.f32 %v1134_v15, 6.0  ;;  %v4240_v37 = vpop.f32.mrb[43].mxu1  ;;  %v4242_v31 = vpop.f32.mrb[43].mxu0  ;;  %v3399_v1 = vld [vmem:[%s4975_s4 + $0x28] sm:$0xff]   ;;  %3180 = vmatprep.subr.bf16.mxu1 %v3397_v16 }
 0x147   : > { %v1784_v62 = vadd.f32 %v1783_v44, %v1691_v54  ;;  %v1700_v4 = vmul.f32 %v4078_v42, %v1442_v14  ;;  %v1135_v27 = vmax.f32 %v828_v35, 0.0  ;;  %v830_v2 = vadd.f32 %v4093_v40, %v3960_v18  ;;  %v3406_v3 = vld [vmem:[%s4975_s4 + $0x168] sm:$0xff]   ;;  %3181 = vmatpush3.bf16.msra.mxu1 %v3399_v1  ;;  %v3403_v14 = vld [vmem:[%s4975_s4 + $0x70] sm:$0xff]  }
 0x148   : > { %v1701_v38 = vmul.f32 %v4078_v42, %v1443_v51  ;;  %v4258_v28 = vrot.slane %v1928_v41, %v3954_v13  ;;  %v1552_v11 = vmul.f32 %v3897_v45, %v1294_v6  ;;  %v832_v7 = vadd.f32 %v4096_v12, %v3964_v19  ;;  %v3407_v40 = vld [vmem:[%s4975_s4 + $0x128] sm:$0xff]   ;;  %3224 = vmatprep.subr.bf16.mxu0 %v3406_v3 }
 0x149   : > { %v1764_v33 = vadd.f32 %v1763_v0, %v1700_v4  ;;  %v1295_v63 = vmin.f32 %v1135_v27, 6.0  ;;  %v1144_v20 = vmax.f32 %v830_v2, 0.0  ;;  %v836_v15 = vadd.f32 %v4111_v32, %v3960_v18  ;;  %3225 = vmatpush3.bf16.msra.mxu0 %v3407_v40  ;;  %3182 = vmatprep.subr.bf16.mxu1 %v3403_v14 }
 0x14a   : > { %5036 = vst [vmem:[#allocation21_spill] sm:$0xff] %v4258_v28  ;;  %v1785_v50 = vadd.f32 %v1784_v62, %v1701_v38  ;;  %v1145_v44 = vmax.f32 %v832_v7, 0.0  ;;  %v939_v54 = vadd.f32 %v938_v10, %v3970_v24  ;;  %v838_v12 = vadd.f32 %v4120_v23, %v3964_v19  ;;  %v3405_v10 = vld [vmem:[%s4975_s4 + $0x30] sm:$0xff]  }
 0x14b   : > { %v1765_v35 = vrot.slane %v1764_v33, 4  ;;  %v1553_v0 = vmul.f32 %v3897_v45, %v1295_v63  ;;  %v1304_v51 = vmin.f32 %v1144_v20, 6.0  ;;  %v1154_v41 = vmax.f32 %v836_v15, 0.0  ;;  %v4275_v32 = vpop.f32.mrb[44].mxu1  ;;  %v4277_v6 = vpop.f32.mrb[44].mxu0  ;;  %3183 = vmatpush3.bf16.msra.mxu1 %v3405_v10  ;;  %v3408_v20 = vld [vmem:[%s4975_s4 + $0x170] sm:$0xff]  }
 0x14c   : > { %v1786_v16 = vrot.slane %v1785_v50, 4  ;;  %v1305_v23 = vmin.f32 %v1145_v44, 6.0  ;;  %v1136_v62 = vmax.f32 %v939_v54, 0.0  ;;  %v1155_v4 = vmax.f32 %v838_v12, 0.0  ;;  %v4282_v27 = vpop.f32.mrb[45].mxu1  ;;  %v4284_v2 = vpop.f32.mrb[45].mxu0  ;;  %3226 = vmatprep.subr.bf16.mxu0 %v3408_v20 }
 0x14d   : > { %v1766_v1 = vadd.f32 %v1765_v35, %v1764_v33  ;;  %v1562_v3 = vmul.f32 %v3901_v47, %v1304_v51  ;;  %v1314_v38 = vmin.f32 %v1154_v41, 6.0  ;;  %v941_v7 = vadd.f32 %v940_v52, %v3974_v25  ;;  %v4288_v40 = vpop.f32.mrb[46].mxu1  ;;  %v4290_v63 = vpop.f32.mrb[46].mxu0  ;;  %v3410_v15 = vld [vmem:[%s4975_s4 + $0x130] sm:$0xff]   ;;  %v3409_v35 = vld [vmem:[%s4975_s4 + $0x78] sm:$0xff]  }
 0x14e   : > { %v1787_v44 = vadd.f32 %v1786_v16, %v1785_v50  ;;  %v1563_v33 = vmul.f32 %v3901_v47, %v1305_v23  ;;  %v1296_v54 = vmin.f32 %v1136_v62, 6.0  ;;  %v1315_v12 = vmin.f32 %v1155_v4, 6.0  ;;  %v4299_v14 = vpop.f32.mrb[47].mxu1  ;;  %v4301_v52 = vpop.f32.mrb[47].mxu0  ;;  %v3411_v50 = vld [vmem:[%s4975_s4 + $0x38] sm:$0xff]   ;;  %3184 = vmatprep.subr.bf16.mxu1 %v3409_v35  ;;  %3227 = vmatpush3.bf16.msra.mxu0 %v3410_v15 }
 0x14f   : > { %v1767_v51 = vrot.slane %v1766_v1, 2  ;;  %v1792_v41 = vadd.f32 %v1562_v3, %v1552_v11  ;;  %v1572_v10 = vmul.f32 %v3899_v46, %v1314_v38  ;;  %v1137_v42 = vmax.f32 %v941_v7, 0.0  ;;  %v3412_v16 = vld [vmem:[%s4975_s4 + $0x178] sm:$0xff]   ;;  %3185 = vmatpush3.bf16.msra.mxu1 %v3411_v50 }
 0x150   : > { %v1788_v23 = vrot.slane %v1787_v44, 2  ;;  %v1813_v62 = vadd.f32 %v1563_v33, %v1553_v0  ;;  %v1554_v4 = vmul.f32 %v3897_v45, %v1296_v54  ;;  %v1573_v56 = vmul.f32 %v3899_v46, %v1315_v12  ;;  %v3413_v11 = vld [vmem:[%s4975_s4 + $0x138] sm:$0xff]   ;;  %3228 = vmatprep.subr.bf16.mxu0 %v3412_v16  ;;  %v3414_v54 = vld [vmem:[%s4975_s4 + $0xc0] sm:$0xff]  }
 0x151   : > { %v1768_v3 = vadd.f32 %v1767_v51, %v1766_v1  ;;  %v1793_v38 = vadd.f32 %v1792_v41, %v1572_v10  ;;  %v1297_v7 = vmin.f32 %v1137_v42, 6.0  ;;  %v840_v20 = vadd.f32 %v4124_v60, %v3960_v18  ;;  %3192 = vmatprep.subr.bf16.mxu1 %v3414_v54 }
 0x152   : > { %v1789_v43 = vadd.f32 %v1788_v23, %v1787_v44  ;;  %v1814_v0 = vadd.f32 %v1813_v62, %v1573_v56  ;;  %v943_v33 = vadd.f32 %v4236_v61, %v3970_v24  ;;  %v842_v15 = vadd.f32 %v4128_v17, %v3964_v19  ;;  %3229 = vmatpush3.bf16.msra.mxu0 %v3413_v11 }
 0x153   : > { %v1769_v1 = vrot.slane %v1768_v3, 1  ;;  %v1555_v42 = vmul.f32 %v3897_v45, %v1297_v7  ;;  %v1164_v12 = vmax.f32 %v840_v20, 0.0  ;;  %v945_v60 = vadd.f32 %v4240_v37, %v3974_v25  ;;  %v4330_v35 = vpop.f32.mrb[48].mxu1  ;;  %v4332_v56 = vpop.f32.mrb[48].mxu0 }
 0x154   : > { %v1790_v44 = vrot.slane %v1789_v43, 1  ;;  %v1146_v61 = vmax.f32 %v943_v33, 0.0  ;;  %v1165_v51 = vmax.f32 %v842_v15, 0.0  ;;  %v846_v17 = vadd.f32 %v4140_v21, %v3960_v18  ;;  %v4336_v41 = vpop.f32.mrb[49].mxu1  ;;  %v4338_v10 = vpop.f32.mrb[49].mxu0 }
 0x155   : > { %v1770_v50 = vadd.f32 %v1769_v1, %v1768_v3  ;;  %v1324_v16 = vmin.f32 %v1164_v12, 6.0  ;;  %v1147_v23 = vmax.f32 %v945_v60, 0.0  ;;  %v848_v37 = vadd.f32 %v4148_v59, %v3964_v19  ;;  %v4342_v62 = vpop.f32.mrb[50].mxu1  ;;  %v4344_v7 = vpop.f32.mrb[50].mxu0  ;;  %v3415_v59 = vld [vmem:[%s4975_s4 + $0x240] sm:$0xff]  }
 0x156   : > { %5037 = vst [vmem:[#allocation22_spill] sm:$0xff] %v4344_v7  ;;  %v1791_v20 = vadd.f32 %v1790_v44, %v1789_v43  ;;  %v1306_v33 = vmin.f32 %v1146_v61, 6.0  ;;  %v1325_v15 = vmin.f32 %v1165_v51, 6.0  ;;  %v1174_v21 = vmax.f32 %v846_v17, 0.0  ;;  %v4346_v45 = vpop.f32.mrb[51].mxu1  ;;  %v4348_v34 = vpop.f32.mrb[51].mxu0  ;;  %3258 = vmatprep.subr.bf16.mxu0 %v3415_v59 }
 0x157   : > { %5038 = vst [vmem:[#allocation23_spill] sm:$0xff] %v4348_v34  ;;  %v1582_v11 = vmul.f32 %v3903_v48, %v1324_v16  ;;  %v1307_v3 = vmin.f32 %v1147_v23, 6.0  ;;  %v1175_v54 = vmax.f32 %v848_v37, 0.0  ;;  %v850_v1 = vadd.f32 %v4154_v36, %v3960_v18  ;;  %v5040_v34 = vld [vmem:[#allocation9_spill] sm:$0xff] }
 0x158   : > { %v1929_v12 = vcombine.low %v1770_v50, %v1791_v20  ;;  %v1564_v43 = vmul.f32 %v3901_v47, %v1306_v33  ;;  %v1583_v60 = vmul.f32 %v3903_v48, %v1325_v15  ;;  %v1334_v44 = vmin.f32 %v1174_v21, 6.0 }
 0x159   : > { %v1794_v61 = vadd.f32 %v1793_v38, %v1582_v11  ;;  %v1565_v51 = vmul.f32 %v3901_v47, %v1307_v3  ;;  %v1335_v17 = vmin.f32 %v1175_v54, 6.0  ;;  %v1184_v16 = vmax.f32 %v850_v1, 0.0 }
 0x15a   : > { %v4360_v23 = vrot.slane %v1929_v12, %v3954_v13  ;;  %v1834_v36 = vadd.f32 %v1564_v43, %v1554_v4  ;;  %v1815_v37 = vadd.f32 %v1814_v0, %v1583_v60  ;;  %v1592_v7 = vmul.f32 %v5040_v34, %v1334_v44 }
 0x15b   : > { %v1855_v8 = vadd.f32 %v1565_v51, %v1555_v42  ;;  %v1593_v50 = vmul.f32 %v5040_v34, %v1335_v17  ;;  %v1344_v20 = vmin.f32 %v1184_v16, 6.0  ;;  %v852_v33 = vadd.f32 %v4157_v9, %v3964_v19  ;;  %v4366_v38 = vpop.f32.mrb[52].mxu0  ;;  %v4368_v15 = vpop.f32.mrb[52].mxu1  ;;  %v5041_v9 = vld [vmem:[#allocation10_spill] sm:$0xff] }
 0x15c   : > { %5039 = vst [vmem:[#allocation24_spill] sm:$0xff] %v4360_v23  ;;  %v1795_v11 = vadd.f32 %v1794_v61, %v1592_v7  ;;  %v856_v4 = vadd.f32 %v4176_v39, %v3960_v18  ;;  %v949_v0 = vadd.f32 %v4275_v32, %v3970_v24  ;;  %v4376_v42 = vpop.f32.mrb[53].mxu0  ;;  %v4378_v3 = vpop.f32.mrb[53].mxu1  ;;  %v858_v12 = vadd.f32 %v4184_v57, %v3964_v19  ;;  %v5042_v23 = vld [vmem:[#allocation11_spill] sm:$0xff] }
 0x15d   : > { %v1816_v54 = vadd.f32 %v1815_v37, %v1593_v50  ;;  %v1602_v1 = vmul.f32 %v5041_v9, %v1344_v20  ;;  %v1185_v59 = vmax.f32 %v852_v33, 0.0  ;;  %v4383_v43 = vpop.f32.mrb[54].mxu0  ;;  %v4385_v7 = vpop.f32.mrb[54].mxu1  ;;  %v951_v32 = vadd.f32 %v4282_v27, %v3974_v25 }
 0x15e   : > { %v1194_v60 = vmax.f32 %v856_v4, 0.0  ;;  %v1156_v39 = vmax.f32 %v949_v0, 0.0  ;;  %v4389_v44 = vpop.f32.mrb[55].mxu0  ;;  %v4391_v61 = vpop.f32.mrb[55].mxu1  ;;  %v1195_v16 = vmax.f32 %v858_v12, 0.0  ;;  %v860_v37 = vadd.f32 %v4191_v26, %v3960_v18 }
 0x15f   : > { %v1796_v51 = vadd.f32 %v1795_v11, %v1602_v1  ;;  %v1345_v17 = vmin.f32 %v1185_v59, 6.0  ;;  %v1157_v20 = vmax.f32 %v951_v32, 0.0  ;;  %v953_v33 = vadd.f32 %v4288_v40, %v3970_v24 }
 0x160   : > { %v1354_v57 = vmin.f32 %v1194_v60, 6.0  ;;  %v1316_v50 = vmin.f32 %v1156_v39, 6.0  ;;  %v1355_v0 = vmin.f32 %v1195_v16, 6.0  ;;  %v1204_v27 = vmax.f32 %v860_v37, 0.0 }
 0x161   : > { %v1603_v4 = vmul.f32 %v5041_v9, %v1345_v17  ;;  %v862_v21 = vadd.f32 %v4195_v22, %v3964_v19  ;;  %v1317_v59 = vmin.f32 %v1157_v20, 6.0  ;;  %v1166_v12 = vmax.f32 %v953_v33, 0.0 }
 0x162   : > { %v1612_v11 = vmul.f32 %v5042_v23, %v1354_v57  ;;  %v1574_v1 = vmul.f32 %v3899_v46, %v1316_v50  ;;  %v1613_v60 = vmul.f32 %v5042_v23, %v1355_v0  ;;  %v1364_v39 = vmin.f32 %v1204_v27, 6.0 }
 0x163   : > { %v1817_v26 = vadd.f32 %v1816_v54, %v1603_v4  ;;  %v1205_v32 = vmax.f32 %v862_v21, 0.0  ;;  %v4403_v28 = vpop.f32.mrb[56].mxu1  ;;  %v4405_v40 = vpop.f32.mrb[56].mxu0  ;;  %v1575_v37 = vmul.f32 %v3899_v46, %v1317_v59  ;;  %v1326_v22 = vmin.f32 %v1166_v12, 6.0 }
 0x164   : > { %v1797_v17 = vadd.f32 %v1796_v51, %v1612_v11  ;;  %v1835_v16 = vadd.f32 %v1834_v36, %v1574_v1  ;;  %v4408_v13 = vpop.f32.mrb[57].mxu1  ;;  %v4410_v57 = vpop.f32.mrb[57].mxu0  ;;  %v1622_v54 = vmul.f32 %v3911_v53, %v1364_v39  ;;  %v955_v21 = vadd.f32 %v4299_v14, %v3974_v25 }
 0x165   : > { %v1818_v50 = vadd.f32 %v1817_v26, %v1613_v60  ;;  %v1365_v20 = vmin.f32 %v1205_v32, 6.0  ;;  %v4415_v33 = vpop.f32.mrb[58].mxu1  ;;  %v4417_v4 = vpop.f32.mrb[58].mxu0  ;;  %v1856_v51 = vadd.f32 %v1855_v8, %v1575_v37  ;;  %v1584_v36 = vmul.f32 %v3903_v48, %v1326_v22 }
 0x166   : > { %v866_v0 = vadd.f32 %v4219_v30, %v3960_v18  ;;  %v868_v27 = vadd.f32 %v4228_v29, %v3964_v19  ;;  %v4424_v11 = vpop.f32.mrb[59].mxu1  ;;  %v4426_v1 = vpop.f32.mrb[59].mxu0  ;;  %v1798_v59 = vadd.f32 %v1797_v17, %v1622_v54  ;;  %v1167_v12 = vmax.f32 %v955_v21, 0.0 }
 0x167   : > { %v1623_v14 = vmul.f32 %v3911_v53, %v1365_v20  ;;  %v870_v26 = vadd.f32 %v4238_v49, %v3960_v18  ;;  %v1836_v8 = vadd.f32 %v1835_v16, %v1584_v36  ;;  %v872_v30 = vadd.f32 %v4242_v31, %v3964_v19 }
 0x168   : > { %v1214_v60 = vmax.f32 %v866_v0, 0.0  ;;  %v1215_v39 = vmax.f32 %v868_v27, 0.0  ;;  %v1327_v37 = vmin.f32 %v1167_v12, 6.0  ;;  %v876_v22 = vadd.f32 %v4277_v6, %v3960_v18 }
 0x169   : > { %v1819_v32 = vadd.f32 %v1818_v50, %v1623_v14  ;;  %v1224_v29 = vmax.f32 %v870_v26, 0.0  ;;  %v1225_v54 = vmax.f32 %v872_v30, 0.0  ;;  %v959_v20 = vadd.f32 %v4330_v35, %v3970_v24 }
 0x16a   : > { %v1374_v46 = vmin.f32 %v1214_v60, 6.0  ;;  %v1375_v17 = vmin.f32 %v1215_v39, 6.0  ;;  %v1585_v49 = vmul.f32 %v3903_v48, %v1327_v37  ;;  %v1234_v21 = vmax.f32 %v876_v22, 0.0 }
 0x16b   : > { %v1384_v16 = vmin.f32 %v1224_v29, 6.0  ;;  %v878_v36 = vadd.f32 %v4284_v2, %v3964_v19  ;;  %v4440_v31 = vpop.f32.mrb[60].mxu1  ;;  %v4442_v50 = vpop.f32.mrb[60].mxu0  ;;  %v1385_v27 = vmin.f32 %v1225_v54, 6.0  ;;  %v1176_v14 = vmax.f32 %v959_v20, 0.0 }
 0x16c   : > { %v1632_v0 = vmul.f32 %v3916_v55, %v1374_v46  ;;  %v1633_v6 = vmul.f32 %v3916_v55, %v1375_v17  ;;  %v4446_v12 = vpop.f32.mrb[61].mxu1  ;;  %v4448_v35 = vpop.f32.mrb[61].mxu0  ;;  %v1857_v26 = vadd.f32 %v1856_v51, %v1585_v49  ;;  %v1394_v39 = vmin.f32 %v1234_v21, 6.0 }
 0x16d   : > { %v1642_v60 = vmul.f32 %v3918_v58, %v1384_v16  ;;  %v1235_v30 = vmax.f32 %v878_v36, 0.0  ;;  %v4451_v2 = vpop.f32.mrb[62].mxu1  ;;  %v4453_v37 = vpop.f32.mrb[62].mxu0  ;;  %v1643_v46 = vmul.f32 %v3918_v58, %v1385_v27  ;;  %v1336_v17 = vmin.f32 %v1176_v14, 6.0 }
 0x16e   : > { %v1799_v29 = vadd.f32 %v1798_v59, %v1632_v0  ;;  %v1820_v22 = vadd.f32 %v1819_v32, %v1633_v6  ;;  %v4456_v54 = vpop.f32.mrb[63].mxu1  ;;  %v4458_v20 = vpop.f32.mrb[63].mxu0  ;;  %v1652_v48 = vmul.f32 %v3939_v5, %v1394_v39  ;;  %v961_v49 = vadd.f32 %v4336_v41, %v3974_v25 }
 0x16f   : > { %v1395_v51 = vmin.f32 %v1235_v30, 6.0  ;;  %v880_v16 = vadd.f32 %v4290_v63, %v3960_v18  ;;  %v1594_v59 = vmul.f32 %v5040_v34, %v1336_v17  ;;  %v963_v32 = vadd.f32 %v4342_v62, %v3970_v24 }
 0x170   : > { %v1800_v21 = vadd.f32 %v1799_v29, %v1642_v60  ;;  %v1821_v36 = vadd.f32 %v1820_v22, %v1643_v46  ;;  %v1177_v6 = vmax.f32 %v961_v49, 0.0  ;;  %v882_v14 = vadd.f32 %v4301_v52, %v3964_v19 }
 0x171   : > { %v1653_v0 = vmul.f32 %v3939_v5, %v1395_v51  ;;  %v1244_v27 = vmax.f32 %v880_v16, 0.0  ;;  %v1837_v30 = vadd.f32 %v1836_v8, %v1594_v59  ;;  %v1186_v41 = vmax.f32 %v963_v32, 0.0  ;;  %v5048_v32 = vld [vmem:[#allocation22_spill] sm:$0xff] }
 0x172   : > { %v1801_v39 = vadd.f32 %v1800_v21, %v1652_v48  ;;  %v965_v63 = vadd.f32 %v4346_v45, %v3974_v25  ;;  %v1337_v29 = vmin.f32 %v1177_v6, 6.0  ;;  %v1245_v46 = vmax.f32 %v882_v14, 0.0  ;;  %v5047_v21 = vld [vmem:[#allocation15_spill] sm:$0xff] }
 0x173   : > { %v1822_v60 = vadd.f32 %v1821_v36, %v1653_v0  ;;  %v1404_v22 = vmin.f32 %v1244_v27, 6.0  ;;  %v4473_v17 = vpop.f32.mrb[64].mxu1  ;;  %v4475_v62 = vpop.f32.mrb[64].mxu0  ;;  %v1346_v51 = vmin.f32 %v1186_v41, 6.0  ;;  %v886_v16 = vadd.f32 %v4332_v56, %v3960_v18 }
 0x174   : > { %5043 = vst [vmem:[#allocation10_spill] sm:$0xff] %v4473_v17  ;;  %5044 = vst [vmem:[#allocation11_spill] sm:$0xff] %v4475_v62  ;;  %v1187_v49 = vmax.f32 %v965_v63, 0.0  ;;  %v888_v48 = vadd.f32 %v4338_v10, %v3964_v19  ;;  %v4481_v52 = vpop.f32.mrb[65].mxu1  ;;  %v4483_v8 = vpop.f32.mrb[65].mxu0  ;;  %v1595_v45 = vmul.f32 %v5040_v34, %v1337_v29  ;;  %v1405_v59 = vmin.f32 %v1245_v46, 6.0 }
 0x175   : > { %5045 = vst [vmem:[#allocation25_spill] sm:$0xff] %v4481_v52  ;;  %5046 = vst [vmem:[#allocation26_spill] sm:$0xff] %v4483_v8  ;;  %v1662_v36 = vmul.f32 %v5047_v21, %v1404_v22  ;;  %v890_v0 = vadd.f32 %v5048_v32, %v3960_v18  ;;  %v4489_v6 = vpop.f32.mrb[66].mxu1  ;;  %v4491_v27 = vpop.f32.mrb[66].mxu0  ;;  %v1604_v56 = vmul.f32 %v5041_v9, %v1346_v51  ;;  %v1254_v10 = vmax.f32 %v886_v16, 0.0  ;;  %v5052_v51 = vld [vmem:[#allocation23_spill] sm:$0xff] }
 0x176   : > { %5049 = vst [vmem:[#allocation15_spill] sm:$0xff] %v4489_v6  ;;  %5050 = vst [vmem:[#allocation22_spill] sm:$0xff] %v4491_v27  ;;  %v1347_v14 = vmin.f32 %v1187_v49, 6.0  ;;  %v1255_v41 = vmax.f32 %v888_v48, 0.0  ;;  %v4494_v63 = vpop.f32.mrb[67].mxu1  ;;  %v4496_v8 = vpop.f32.mrb[67].mxu0  ;;  %v1858_v29 = vadd.f32 %v1857_v26, %v1595_v45  ;;  %v1663_v22 = vmul.f32 %v5047_v21, %v1405_v59 }
 0x177   : > { %5051 = vst [vmem:[#allocation27_spill] sm:$0xff] %v4496_v8  ;;  %v1802_v34 = vadd.f32 %v1801_v39, %v1662_v36  ;;  %v1264_v46 = vmax.f32 %v890_v0, 0.0  ;;  %v1838_v52 = vadd.f32 %v1837_v30, %v1604_v56  ;;  %v1414_v6 = vmin.f32 %v1254_v10, 6.0  ;;  %v5053_v8 = vld [vmem:[#allocation17_spill] sm:$0xff]  ;;  %v5054_v45 = vld [vmem:[#allocation18_spill] sm:$0xff] }
 0x178   : > { %v1605_v32 = vmul.f32 %v5041_v9, %v1347_v14  ;;  %v1415_v62 = vmin.f32 %v1255_v41, 6.0  ;;  %v1823_v27 = vadd.f32 %v1822_v60, %v1663_v22  ;;  %v892_v49 = vadd.f32 %v5052_v51, %v3964_v19 }
 0x179   : > { %v1424_v17 = vmin.f32 %v1264_v46, 6.0  ;;  %v896_v16 = vadd.f32 %v4366_v38, %v3960_v18  ;;  %v1672_v26 = vmul.f32 %v5053_v8, %v1414_v6  ;;  %v969_v30 = vadd.f32 %v4368_v15, %v3970_v24 }
 0x17a   : > { %v1859_v48 = vadd.f32 %v1858_v29, %v1605_v32  ;;  %v1673_v39 = vmul.f32 %v5053_v8, %v1415_v62  ;;  %v1265_v59 = vmax.f32 %v892_v49, 0.0  ;;  %v898_v60 = vadd.f32 %v4376_v42, %v3964_v19 }
 0x17b   : > { %v1682_v36 = vmul.f32 %v5054_v45, %v1424_v17  ;;  %v1274_v0 = vmax.f32 %v896_v16, 0.0  ;;  %v4511_v56 = vpop.f32.mrb[68].mxu1  ;;  %v4513_v14 = vpop.f32.mrb[68].mxu0  ;;  %v1803_v38 = vadd.f32 %v1802_v34, %v1672_v26  ;;  %v1196_v41 = vmax.f32 %v969_v30, 0.0 }
 0x17c   : > { %v1824_v10 = vadd.f32 %v1823_v27, %v1673_v39  ;;  %v971_v62 = vadd.f32 %v4378_v3, %v3974_v25  ;;  %v4517_v6 = vpop.f32.mrb[69].mxu1  ;;  %v4519_v15 = vpop.f32.mrb[69].mxu0  ;;  %v1425_v17 = vmin.f32 %v1265_v59, 6.0  ;;  %v1275_v22 = vmax.f32 %v898_v60, 0.0  ;;  %v5056_v39 = vld [vmem:[#allocation19_spill] sm:$0xff] }
 0x17d   : > { %v1434_v29 = vmin.f32 %v1274_v0, 6.0  ;;  %v900_v42 = vadd.f32 %v4383_v43, %v3960_v18  ;;  %v4523_v46 = vpop.f32.mrb[70].mxu1  ;;  %v4525_v32 = vpop.f32.mrb[70].mxu0  ;;  %v1804_v34 = vadd.f32 %v1803_v38, %v1682_v36  ;;  %v1356_v27 = vmin.f32 %v1196_v41, 6.0 }
 0x17e   : > { %v1197_v51 = vmax.f32 %v971_v62, 0.0  ;;  %v973_v3 = vadd.f32 %v4385_v7, %v3970_v24  ;;  %v4529_v49 = vpop.f32.mrb[71].mxu1  ;;  %v4531_v16 = vpop.f32.mrb[71].mxu0  ;;  %v1683_v26 = vmul.f32 %v5054_v45, %v1425_v17  ;;  %v1435_v59 = vmin.f32 %v1275_v22, 6.0  ;;  %v347_v17 = vld [vmem:[%s4974_s3 + $0x8] sm:$0x3] }
 0x17f   : > { %5055 = vst [vmem:[#allocation23_spill] sm:$0xff] %v4531_v16  ;;  %v1692_v30 = vmul.f32 %v5056_v39, %v1434_v29  ;;  %v1284_v18 = vmax.f32 %v900_v42, 0.0  ;;  %v1614_v43 = vmul.f32 %v5042_v23, %v1356_v27  ;;  %v902_v36 = vadd.f32 %v4389_v44, %v3964_v19 }
 0x180   : > { %v1357_v0 = vmin.f32 %v1197_v51, 6.0  ;;  %v1206_v60 = vmax.f32 %v973_v3, 0.0  ;;  %v1825_v38 = vadd.f32 %v1824_v10, %v1683_v26  ;;  %v1693_v7 = vmul.f32 %v5056_v39, %v1435_v59  ;;  %v5057_v51 = vld [vmem:[#allocation20_spill] sm:$0xff] }
 0x181   : > { %v1805_v41 = vadd.f32 %v1804_v34, %v1692_v30  ;;  %v1444_v62 = vmin.f32 %v1284_v18, 6.0  ;;  %v1839_v16 = vadd.f32 %v1838_v52, %v1614_v43  ;;  %v1285_v42 = vmax.f32 %v902_v36, 0.0  ;;  %v5058_v52 = vld [vmem:[#allocation13_spill] sm:$0xff] }
 0x182   : > { %v1615_v29 = vmul.f32 %v5042_v23, %v1357_v0  ;;  %v1366_v22 = vmin.f32 %v1206_v60, 6.0  ;;  %v1826_v27 = vadd.f32 %v1825_v38, %v1693_v7  ;;  %v975_v19 = vadd.f32 %v4391_v61, %v3974_v25  ;;  %v5059_v7 = vld [vmem:[#allocation14_spill] sm:$0xff] }
 0x183   : > { %v1702_v3 = vmul.f32 %v5057_v51, %v1444_v62  ;;  %v979_v44 = vadd.f32 %v4403_v28, %v3970_v24  ;;  %v4548_v10 = vpop.f32.mrb[72].mxu0  ;;  %v1445_v30 = vmin.f32 %v1285_v42, 6.0  ;;  %v4552_v59 = vrot.slane %v347_v17, %v5058_v52 }
 0x184   : > { %v1860_v34 = vadd.f32 %v1859_v48, %v1615_v29  ;;  %v1624_v26 = vmul.f32 %v3911_v53, %v1366_v22  ;;  %v4554_v18 = vpop.f32.mrb[73].mxu0  ;;  %v1207_v0 = vmax.f32 %v975_v19, 0.0  ;;  %v981_v61 = vadd.f32 %v4408_v13, %v3974_v25 }
 0x185   : > { %v1806_v43 = vadd.f32 %v1805_v41, %v1702_v3  ;;  %v1216_v60 = vmax.f32 %v979_v44, 0.0  ;;  %v4558_v36 = vpop.f32.mrb[74].mxu0  ;;  %v1703_v38 = vmul.f32 %v5057_v51, %v1445_v30  ;;  %v1052_v48 = vadd.f32 %v4405_v40, %v4552_v59  ;;  %v5061_v51 = vld [vmem:[#allocation6_spill] sm:$0xff] }
 0x186   : > { %v1840_v28 = vadd.f32 %v1839_v16, %v1624_v26  ;;  %v4564_v62 = vrot.slane %v347_v17, %v5059_v7  ;;  %v4566_v29 = vpop.f32.mrb[75].mxu0  ;;  %v1367_v41 = vmin.f32 %v1207_v0, 6.0  ;;  %v1217_v3 = vmax.f32 %v981_v61, 0.0 }
 0x187   : > { %5060 = vst [vmem:[#allocation17_spill] sm:$0xff] %v4566_v29  ;;  %v1807_v22 = vrot.slane %v1806_v43, 4  ;;  %v1376_v42 = vmin.f32 %v1216_v60, 6.0  ;;  %v1827_v19 = vadd.f32 %v1826_v27, %v1703_v38  ;;  %v1138_v44 = vmax.f32 %v1052_v48, 0.0 }
 0x188   : > { %v1054_v13 = vadd.f32 %v4410_v57, %v4564_v62  ;;  %v983_v16 = vadd.f32 %v4415_v33, %v3970_v24  ;;  %v1625_v40 = vmul.f32 %v3911_v53, %v1367_v41  ;;  %v1377_v30 = vmin.f32 %v1217_v3, 6.0 }
 0x189   : > { %v1808_v26 = vadd.f32 %v1807_v22, %v1806_v43  ;;  %v1634_v17 = vmul.f32 %v3916_v55, %v1376_v42  ;;  %v1828_v52 = vrot.slane %v1827_v19, 4  ;;  %v1298_v7 = vmin.f32 %v1138_v44, 6.0 }
 0x18a   : > { %v1139_v29 = vmax.f32 %v1054_v13, 0.0  ;;  %v1226_v0 = vmax.f32 %v983_v16, 0.0  ;;  %v1861_v61 = vadd.f32 %v1860_v34, %v1625_v40  ;;  %v1635_v38 = vmul.f32 %v3916_v55, %v1377_v30 }
 0x18b   : > { %v1809_v60 = vrot.slane %v1808_v26, 2  ;;  %v1841_v27 = vadd.f32 %v1840_v28, %v1634_v17  ;;  %v4575_v48 = vpop.f32.mrb[76].mxu0  ;;  %v1829_v57 = vadd.f32 %v1828_v52, %v1827_v19  ;;  %v1556_v33 = vmul.f32 %v5061_v51, %v1298_v7 }
 0x18c   : > { %v1299_v43 = vmin.f32 %v1139_v29, 6.0  ;;  %v1386_v22 = vmin.f32 %v1226_v0, 6.0  ;;  %v4578_v41 = vpop.f32.mrb[77].mxu0  ;;  %v1862_v3 = vadd.f32 %v1861_v61, %v1635_v38  ;;  %v1056_v44 = vadd.f32 %v4417_v4, %v4552_v59 }
 0x18d   : > { %v1810_v42 = vadd.f32 %v1809_v60, %v1808_v26  ;;  %v985_v34 = vadd.f32 %v4424_v11, %v3974_v25  ;;  %v4584_v28 = vpop.f32.mrb[78].mxu0  ;;  %v1830_v13 = vrot.slane %v1829_v57, 2  ;;  %v1058_v7 = vadd.f32 %v4426_v1, %v4564_v62 }
 0x18e   : > { %v1557_v16 = vmul.f32 %v5061_v51, %v1299_v43  ;;  %v1644_v52 = vmul.f32 %v3918_v58, %v1386_v22  ;;  %v4590_v29 = vpop.f32.mrb[79].mxu0  ;;  %v1148_v26 = vmax.f32 %v1056_v44, 0.0  ;;  %v989_v4 = vadd.f32 %v4440_v31, %v3970_v24 }
 0x18f   : > { %v1811_v19 = vrot.slane %v1810_v42, 1  ;;  %v1227_v40 = vmax.f32 %v985_v34, 0.0  ;;  %v1831_v17 = vadd.f32 %v1830_v13, %v1829_v57  ;;  %v1149_v30 = vmax.f32 %v1058_v7, 0.0 }
 0x190   : > { %v1842_v11 = vadd.f32 %v1841_v27, %v1644_v52  ;;  %v1062_v0 = vadd.f32 %v4442_v50, %v4552_v59  ;;  %v1308_v60 = vmin.f32 %v1148_v26, 6.0  ;;  %v1236_v38 = vmax.f32 %v989_v4, 0.0 }
 0x191   : > { %v1812_v51 = vadd.f32 %v1811_v19, %v1810_v42  ;;  %v1387_v61 = vmin.f32 %v1227_v40, 6.0  ;;  %v1832_v43 = vrot.slane %v1831_v17, 1  ;;  %v1309_v1 = vmin.f32 %v1149_v30, 6.0 }
 0x192   : > { %v1158_v22 = vmax.f32 %v1062_v0, 0.0  ;;  %v991_v44 = vadd.f32 %v4446_v12, %v3974_v25  ;;  %v1566_v34 = vmul.f32 %v3901_v47, %v1308_v60  ;;  %v1396_v57 = vmin.f32 %v1236_v38, 6.0 }
 0x193   : > { %v1645_v31 = vmul.f32 %v3918_v58, %v1387_v61  ;;  %v1064_v27 = vadd.f32 %v4448_v35, %v4564_v62  ;;  %v4602_v13 = vpop.f32.mrb[80].mxu0  ;;  %v1833_v50 = vadd.f32 %v1832_v43, %v1831_v17  ;;  %v1567_v42 = vmul.f32 %v3901_v47, %v1309_v1  ;;  %v5063_v61 = vld [vmem:[#allocation7_spill] sm:$0xff] }
 0x194   : > { %5062 = vst [vmem:[#allocation18_spill] sm:$0xff] %v4602_v13  ;;  %v1318_v52 = vmin.f32 %v1158_v22, 6.0  ;;  %v1237_v7 = vmax.f32 %v991_v44, 0.0  ;;  %v4605_v19 = vpop.f32.mrb[81].mxu0  ;;  %v1876_v26 = vadd.f32 %v1566_v34, %v1556_v33  ;;  %v1654_v12 = vmul.f32 %v3939_v5, %v1396_v57 }
 0x195   : > { %v1863_v40 = vadd.f32 %v1862_v3, %v1645_v31  ;;  %v1159_v4 = vmax.f32 %v1064_v27, 0.0  ;;  %v4608_v30 = vpop.f32.mrb[82].mxu0  ;;  %v1930_v0 = vcombine.low %v1812_v51, %v1833_v50  ;;  %v1897_v60 = vadd.f32 %v1567_v42, %v1557_v16  ;;  %v5064_v3 = vld [vmem:[#allocation16_spill] sm:$0xff]  ;;  %v5067_v50 = vld [vmem:[#allocation11_spill] sm:$0xff] }
 0x196   : > { %v1576_v35 = vmul.f32 %v5063_v61, %v1318_v52  ;;  %v1397_v38 = vmin.f32 %v1237_v7, 6.0  ;;  %v4611_v13 = vpop.f32.mrb[83].mxu0  ;;  %v1843_v17 = vadd.f32 %v1842_v11, %v1654_v12  ;;  %v993_v43 = vadd.f32 %v4451_v2, %v3970_v24 }
 0x197   : > { %v1319_v47 = vmin.f32 %v1159_v4, 6.0  ;;  %v1066_v33 = vadd.f32 %v4453_v37, %v4552_v59  ;;  %v4618_v1 = vrot.slane %v1930_v0, %v5064_v3  ;;  %v995_v16 = vadd.f32 %v4456_v54, %v3974_v25  ;;  %v5066_v37 = vld [vmem:[#allocation10_spill] sm:$0xff] }
 0x198   : > { %v1877_v22 = vadd.f32 %v1876_v26, %v1576_v35  ;;  %v1655_v51 = vmul.f32 %v3939_v5, %v1397_v38  ;;  %v1246_v34 = vmax.f32 %v993_v43, 0.0  ;;  %v1068_v31 = vadd.f32 %v4458_v20, %v4564_v62  ;;  %v5068_v35 = vld [vmem:[#allocation25_spill] sm:$0xff] }
 0x199   : > { %5065 = vst [vmem:[#allocation19_spill] sm:$0xff] %v4618_v1  ;;  %v1577_v44 = vmul.f32 %v5063_v61, %v1319_v47  ;;  %v1168_v11 = vmax.f32 %v1066_v33, 0.0  ;;  %v1247_v57 = vmax.f32 %v995_v16, 0.0  ;;  %v999_v27 = vadd.f32 %v5066_v37, %v3970_v24  ;;  %v5069_v47 = vld [vmem:[#allocation8_spill] sm:$0xff] }
 0x19a   : > { %v1864_v2 = vadd.f32 %v1863_v40, %v1655_v51  ;;  %v1072_v42 = vadd.f32 %v5067_v50, %v4552_v59  ;;  %v1406_v7 = vmin.f32 %v1246_v34, 6.0  ;;  %v1169_v12 = vmax.f32 %v1068_v31, 0.0 }
 0x19b   : > { %v1898_v52 = vadd.f32 %v1897_v60, %v1577_v44  ;;  %v1328_v26 = vmin.f32 %v1168_v11, 6.0  ;;  %v4630_v54 = vpop.f32.mrb[84].mxu0  ;;  %v1407_v4 = vmin.f32 %v1247_v57, 6.0  ;;  %v1256_v0 = vmax.f32 %v999_v27, 0.0  ;;  %v5070_v60 = vld [vmem:[#allocation26_spill] sm:$0xff] }
 0x19c   : > { %v1178_v61 = vmax.f32 %v1072_v42, 0.0  ;;  %v1001_v20 = vadd.f32 %v5068_v35, %v3974_v25  ;;  %v4634_v40 = vpop.f32.mrb[85].mxu0  ;;  %v1664_v38 = vmul.f32 %v5047_v21, %v1406_v7  ;;  %v1329_v33 = vmin.f32 %v1169_v12, 6.0  ;;  %v5072_v12 = vld [vmem:[#allocation9_spill] sm:$0xff] }
 0x19d   : > { %v1586_v43 = vmul.f32 %v5069_v47, %v1328_v26  ;;  %v1074_v51 = vadd.f32 %v5070_v60, %v4564_v62  ;;  %v4640_v16 = vpop.f32.mrb[86].mxu0  ;;  %v1665_v44 = vmul.f32 %v5047_v21, %v1407_v4  ;;  %v1416_v34 = vmin.f32 %v1256_v0, 6.0  ;;  %v5073_v4 = vld [vmem:[#allocation15_spill] sm:$0xff] }
 0x19e   : > { %v1338_v11 = vmin.f32 %v1178_v61, 6.0  ;;  %v1257_v31 = vmax.f32 %v1001_v20, 0.0  ;;  %v4643_v57 = vpop.f32.mrb[87].mxu0  ;;  %v1844_v37 = vadd.f32 %v1843_v17, %v1664_v38  ;;  %v1587_v50 = vmul.f32 %v5069_v47, %v1329_v33  ;;  %v5074_v61 = vld [vmem:[#allocation22_spill] sm:$0xff] }
 0x19f   : > { %5071 = vst [vmem:[#allocation6_spill] sm:$0xff] %v4643_v57  ;;  %v1878_v27 = vadd.f32 %v1877_v22, %v1586_v43  ;;  %v1179_v42 = vmax.f32 %v1074_v51, 0.0  ;;  %v1865_v7 = vadd.f32 %v1864_v2, %v1665_v44  ;;  %v1674_v26 = vmul.f32 %v5053_v8, %v1416_v34 }
 0x1a0   : > { %v1596_v35 = vmul.f32 %v5072_v12, %v1338_v11  ;;  %v1417_v60 = vmin.f32 %v1257_v31, 6.0  ;;  %v1899_v1 = vadd.f32 %v1898_v52, %v1587_v50  ;;  %v1003_v0 = vadd.f32 %v5073_v4, %v3970_v24  ;;  %v5075_v52 = vld [vmem:[#allocation27_spill] sm:$0xff] }
 0x1a1   : > { %v1339_v3 = vmin.f32 %v1179_v42, 6.0  ;;  %v1076_v20 = vadd.f32 %v5074_v61, %v4552_v59  ;;  %v1845_v57 = vadd.f32 %v1844_v37, %v1674_v26  ;;  %v1005_v2 = vadd.f32 %v4494_v63, %v3974_v25 }
 0x1a2   : > { %v1879_v17 = vadd.f32 %v1878_v27, %v1596_v35  ;;  %v1675_v22 = vmul.f32 %v5053_v8, %v1417_v60  ;;  %v1266_v47 = vmax.f32 %v1003_v0, 0.0  ;;  %v1078_v33 = vadd.f32 %v5075_v52, %v4564_v62 }
 0x1a3   : > { %v1597_v38 = vmul.f32 %v5072_v12, %v1339_v3  ;;  %v1188_v43 = vmax.f32 %v1076_v20, 0.0  ;;  %v1267_v44 = vmax.f32 %v1005_v2, 0.0  ;;  %v1009_v34 = vadd.f32 %v4511_v56, %v3970_v24 }
 0x1a4   : > { %v1866_v51 = vadd.f32 %v1865_v7, %v1675_v22  ;;  %v1082_v11 = vadd.f32 %v4513_v14, %v4552_v59  ;;  %v1426_v37 = vmin.f32 %v1266_v47, 6.0  ;;  %v1189_v50 = vmax.f32 %v1078_v33, 0.0 }
 0x1a5   : > { %v1900_v31 = vadd.f32 %v1899_v1, %v1597_v38  ;;  %v1348_v27 = vmin.f32 %v1188_v43, 6.0  ;;  %v1427_v63 = vmin.f32 %v1267_v44, 6.0  ;;  %v1276_v42 = vmax.f32 %v1009_v34, 0.0 }
 0x1a6   : > { %v1198_v3 = vmax.f32 %v1082_v11, 0.0  ;;  %v1011_v26 = vadd.f32 %v4517_v6, %v3974_v25  ;;  %v1684_v12 = vmul.f32 %v5054_v45, %v1426_v37  ;;  %v1349_v35 = vmin.f32 %v1189_v50, 6.0 }
 0x1a7   : > { %v1606_v7 = vmul.f32 %v5041_v9, %v1348_v27  ;;  %v1084_v56 = vadd.f32 %v4519_v15, %v4564_v62  ;;  %v1685_v14 = vmul.f32 %v5054_v45, %v1427_v63  ;;  %v1436_v1 = vmin.f32 %v1276_v42, 6.0 }
 0x1a8   : > { %v1358_v60 = vmin.f32 %v1198_v3, 6.0  ;;  %v1277_v4 = vmax.f32 %v1011_v26, 0.0  ;;  %v1846_v0 = vadd.f32 %v1845_v57, %v1684_v12  ;;  %v1607_v20 = vmul.f32 %v5041_v9, %v1349_v35 }
 0x1a9   : > { %v1880_v61 = vadd.f32 %v1879_v17, %v1606_v7  ;;  %v1199_v22 = vmax.f32 %v1084_v56, 0.0  ;;  %v1867_v2 = vadd.f32 %v1866_v51, %v1685_v14  ;;  %v1694_v6 = vmul.f32 %v5056_v39, %v1436_v1 }
 0x1aa   : > { %v1616_v38 = vmul.f32 %v5042_v23, %v1358_v60  ;;  %v1437_v47 = vmin.f32 %v1277_v4, 6.0  ;;  %v1901_v43 = vadd.f32 %v1900_v31, %v1607_v20  ;;  %v1013_v15 = vadd.f32 %v4523_v46, %v3970_v24  ;;  %v5076_v31 = vld [vmem:[#allocation23_spill] sm:$0xff] }
 0x1ab   : > { %v1359_v52 = vmin.f32 %v1199_v22, 6.0  ;;  %v1086_v33 = vadd.f32 %v4525_v32, %v4552_v59  ;;  %v1847_v44 = vadd.f32 %v1846_v0, %v1694_v6  ;;  %v1015_v11 = vadd.f32 %v4529_v49, %v3974_v25  ;;  %v5077_v49 = vld [vmem:[#allocation20_spill] sm:$0xff] }
 0x1ac   : > { %v1881_v57 = vadd.f32 %v1880_v61, %v1616_v38  ;;  %v1695_v17 = vmul.f32 %v5056_v39, %v1437_v47  ;;  %v1286_v51 = vmax.f32 %v1013_v15, 0.0  ;;  %v1088_v27 = vadd.f32 %v5076_v31, %v4564_v62 }
 0x1ad   : > { %v1617_v9 = vmul.f32 %v5042_v23, %v1359_v52  ;;  %v1208_v34 = vmax.f32 %v1086_v33, 0.0  ;;  %v1092_v24 = vadd.f32 %v4548_v10, %v4552_v59  ;;  %v1094_v46 = vadd.f32 %v4554_v18, %v4564_v62  ;;  %v5078_v10 = vld [vmem:[#allocation17_spill] sm:$0xff] }
 0x1ae   : > { %v1868_v37 = vadd.f32 %v1867_v2, %v1695_v17  ;;  %v1446_v50 = vmin.f32 %v1286_v51, 6.0  ;;  %v1287_v42 = vmax.f32 %v1015_v11, 0.0  ;;  %v1209_v23 = vmax.f32 %v1088_v27, 0.0 }
 0x1af   : > { %v1902_v32 = vadd.f32 %v1901_v43, %v1617_v9  ;;  %v1368_v63 = vmin.f32 %v1208_v34, 6.0  ;;  %v1218_v3 = vmax.f32 %v1092_v24, 0.0  ;;  %v1219_v26 = vmax.f32 %v1094_v46, 0.0 }
 0x1b0   : > { %v1096_v25 = vadd.f32 %v4558_v36, %v4552_v59  ;;  %v1704_v12 = vmul.f32 %v5077_v49, %v1446_v50  ;;  %v1447_v35 = vmin.f32 %v1287_v42, 6.0  ;;  %v1098_v56 = vadd.f32 %v5078_v10, %v4564_v62  ;;  %v5079_v50 = vld [vmem:[#allocation18_spill] sm:$0xff] }
 0x1b1   : > { %v1626_v7 = vmul.f32 %v3911_v53, %v1368_v63  ;;  %v1369_v14 = vmin.f32 %v1209_v23, 6.0  ;;  %v1378_v18 = vmin.f32 %v1218_v3, 6.0  ;;  %v1379_v1 = vmin.f32 %v1219_v26, 6.0 }
 0x1b2   : > { %v1228_v60 = vmax.f32 %v1096_v25, 0.0  ;;  %v1848_v4 = vadd.f32 %v1847_v44, %v1704_v12  ;;  %v1705_v61 = vmul.f32 %v5077_v49, %v1447_v35  ;;  %v1229_v20 = vmax.f32 %v1098_v56, 0.0 }
 0x1b3   : > { %v1882_v0 = vadd.f32 %v1881_v57, %v1626_v7  ;;  %v1627_v22 = vmul.f32 %v3911_v53, %v1369_v14  ;;  %v1636_v36 = vmul.f32 %v3916_v55, %v1378_v18  ;;  %v1637_v2 = vmul.f32 %v3916_v55, %v1379_v1 }
 0x1b4   : > { %v1388_v6 = vmin.f32 %v1228_v60, 6.0  ;;  %v1849_v38 = vrot.slane %v1848_v4, 4  ;;  %v1869_v47 = vadd.f32 %v1868_v37, %v1705_v61  ;;  %v1389_v43 = vmin.f32 %v1229_v20, 6.0 }
 0x1b5   : > { %v1102_v52 = vadd.f32 %v4575_v48, %v4552_v59  ;;  %v1903_v15 = vadd.f32 %v1902_v32, %v1627_v22  ;;  %v1883_v33 = vadd.f32 %v1882_v0, %v1636_v36  ;;  %v1104_v57 = vadd.f32 %v4578_v41, %v4564_v62 }
 0x1b6   : > { %v1646_v44 = vmul.f32 %v3918_v58, %v1388_v6  ;;  %v1850_v17 = vadd.f32 %v1849_v38, %v1848_v4  ;;  %v1870_v53 = vrot.slane %v1869_v47, 4  ;;  %v1647_v9 = vmul.f32 %v3918_v58, %v1389_v43 }
 0x1b7   : > { %v1238_v51 = vmax.f32 %v1102_v52, 0.0  ;;  %v1904_v55 = vadd.f32 %v1903_v15, %v1637_v2  ;;  %v1239_v11 = vmax.f32 %v1104_v57, 0.0  ;;  %v1106_v37 = vadd.f32 %v4584_v28, %v4552_v59 }
 0x1b8   : > { %v1884_v34 = vadd.f32 %v1883_v33, %v1646_v44  ;;  %v1851_v31 = vrot.slane %v1850_v17, 2  ;;  %v1871_v48 = vadd.f32 %v1870_v53, %v1869_v47  ;;  %v1108_v24 = vadd.f32 %v4590_v29, %v4564_v62 }
 0x1b9   : > { %v1398_v27 = vmin.f32 %v1238_v51, 6.0  ;;  %v1905_v46 = vadd.f32 %v1904_v55, %v1647_v9  ;;  %v1399_v32 = vmin.f32 %v1239_v11, 6.0  ;;  %v1248_v41 = vmax.f32 %v1106_v37, 0.0  ;;  %v5084_v11 = vld [vmem:[#allocation6_spill] sm:$0xff] }
 0x1ba   : > { %v1112_v63 = vadd.f32 %v5079_v50, %v4552_v59  ;;  %v1852_v58 = vadd.f32 %v1851_v31, %v1850_v17  ;;  %v1872_v42 = vrot.slane %v1871_v48, 2  ;;  %v1249_v3 = vmax.f32 %v1108_v24, 0.0  ;;  %v5085_v31 = vld [vmem:[#allocation19_spill] sm:$0xff] }
 0x1bb   : > { %v1656_v23 = vmul.f32 %v3939_v5, %v1398_v27  ;;  %v1657_v26 = vmul.f32 %v3939_v5, %v1399_v32  ;;  %v1408_v28 = vmin.f32 %v1248_v41, 6.0  ;;  %v1114_v12 = vadd.f32 %v4605_v19, %v4564_v62  ;;  %v3439_v9 = vld [vmem:[%s4975_s4 + $0x270] sm:$0xff]  }
 0x1bc   : > { %v1258_v25 = vmax.f32 %v1112_v63, 0.0  ;;  %v1853_v7 = vrot.slane %v1852_v58, 1  ;;  %v1873_v29 = vadd.f32 %v1872_v42, %v1871_v48  ;;  %v1409_v10 = vmin.f32 %v1249_v3, 6.0  ;;  %v5086_v63 = vld [vmem:[#allocation21_spill] sm:$0xff] }
 0x1bd   : > { %v1885_v35 = vadd.f32 %v1884_v34, %v1656_v23  ;;  %v1906_v56 = vadd.f32 %v1905_v46, %v1657_v26  ;;  %v1666_v14 = vmul.f32 %v5047_v21, %v1408_v28  ;;  %v1259_v1 = vmax.f32 %v1114_v12, 0.0 }
 0x1be   : > { %v1418_v18 = vmin.f32 %v1258_v25, 6.0  ;;  %v1854_v60 = vadd.f32 %v1853_v7, %v1852_v58  ;;  %v1874_v4 = vrot.slane %v1873_v29, 1  ;;  %v1667_v0 = vmul.f32 %v5047_v21, %v1409_v10  ;;  %v5087_v58 = vld [vmem:[#allocation24_spill] sm:$0xff]  ;;  %v5089_v10 = vld [vmem:[#allocation14_spill] sm:$0xff] }
 0x1bf   : > { %v1116_v5 = vadd.f32 %v4608_v30, %v4552_v59  ;;  %v1886_v61 = vadd.f32 %v1885_v35, %v1666_v14  ;;  %v1419_v19 = vmin.f32 %v1259_v1, 6.0  ;;  %v1118_v22 = vadd.f32 %v4611_v13, %v4564_v62  ;;  %v5090_v14 = vld [vmem:[#allocation12_spill] sm:$0xff] }
 0x1c0   : > { %v1676_v20 = vmul.f32 %v5053_v8, %v1418_v18  ;;  %v1875_v36 = vadd.f32 %v1874_v4, %v1873_v29  ;;  %v1907_v2 = vadd.f32 %v1906_v56, %v1667_v0  ;;  %v1122_v38 = vadd.f32 %v4630_v54, %v4552_v59  ;;  %v5083_v54 = vld [vmem:[#allocation16_spill] sm:$0xff] }
 0x1c1   : > { %v1268_v6 = vmax.f32 %v1116_v5, 0.0  ;;  %v1677_v43 = vmul.f32 %v5053_v8, %v1419_v19  ;;  %v1269_v21 = vmax.f32 %v1118_v22, 0.0  ;;  %v1124_v30 = vadd.f32 %v4634_v40, %v4564_v62 }
 0x1c2   : > { %v1887_v47 = vadd.f32 %v1886_v61, %v1676_v20  ;;  %v1931_v52 = vcombine.low %v1854_v60, %v1875_v36  ;;  %v1278_v33 = vmax.f32 %v1122_v38, 0.0  ;;  %v1126_v44 = vadd.f32 %v4640_v16, %v4552_v59  ;;  %v5092_v60 = vld [vmem:[#allocation13_spill] sm:$0xff] }
 0x1c3   : > { %v1428_v15 = vmin.f32 %v1268_v6, 6.0  ;;  %v1908_v13 = vadd.f32 %v1907_v2, %v1677_v43  ;;  %v1429_v57 = vmin.f32 %v1269_v21, 6.0  ;;  %v1279_v17 = vmax.f32 %v1124_v30, 0.0  ;;  %v3416_v6 = vld [vmem:[%s4975_s4 + $0x80] sm:$0xff]   ;;  %v3418_v21 = vld [vmem:[%s4975_s4 + $0xc8] sm:$0xff]  }
 0x1c4   : > { %v5080_v53 = vlaneseq  ;;  %v1959_v8 = vrot.slane %v1931_v52, %v5083_v54  ;;  %v1438_v55 = vmin.f32 %v1278_v33, 6.0  ;;  %v1288_v40 = vmax.f32 %v1126_v44, 0.0  ;;  %v3417_v38 = vld [vmem:[%s4975_s4 + $0x200] sm:$0xff]   ;;  %v3419_v52 = vld [vmem:[%s4975_s4 + $0x248] sm:$0xff]  }
 0x1c5   : > { %v1686_v51 = vmul.f32 %v5054_v45, %v1428_v15  ;;  %v3544_v34 = vmov 0.0   ;;  %v1687_v59 = vmul.f32 %v5054_v45, %v1429_v57  ;;  %v1439_v16 = vmin.f32 %v1279_v17, 6.0  ;;  %v3421_v57 = vld [vmem:[%s4975_s4 + $0x208] sm:$0xff]  }
 0x1c6   : > { %vm4727_vm1 = vcmp.lt.s32.totalorder %v5080_v53, 256  ;;  %v1128_v37 = vadd.f32 %v5084_v11, %v4564_v62  ;;  %v1961_v48 = vcombine.low %v5085_v31, %v1959_v8  ;;  %v1696_v24 = vmul.f32 %v5056_v39, %v1438_v55  ;;  %v3422_v53 = vld [vmem:[%s4975_s4 + $0xd0] sm:$0xff]   ;;  %v3427_v11 = vld [vmem:[%s4975_s4 + $0x258] sm:$0xff]  }
 0x1c7   : > { %309 = vst.msk [vmem:[#allocation2 + $0x8] sm:$0x3] %vm4727_vm1, %v3544_v34  ;;  %v1888_v27 = vadd.f32 %v1887_v47, %v1686_v51  ;;  %v1448_v46 = vmin.f32 %v1288_v40, 6.0  ;;  %v1909_v32 = vadd.f32 %v1908_v13, %v1687_v59  ;;  %v1697_v41 = vmul.f32 %v5056_v39, %v1439_v16  ;;  %v3420_v13 = vld [vmem:[%s4975_s4 + $0x88] sm:$0xff]   ;;  %v3423_v8 = vld [vmem:[%s4975_s4 + $0x250] sm:$0xff]   ;;  %v3426_v16 = vld [vmem:[%s4975_s4 + $0xd8] sm:$0xff]  }
 0x1c8   : > { %v1289_v50 = vmax.f32 %v1128_v37, 0.0  ;;  %v5088_v42 = vcombine.low %v5086_v63, %v5087_v58  ;;  %v1975_v45 = vrot.slane %v1961_v48, %v5083_v54  ;;  %v5091_v18 = vsub.s32 5, %v5090_v14  ;;  %v3424_v40 = vld [vmem:[%s4975_s4 + $0x90] sm:$0xff]   ;;  %v3428_v31 = vld [vmem:[%s4975_s4 + $0x98] sm:$0xff]   ;;  %v3433_v63 = vld [vmem:[%s4975_s4 + $0x220] sm:$0xff]  }
 0x1c9   : > { %v1889_v3 = vadd.f32 %v1888_v27, %v1696_v24  ;;  %v1706_v62 = vmul.f32 %v5077_v49, %v1448_v46  ;;  %v1910_v26 = vadd.f32 %v1909_v32, %v1697_v41  ;;  %v5093_v5 = vsub.s32 4, %v5090_v14  ;;  %v3425_v34 = vld [vmem:[%s4975_s4 + $0x210] sm:$0xff]   ;;  %v3429_v48 = vld [vmem:[%s4975_s4 + $0x218] sm:$0xff]   ;;  %v3430_v24 = vld [vmem:[%s4975_s4 + $0xe0] sm:$0xff]  }
 0x1ca   : > { %v1968_v23 = vrot.slane %v5088_v42, %v5083_v54  ;;  %v1449_v28 = vmin.f32 %v1289_v50, 6.0  ;;  %v3431_v46 = vld [vmem:[%s4975_s4 + $0x260] sm:$0xff]   ;;  %v3434_v42 = vld [vmem:[%s4975_s4 + $0xe8] sm:$0xff]  }
 0x1cb   : > { %v1890_v12 = vadd.f32 %v1889_v3, %v1706_v62  ;;  %v3432_v50 = vld [vmem:[%s4975_s4 + $0xa0] sm:$0xff]   ;;  %v3438_v3 = vld [vmem:[%s4975_s4 + $0xf0] sm:$0xff]  }
 0x1cc   : > { %v4747_v25 = vcombine.low %v1968_v23, %v1975_v45  ;;  %v1707_v7 = vmul.f32 %v5077_v49, %v1449_v28  ;;  %v5094_v49 = vsub.s32 3, %v5090_v14  ;;  %v3436_v23 = vld [vmem:[%s4975_s4 + $0xa8] sm:$0xff]   ;;  %v3440_v62 = vld [vmem:[%s4975_s4 + $0xb0] sm:$0xff]   ;;  %v3442_v28 = vld [vmem:[%s4975_s4 + $0xf8] sm:$0xff]  }
 0x1cd   : > { %v1891_v29 = vrot.slane %v1890_v12, 4  ;;  %v3437_v45 = vld [vmem:[%s4975_s4 + $0x228] sm:$0xff]  }
 0x1ce   : > { %v1911_v39 = vadd.f32 %v1910_v26, %v1707_v7  ;;  %v2016_v56 = vrot.slane %v4747_v25, %v5089_v10  ;;  %v2032_v1 = vrot.slane %v4747_v25, %v5091_v18  ;;  %v2012_v4 = vrot.slane %v4747_v25, %v5092_v60  ;;  %v1451_v32 = vld [vmem:[#allocation2 + $0x8] sm:$0x3]  ;;  %v3441_v26 = vld [vmem:[%s4975_s4 + $0x230] sm:$0xff]  }
 0x1cf   : > { %v1892_v35 = vadd.f32 %v1891_v29, %v1890_v12  ;;  %v2028_v61 = vrot.slane %v4747_v25, %v5093_v5  ;;  %v2024_v20 = vrot.slane %v4747_v25, %v5094_v49  ;;  %v3443_v12 = vld [vmem:[%s4975_s4 + $0x278] sm:$0xff]  }
 0x1d0   : > { %v1912_v0 = vrot.slane %v1911_v39, 4  ;;  %v2060_v22 = vpack.c.bf16 %v2016_v56, %v2016_v56  ;;  %v2064_v36 = vpack.c.bf16 %v2032_v1, %v2032_v1  ;;  %v2059_v2 = vpack.c.bf16 %v2012_v4, %v2012_v4  ;;  %v3445_v56 = vld [vmem:[%s4975_s4 + $0x238] sm:$0xff]  }
 0x1d1   : > { %v1893_v19 = vrot.slane %v1892_v35, 2  ;;  %v2063_v43 = vpack.c.bf16 %v2028_v61, %v2028_v61  ;;  %v2062_v33 = vpack.c.bf16 %v2024_v20, %v2024_v20  ;;  %v5095_v1 = vsub.s32 2, %v5090_v14  ;;  %v3447_v61 = vld [vmem:[%s4975_s4 + $0x180] sm:$0xff]   ;;  %v3448_v20 = vld [vmem:[%s4975_s4 + $0x1c8] sm:$0xff]  }
 0x1d2   : > { %v1913_v47 = vadd.f32 %v1912_v0, %v1911_v39  ;;  %2742 = vmatprep.mubr.bf16.mxu1 %v2060_v22  ;;  %2822 = vmatprep.mubr.bf16.mxu0 %v2064_v36  ;;  %v3449_v22 = vld [vmem:[%s4975_s4 + $0x188] sm:$0xff]   ;;  %v3450_v36 = vld [vmem:[%s4975_s4 + $0x1d0] sm:$0xff]  }
 0x1d3   : > { %v1894_v30 = vadd.f32 %v1893_v19, %v1892_v35  ;;  %2743 = vmatmul.mubr.bf16.vlgmr.msra.gmra.mrb[72].mxu1 %v2059_v2  ;;  %2823 = vmatmul.mubr.bf16.vlgmr.msra.gmra.mrb[88].mxu0 %v2063_v43  ;;  %v3444_v35 = vld [vmem:[%s4975_s4 + $0xb8] sm:$0xff]   ;;  %v2020_v4 = vrot.slane %v4747_v25, %v5095_v1  ;;  %v3451_v2 = vld [vmem:[%s4975_s4 + $0x190] sm:$0xff]   ;;  %v3455_v43 = vld [vmem:[%s4975_s4 + $0x1a0] sm:$0xff]  }
 0x1d4   : > { %v1914_v15 = vrot.slane %v1913_v47, 2  ;;  %3193 = vmatpush3.bf16.msra.mxu1 %v3416_v6  ;;  %3259 = vmatpush3.bf16.msra.mxu0 %v3417_v38  ;;  %v3452_v6 = vld [vmem:[%s4975_s4 + $0x1d8] sm:$0xff]  }
 0x1d5   : > { %v1895_v44 = vrot.slane %v1894_v30, 1  ;;  %2782 = vmatprep.mubr.bf16.mxu1 %v2062_v33  ;;  %3194 = vmatprep.subr.bf16.mxu1 %v3418_v21  ;;  %v2061_v49 = vpack.c.bf16 %v2020_v4, %v2020_v4  ;;  %v3453_v38 = vld [vmem:[%s4975_s4 + $0x198] sm:$0xff]   ;;  %v3456_v21 = vld [vmem:[%s4975_s4 + $0x1e8] sm:$0xff]  }
 0x1d6   : > { %v1915_v17 = vadd.f32 %v1914_v15, %v1913_v47  ;;  %3260 = vmatprep.subr.bf16.mxu0 %v3419_v52  ;;  %v3454_v47 = vld [vmem:[%s4975_s4 + $0x1e0] sm:$0xff]   ;;  %v3458_v52 = vld [vmem:[%s4975_s4 + $0x1f0] sm:$0xff]   ;;  %v3460_v33 = vld [vmem:[%s4975_s4 + $0x1f8] sm:$0xff]  }
 0x1d7   : > { %v1896_v51 = vadd.f32 %v1895_v44, %v1894_v30  ;;  %v3457_v30 = vld [vmem:[%s4975_s4 + $0x1a8] sm:$0xff]   ;;  %v3459_v15 = vld [vmem:[%s4975_s4 + $0x1b0] sm:$0xff]   ;;  %v3461_v44 = vld [vmem:[%s4975_s4 + $0x1b8] sm:$0xff]  }
 0x1d8   : > { %v1916_v55 = vrot.slane %v1915_v17, 1  ;;  %3195 = vmatpush3.bf16.msra.mxu1 %v3420_v13  ;;  %3261 = vmatpush3.bf16.msra.mxu0 %v3421_v57  ;;  %v5097_v13 = vsub.s32 6, %v5090_v14 }
 0x1d9   : > { %3196 = vmatprep.subr.bf16.mxu1 %v3422_v53  ;;  %3262 = vmatprep.subr.bf16.mxu0 %v3423_v8 }
 0x1da   : > { %v1917_v59 = vadd.f32 %v1916_v55, %v1915_v17  ;;  %v2036_v57 = vrot.slane %v4747_v25, %v5097_v13 }
 0x1dc   : > { %v1977_v37 = vcombine.low %v1896_v51, %v1917_v59  ;;  %3197 = vmatpush3.bf16.msra.mxu1 %v3424_v40  ;;  %3263 = vmatpush3.bf16.msra.mxu0 %v3425_v34  ;;  %v2065_v17 = vpack.c.bf16 %v2036_v57, %v2036_v57 }
 0x1dd   : > { %3198 = vmatprep.subr.bf16.mxu1 %v3426_v16  ;;  %3264 = vmatprep.subr.bf16.mxu0 %v3427_v11 }
 0x1de   : > { %v1984_v27 = vrot.slane %v1977_v37, %v5083_v54 }
 0x1e0   : > { %v1991_v41 = vrot.slane %v1984_v27, %v5083_v54  ;;  %3199 = vmatpush3.bf16.msra.mxu1 %v3428_v31  ;;  %3265 = vmatpush3.bf16.msra.mxu0 %v3429_v48  ;;  %v3435_v54 = vld [vmem:[%s4975_s4 + $0x268] sm:$0xff]  }
 0x1e1   : > { %3200 = vmatprep.subr.bf16.mxu1 %v3430_v24  ;;  %3266 = vmatprep.subr.bf16.mxu0 %v3431_v46 }
 0x1e2   : > { %v1995_v58 = vadd.f32 %v1991_v41, %v1451_v32 }
 0x1e4   : > { %2001 = vst.msk [vmem:[#allocation2 + $0x8] sm:$0x3] %vm4727_vm1, %v1995_v58  ;;  %3201 = vmatpush3.bf16.msra.mxu1 %v3432_v50  ;;  %3267 = vmatpush3.bf16.msra.mxu0 %v3433_v63 }
 0x1e5   : > { %3202 = vmatprep.subr.bf16.mxu1 %v3434_v42  ;;  %3268 = vmatprep.subr.bf16.mxu0 %v3435_v54 }
 0x1e8   : > { %3203 = vmatpush3.bf16.msra.mxu1 %v3436_v23  ;;  %3269 = vmatpush3.bf16.msra.mxu0 %v3437_v45 }
 0x1e9   : > { %3204 = vmatprep.subr.bf16.mxu1 %v3438_v3  ;;  %3270 = vmatprep.subr.bf16.mxu0 %v3439_v9 }
 0x1eb   : > { %v2006_v7 = vld [vmem:[#allocation2 + $0x8] sm:$0x3] }
 0x1ec   : > { %v2044_v29 = vrot.slane %v2006_v7, %v5092_v60  ;;  %v2048_v39 = vrot.slane %v2006_v7, %v5089_v10  ;;  %3205 = vmatpush3.bf16.msra.mxu1 %v3440_v62  ;;  %3271 = vmatpush3.bf16.msra.mxu0 %v3441_v26  ;;  %v3446_v10 = vld [vmem:[%s4975_s4 + $0x1c0] sm:$0xff]   ;;  %v5096_v60 = vsub.s32 7, %v5090_v14 }
 0x1ed   : > { %3206 = vmatprep.subr.bf16.mxu1 %v3442_v28  ;;  %3272 = vmatprep.subr.bf16.mxu0 %v3443_v12  ;;  %v2229_v14 = vld [vmem:[%s4976_s5] sm:$0x1] }
 0x1ee   : > { %v2068_v18 = vpack.c.bf16 %v2048_v39, %v2048_v39  ;;  %v2040_v0 = vrot.slane %v4747_v25, %v5096_v60  ;;  %v2067_v5 = vpack.c.bf16 %v2044_v29, %v2044_v29 }
 0x1f0   : > { %2902 = vmatprep.mubr.bf16.mxu0 %v2068_v18  ;;  %3207 = vmatpush3.bf16.msra.mxu1 %v3444_v35  ;;  %v2066_v19 = vpack.c.bf16 %v2040_v0, %v2040_v0 }
 0x1f1   : > { %3273 = vmatpush3.bf16.msra.mxu0 %v3445_v56  ;;  %3236 = vmatprep.subr.bf16.mxu1 %v3446_v10 }
 0x1f3   : > { %2783 = vmatmul.mubr.bf16.vlgmr.msra.gmra.mrb[76].mxu1 %v2061_v49 }
 0x1f4   : > { %2903 = vmatmul.mubr.bf16.vlgmr.msra.gmra.mrb[92].mxu0 %v2067_v5  ;;  %3237 = vmatpush3.bf16.msra.mxu1 %v3447_v61 }
 0x1f5   : > { %2862 = vmatprep.mubr.bf16.mxu1 %v2066_v19  ;;  %3238 = vmatprep.subr.bf16.mxu1 %v3448_v20 }
 0x1f8   : > { %3239 = vmatpush3.bf16.msra.mxu1 %v3449_v22 }
 0x1f9   : > { %3240 = vmatprep.subr.bf16.mxu1 %v3450_v36 }
 0x1fc   : > { %3241 = vmatpush3.bf16.msra.mxu1 %v3451_v2 }
 0x1fd   : > { %3242 = vmatprep.subr.bf16.mxu1 %v3452_v6 }
 0x200   : > { %3243 = vmatpush3.bf16.msra.mxu1 %v3453_v38 }
 0x201   : > { %3244 = vmatprep.subr.bf16.mxu1 %v3454_v47 }
 0x204   : > { %3245 = vmatpush3.bf16.msra.mxu1 %v3455_v43 }
 0x205   : > { %3246 = vmatprep.subr.bf16.mxu1 %v3456_v21 }
 0x208   : > { %3247 = vmatpush3.bf16.msra.mxu1 %v3457_v30 }
 0x209   : > { %3248 = vmatprep.subr.bf16.mxu1 %v3458_v52 }
 0x20c   : > { %3249 = vmatpush3.bf16.msra.mxu1 %v3459_v15 }
 0x20d   : > { %3250 = vmatprep.subr.bf16.mxu1 %v3460_v33 }
 0x210   : > { %3251 = vmatpush3.bf16.msra.mxu1 %v3461_v44 }
 0x213   : > { %2863 = vmatmul.mubr.bf16.vlgmr.msra.gmra.mrb[80].mxu1 %v2065_v17 }
 0x2a6   : > { %v3186_v53 = vpop.f32.mrb[72].mxu1  ;;  %v3230_v8 = vpop.f32.mrb[88].mxu0 }
 0x2a7   : > { %v3187_v51 = vpop.f32.mrb[73].mxu1  ;;  %v3231_v55 = vpop.f32.mrb[89].mxu0 }
 0x2a8   : > { %v3188_v40 = vadd.f32 %v3187_v51, %v3186_v53  ;;  %v3232_v34 = vadd.f32 %v3231_v55, %v3230_v8  ;;  %v3189_v59 = vpop.f32.mrb[74].mxu1  ;;  %v3233_v16 = vpop.f32.mrb[90].mxu0 }
 0x2a9   : > { %v3190_v11 = vpop.f32.mrb[75].mxu1  ;;  %v3234_v37 = vpop.f32.mrb[91].mxu0 }
 0x2aa   : > { %v2745_v24 = vadd.f32 %v3188_v40, %v2229_v14 }
 0x2c6   : > { %v3208_v31 = vpop.f32.mrb[76].mxu1 }
 0x2c7   : > { %v3274_v25 = vpop.f32.mrb[92].mxu0  ;;  %v3209_v48 = vpop.f32.mrb[77].mxu1 }
 0x2c8   : > { %v3275_v27 = vpop.f32.mrb[93].mxu0  ;;  %v3210_v46 = vadd.f32 %v3209_v48, %v3208_v31  ;;  %v3211_v41 = vpop.f32.mrb[78].mxu1 }
 0x2c9   : > { %v3276_v32 = vadd.f32 %v3275_v27, %v3274_v25  ;;  %v3277_v50 = vpop.f32.mrb[94].mxu0  ;;  %v3212_v63 = vpop.f32.mrb[79].mxu1 }
 0x2ca   : > { %v3278_v58 = vpop.f32.mrb[95].mxu0  ;;  %v2785_v42 = vadd.f32 %v3210_v46, %v2745_v24 }
 0x2cc   : > { %v2825_v54 = vadd.f32 %v3232_v34, %v2785_v42 }
 0x2e6   : > { %v3252_v23 = vpop.f32.mrb[80].mxu1 }
 0x2e7   : > { %v3253_v45 = vpop.f32.mrb[81].mxu1 }
 0x2e8   : > { %v3254_v3 = vadd.f32 %v3253_v45, %v3252_v23  ;;  %v3255_v9 = vpop.f32.mrb[82].mxu1 }
 0x2e9   : > { %v3256_v62 = vpop.f32.mrb[83].mxu1 }
 0x2ea   : > { %v2865_v26 = vadd.f32 %v3254_v3, %v2825_v54 }
 0x2ec   : > { %v2905_v28 = vadd.f32 %v3276_v32, %v2865_v26 }
 0x2ee   : > { %v2910_v12 = vmax.f32 %v2905_v28, 0.0 }
 0x2f0   : > { %2912 = vst.msk [vmem:[%s282_s27] sm:$0x1] %vm2911_vm2, %v2910_v12 }
 0x2f1   : > { %3475 = shalt.err (!%p3472_p5)
}
 0x2f2   : > { %s3476_s16 = scalar_lea.hbm %s4924_s12, 16  ;;  %s3480_s19 = scalar_lea.hbm %s4977_s6, 32 }
 0x2f3   : > { %p3477_p6 = scmp.ne.s32.totalorder %s4924_s12, %s3476_s16  ;;  %p3481_p10 = scmp.lt.u32.totalorder %s4924_s12, %s4977_s6 }
 0x2f4   : > { %p3482_p11 = scmp.lt.u32.totalorder %s3480_s19, %s3476_s16  ;;  %p3484_p13 = scmp.lt.u32.totalorder %s3476_s16, %s4924_s12 }
 0x2f5   : > { %p3478_p7 = pnand %p3477_p6, %p3621_p4 }
 0x2f6   : > { %p3483_p12 = por %p3482_p11, %p3481_p10 }
 0x2f7   : > { %p3479_p9 = pneg %p3478_p7 }
 0x2f8   : > { %p3485_p0 = por %p3484_p13, %p3483_p12 }
 0x2fa   : > { %p3486_p1 = pnand %p3485_p0, %p3479_p9 }
 0x2fc   : > { %3489 = shalt.err (!%p3486_p1)
}
 0x2fd   : > { %3284 = dma.vmem_to_hbm [thread:$0]  (%p3621_p4), %s4926_s28, 16, %s4924_s12, %s2914_s13  }
 0x2fe PF: > { %p3290_p2 = scmp.ge.s32.totalorder %s3540_s26, 2  ;;  %s2938_s30 = sand.u32 1, %s3520_s21  }
 0x2ff   : > { %s2939_s8 = scalar_lea.sflag [#allocation4], %s2938_s30 }
 0x300   : > { %p3287_p3 = pnand %p3290_p2, %p3628_p8 }
 0x302   : > { %3515 = dma.done.wait (!%p3287_p3), %s2939_s8, 16  }
 0x303   : > { %3517 = vsyncadd (!%p3287_p3), %s2939_s8, 4294967280  ;;  %s19_s26 = sadd.s32 1, %s3540_s26   ;;  %s5098_s21 = smov %s3524_s22 }
 0x304   : > { %p16_p5 = scmp.ge.s32.totalorder %s19_s26, 4   ;;  %s5099_s22 = smov %s3528_s23 }
 0x305   : > { %s5100_s23 = smov %s3634_s10  ;;  %s5101_s24 = smov %s3536_s25 }
 0x306   : > { %s5102_s25 = smov %s5104_s29  ;;  %18 = sbr.rel (!%p16_p5) target bundleno = 4 (0x4), region = 90 }
 0x30d   :  { %2943 = vsyncpa [#allocation4], 1 }
 0x30e   :  { %2945 = vsyncpa [#allocation4 + $0x1], 1 }

</bundles_post_ra>
